<compile_context>
chip_gen: v7x
topology: tpu7x:2x2x1
jax: 0.10.0
libtpu: 0.0.40
codegen_flags: <defaults>
</compile_context>

<pallas_src>
import functools

import jax
import jax.numpy as jnp
from jax.experimental import pallas as pl
from jax.experimental.pallas import tpu as pltpu

LANES = 128


def _round_up(x, m):
    return (x + m - 1) // m * m


def node_model_kernel(start_blk_ref, num_blk_ref,          # scalar prefetch (SMEM)
                      edge_src_ref, nodes_ref, edges_ref,
                      w0a_ref, w0b_ref, b0_ref, w1_ref, b1_ref,
                      w2_ref, b2_ref, w3_ref, b3_ref,
                      out_ref, acc_ref, *, dim, tile_n):
    i = pl.program_id(0)           # row (node) tile
    e = pl.program_id(1)           # edge-block step within this row tile

    @pl.when(e == 0)
    def _init():
        acc_ref[...] = jnp.zeros_like(acc_ref)

    @pl.when(e < num_blk_ref[i])
    def _accumulate():
        # Segment-sum of this tile's edge block on the MXU:
        #   onehot (tile_n, tile_e) @ edges (tile_e, 128).
        # Edges whose source lies outside [row0, row0+tile_n) (boundary blocks, padding)
        # match no row and add 0.  edges lane `dim` holds 1.0 for every real edge, so
        # acc[:, dim] accumulates the per-node edge count in the very same matmul.
        row0 = i * tile_n
        node_col = row0 + jax.lax.broadcasted_iota(jnp.int32, (tile_n, 1), 0)
        onehot = (node_col == edge_src_ref[...]).astype(jnp.bfloat16)   # exact 0/1 in bf16
        acc_ref[...] += jnp.dot(onehot, edges_ref[...],
                                preferred_element_type=jnp.float32)

    @pl.when(e == pl.num_programs(1) - 1)
    def _finalize():
        agg = acc_ref[...]                          # (tile_n, 128) f32
        counts = agg[:, dim:dim + 1]                # per-node edge count
        # zero-degree nodes: max(count, 1) -> mean 0, matching torch_scatter.scatter_mean.
        inv = 1.0 / jnp.maximum(counts, 1.0)
        # lanes > dim of agg are exactly 0.0 (edges_p is zero-padded) and lane `dim`
        # (the count) multiplies zero rows of w0b, so the padding never leaks into h0.
        v_e = (agg * inv).astype(jnp.bfloat16)

        # layer 0 without the concat: split weight, accumulate two MXU dots in f32.
        h = (jnp.dot(nodes_ref[...], w0a_ref[...], preferred_element_type=jnp.float32)
             + jnp.dot(v_e, w0b_ref[...], preferred_element_type=jnp.float32)
             + b0_ref[...])
        h = jnp.maximum(h, 0.0)
        for w_ref, b_ref in ((w1_ref, b1_ref), (w2_ref, b2_ref), (w3_ref, b3_ref)):
            h = jnp.dot(h.astype(jnp.bfloat16), w_ref[...],
                        preferred_element_type=jnp.float32) + b_ref[...]
            h = jnp.maximum(h, 0.0)
        out_ref[...] = h.astype(out_ref.dtype)


def node_model_forward(nodes, edge_index, edges, params, *, tile_n=256, tile_e=2048):
    """params: 4 (W, b) pairs, W: (in, out) f32, b: (1, out) f32.

    Layer shapes: (2*dim,128), (128,128), (128,64), (64,dim).
    """
    N, dim = nodes.shape
    E = edges.shape[0]
    assert dim < LANES, "feature dim (+count lane) must fit in one 128-lane vreg"
    assert tile_e % LANES == 0 and tile_n % 8 == 0

    # keep >= 2 row tiles on non-tiny graphs so the 'parallel' axis can feed both
    # TensorCores on v7x.
    while tile_n > 128 and (N + tile_n - 1) // tile_n < 2:
        tile_n //= 2

    n_pad = _round_up(N, tile_n)
    e_pad = _round_up(max(E, 1), tile_e)
    num_row_tiles = n_pad // tile_n
    e_blocks = e_pad // tile_e

    # ---- sort edges by source node (segment sum is permutation-invariant) ----
    src = edge_index[0, :].astype(jnp.int32)
    order = jnp.argsort(src)
    src_sorted = src[order]
    edges_sorted = edges[order].astype(jnp.bfloat16)

    # edges -> (e_pad, 128) bf16 with a "count" column of ones at lane `dim`;
    # padded edges have zero features and src = n_pad, so they contribute nothing.
    edges_p = jnp.zeros((e_pad, LANES), jnp.bfloat16)
    edges_p = edges_p.at[:E, :dim].set(edges_sorted)
    edges_p = edges_p.at[:E, dim].set(1.0)

    edge_src = jnp.full((1, e_pad), n_pad, jnp.int32)
    edge_src = edge_src.at[0, :E].set(src_sorted)

    # per-row-tile edge ranges -> tile_e block offsets / counts (scalar prefetch)
    bounds = jnp.searchsorted(
        src_sorted, jnp.arange(num_row_tiles + 1, dtype=jnp.int32) * tile_n,
        side="left").astype(jnp.int32)
    raw_start = bounds[:-1] // tile_e
    start_block = jnp.minimum(raw_start, e_blocks - 1).astype(jnp.int32)
    end_block = (bounds[1:] + tile_e - 1) // tile_e
    num_blocks = jnp.maximum(end_block - raw_start, 0).astype(jnp.int32)
    # grid extent along the edge axis = busiest row tile's block count.
    # (computed eagerly here; under jit you would pass a static upper bound instead)
    max_blocks = max(int(jnp.max(num_blocks)), 1)

    # nodes -> (n_pad, 128) bf16, zero-padded (lane-dense)
    nodes_p = jnp.zeros((n_pad, LANES), jnp.bfloat16)
    nodes_p = nodes_p.at[:N, :dim].set(nodes.astype(jnp.bfloat16))

    (w0, b0), (w1, b1), (w2, b2), (w3, b3) = params
    # split layer 0 (no concat) and pad every weight to a lane-dense (128,128) bf16 block
    w0a = jnp.zeros((LANES, 128), jnp.bfloat16).at[:dim, :].set(w0[:dim].astype(jnp.bfloat16))
    w0b = jnp.zeros((LANES, 128), jnp.bfloat16).at[:dim, :].set(w0[dim:].astype(jnp.bfloat16))
    w1p = w1.astype(jnp.bfloat16)
    w2p = jnp.zeros((128, LANES), jnp.bfloat16).at[:, :64].set(w2.astype(jnp.bfloat16))
    w3p = jnp.zeros((LANES, LANES), jnp.bfloat16).at[:64, :dim].set(w3.astype(jnp.bfloat16))
    b0p = b0.astype(jnp.float32).reshape(1, 128)
    b1p = b1.astype(jnp.float32).reshape(1, 128)
    b2p = jnp.zeros((1, LANES), jnp.float32).at[:, :64].set(b2.astype(jnp.float32))
    b3p = jnp.zeros((1, LANES), jnp.float32).at[:, :dim].set(b3.astype(jnp.float32))

    # index maps receive the scalar-prefetch refs (start_block, num_blocks) positionally.
    def edge_src_map(i, e, sb, nb):
        return (0, sb[i] + jnp.minimum(e, jnp.maximum(nb[i] - 1, 0)))

    def edge_feat_map(i, e, sb, nb):
        return (sb[i] + jnp.minimum(e, jnp.maximum(nb[i] - 1, 0)), 0)

    row_map = lambda i, e, sb, nb: (i, 0)
    const = lambda i, e, sb, nb: (0, 0)

    in_specs = [
        pl.BlockSpec((1, tile_e), edge_src_map),        # edge sources (sorted)
        pl.BlockSpec((tile_n, LANES), row_map),         # nodes (row tile, resident over e)
        pl.BlockSpec((tile_e, LANES), edge_feat_map),   # edge feats (+ count lane)
        pl.BlockSpec((LANES, 128), const),              # w0a  (resident)
        pl.BlockSpec((LANES, 128), const),              # w0b
        pl.BlockSpec((1, 128), const),                  # b0
        pl.BlockSpec((128, 128), const),                # w1
        pl.BlockSpec((1, 128), const),                  # b1
        pl.BlockSpec((128, LANES), const),              # w2 (padded to 128 lanes)
        pl.BlockSpec((1, LANES), const),                # b2
        pl.BlockSpec((LANES, LANES), const),            # w3 (padded to 128 lanes)
        pl.BlockSpec((1, LANES), const),                # b3
    ]
    out_spec = pl.BlockSpec((tile_n, LANES), row_map)

    kernel = functools.partial(node_model_kernel, dim=dim, tile_n=tile_n)
    out_p = pl.pallas_call(
        kernel,
        out_shape=jax.ShapeDtypeStruct((n_pad, LANES), jnp.bfloat16),
        grid_spec=pltpu.PrefetchScalarGridSpec(
            num_scalar_prefetch=2,
            grid=(num_row_tiles, max_blocks),
            in_specs=in_specs,
            out_specs=out_spec,
            scratch_shapes=[pltpu.VMEM((tile_n, LANES), jnp.float32)],
        ),
        compiler_params=pltpu.CompilerParams(
            dimension_semantics=("parallel", "arbitrary"),
        ),
    )(start_block, num_blocks,
      edge_src, nodes_p, edges_p,
      w0a, w0b, b0p, w1p, b1p, w2p, b2p, w3p, b3p)

    return out_p[:N, :dim].astype(jnp.float32)


def init_linear(key, fan_in, fan_out):
    """Deterministic torch.nn.Linear-style init: U(-1/sqrt(fan_in), 1/sqrt(fan_in))."""
    kw, kb = jax.random.split(key)
    bound = 1.0 / (fan_in ** 0.5)
    w = jax.random.uniform(kw, (fan_in, fan_out), jnp.float32, -bound, bound)
    b = jax.random.uniform(kb, (1, fan_out), jnp.float32, -bound, bound)
    return w, b


def reference_forward(nodes, edge_index, edges, params):
    """Pure-JAX reference; inputs/weights quantized to bf16 to mirror kernel precision."""
    q = lambda x: x.astype(jnp.bfloat16).astype(jnp.float32)
    N = nodes.shape[0]
    src = edge_index[0, :]
    seg_sum = jax.ops.segment_sum(q(edges), src, num_segments=N)
    counts = jax.ops.segment_sum(jnp.ones((edges.shape[0],), jnp.float32), src,
                                 num_segments=N)
    v_e = seg_sum / jnp.maximum(counts, 1.0)[:, None]
    h = jnp.concatenate([q(nodes), v_e], axis=1)
    for w, b in params:
        h = jnp.maximum(q(h) @ q(w) + b, 0.0)
    return h


def _run_case(key, N, E, dim, **tile_kwargs):
    k_nodes, k_edges, k_idx, k0, k1, k2, k3 = jax.random.split(key, 7)
    nodes = jax.random.normal(k_nodes, (N, dim), jnp.float32)
    edges = jax.random.normal(k_edges, (E, dim), jnp.float32)
    edge_index = jax.random.randint(k_idx, (2, E), 0, N, jnp.int32)
    params = [init_linear(k0, dim * 2, 128), init_linear(k1, 128, 128),
              init_linear(k2, 128, 64), init_linear(k3, 64, dim)]

    out = jax.block_until_ready(
        node_model_forward(nodes, edge_index, edges, params, **tile_kwargs))
    ref = reference_forward(nodes, edge_index, edges, params)
    assert out.shape == (N, dim)
    max_err = float(jnp.max(jnp.abs(out - ref)))
    assert jnp.allclose(out, ref, atol=2e-2, rtol=2e-2), max_err
    return out


if __name__ == "__main__":
    key = jax.random.PRNGKey(0)
    k_a, k_b, k_c = jax.random.split(key, 3)
    _run_case(k_a, N=8, E=16, dim=32)                               # toy size, defaults
    _run_case(k_b, N=300, E=1000, dim=32)                           # 2 row tiles, 1 edge block
    _run_case(k_c, N=300, E=1000, dim=32, tile_n=128, tile_e=256)   # multi edge-block path
    print("KERNEL_OK")
</pallas_src>

<mosaic_0001>
module attributes {stable_mosaic.version = 11 : i64} {
  func.func @node_model_kernel(%arg0: i32, %arg1: i32, %arg2: memref<1xi32, #tpu.memory_space<smem>>, %arg3: memref<1xi32, #tpu.memory_space<smem>>, %arg4: memref<1x2048xi32, #tpu.memory_space<vmem>>, %arg5: memref<128x128xbf16, #tpu.memory_space<vmem>>, %arg6: memref<2048x128xbf16, #tpu.memory_space<vmem>>, %arg7: memref<128x128xbf16, #tpu.memory_space<vmem>>, %arg8: memref<128x128xbf16, #tpu.memory_space<vmem>>, %arg9: memref<1x128xf32, #tpu.memory_space<vmem>>, %arg10: memref<128x128xbf16, #tpu.memory_space<vmem>>, %arg11: memref<1x128xf32, #tpu.memory_space<vmem>>, %arg12: memref<128x128xbf16, #tpu.memory_space<vmem>>, %arg13: memref<1x128xf32, #tpu.memory_space<vmem>>, %arg14: memref<128x128xbf16, #tpu.memory_space<vmem>>, %arg15: memref<1x128xf32, #tpu.memory_space<vmem>>, %arg16: memref<128x128xbf16, #tpu.memory_space<vmem>>, %arg17: memref<128x128xf32, #tpu.memory_space<vmem>>) attributes {dimension_semantics = [#tpu.dimension_semantics<parallel>, #tpu.dimension_semantics<arbitrary>], iteration_bounds = array<i64: 1, 1>, scalar_prefetch = 2 : i64, scratch_operands = 1 : i64, tpu.core_type = #tpu.core_type<tc>, window_params = [{transform_indices = @transform_0, window_bounds = array<i64: 1, 2048>}, {transform_indices = @transform_1, window_bounds = array<i64: 128, 128>}, {transform_indices = @transform_2, window_bounds = array<i64: 2048, 128>}, {pipeline_mode = #tpu.pipeline_mode<synchronous>, transform_indices = @transform_3, window_bounds = array<i64: 128, 128>}, {pipeline_mode = #tpu.pipeline_mode<synchronous>, transform_indices = @transform_4, window_bounds = array<i64: 128, 128>}, {pipeline_mode = #tpu.pipeline_mode<synchronous>, transform_indices = @transform_5, window_bounds = array<i64: 1, 128>}, {pipeline_mode = #tpu.pipeline_mode<synchronous>, transform_indices = @transform_6, window_bounds = array<i64: 128, 128>}, {pipeline_mode = #tpu.pipeline_mode<synchronous>, transform_indices = @transform_7, window_bounds = array<i64: 1, 128>}, {pipeline_mode = #tpu.pipeline_mode<synchronous>, transform_indices = @transform_8, window_bounds = array<i64: 128, 128>}, {pipeline_mode = #tpu.pipeline_mode<synchronous>, transform_indices = @transform_9, window_bounds = array<i64: 1, 128>}, {pipeline_mode = #tpu.pipeline_mode<synchronous>, transform_indices = @transform_10, window_bounds = array<i64: 128, 128>}, {pipeline_mode = #tpu.pipeline_mode<synchronous>, transform_indices = @transform_11, window_bounds = array<i64: 1, 128>}, {transform_indices = @transform_12, window_bounds = array<i64: 128, 128>}]} {
    %c0_i32 = arith.constant 0 : i32
    %0 = arith.cmpi eq, %arg1, %c0_i32 : i32
    %1 = arith.extui %0 : i1 to i32
    %c0_i32_0 = arith.constant 0 : i32
    %2 = arith.cmpi ne, %1, %c0_i32_0 : i32
    scf.if %2 {
      %cst = arith.constant 0.000000e+00 : f32
      %11 = vector.broadcast %cst : f32 to vector<128x128xf32>
      %c0 = arith.constant 0 : index
      %c0_4 = arith.constant 0 : index
      %12 = vector.load %arg17[%c0, %c0_4] : memref<128x128xf32, #tpu.memory_space<vmem>>, vector<128x128xf32>
      tpu.vector_store %arg17[%c0, %c0_4], %11 {strides = array<i32>} : memref<128x128xf32, #tpu.memory_space<vmem>>, vector<128x128xf32>,
    } else {
    }
    %3 = arith.index_cast %arg0 : i32 to index
    %4 = memref.load %arg3[%3] : memref<1xi32, #tpu.memory_space<smem>>
    %5 = arith.cmpi slt, %arg1, %4 : i32
    %6 = arith.extui %5 : i1 to i32
    %c0_i32_1 = arith.constant 0 : i32
    %7 = arith.cmpi ne, %6, %c0_i32_1 : i32
    scf.if %7 {
      %c128_i32 = arith.constant 128 : i32
      %11 = arith.muli %arg0, %c128_i32 : i32
      %12 = tpu.iota {dimensions = array<i32: 0>} : vector<128x1xi32>
      %13 = vector.broadcast %11 : i32 to vector<128x1xi32>
      %14 = arith.addi %13, %12 : vector<128x1xi32>
      %c0 = arith.constant 0 : index
      %c0_4 = arith.constant 0 : index
      %15 = vector.load %arg4[%c0, %c0_4] : memref<1x2048xi32, #tpu.memory_space<vmem>>, vector<1x2048xi32>
      %16 = vector.broadcast %14 : vector<128x1xi32> to vector<128x2048xi32>
      %17 = vector.broadcast %15 : vector<1x2048xi32> to vector<128x2048xi32>
      %18 = arith.cmpi eq, %16, %17 : vector<128x2048xi32>
      %19 = arith.extui %18 : vector<128x2048xi1> to vector<128x2048xi32>
      %20 = arith.sitofp %19 : vector<128x2048xi32> to vector<128x2048xf32>
      %21 = arith.truncf %20 : vector<128x2048xf32> to vector<128x2048xbf16>
      %c0_5 = arith.constant 0 : index
      %c0_6 = arith.constant 0 : index
      %22 = vector.load %arg17[%c0_5, %c0_6] : memref<128x128xf32, #tpu.memory_space<vmem>>, vector<128x128xf32>
      %c0_7 = arith.constant 0 : index
      %c0_8 = arith.constant 0 : index
      %23 = vector.load %arg6[%c0_7, %c0_8] : memref<2048x128xbf16, #tpu.memory_space<vmem>>, vector<2048x128xbf16>
      %cst = arith.constant dense<0.000000e+00> : vector<128x128xf32>
      %24 = tpu.matmul %21, %23, %cst {dimension_numbers = #tpu.dot_dimension_numbers<[1], [0], [0], [1], [0, 0, 1, 1], [], []>} : vector<128x2048xbf16>, vector<2048x128xbf16>, vector<128x128xf32> -> vector<128x128xf32>
      %25 = arith.addf %22, %24 : vector<128x128xf32>
      %c0_9 = arith.constant 0 : index
      %c0_10 = arith.constant 0 : index
      %26 = vector.load %arg17[%c0_9, %c0_10] : memref<128x128xf32, #tpu.memory_space<vmem>>, vector<128x128xf32>
      tpu.vector_store %arg17[%c0_9, %c0_10], %25 {strides = array<i32>} : memref<128x128xf32, #tpu.memory_space<vmem>>, vector<128x128xf32>,
    } else {
    }
    %c0_i32_2 = arith.constant 0 : i32
    %8 = arith.cmpi eq, %arg1, %c0_i32_2 : i32
    %9 = arith.extui %8 : i1 to i32
    %c0_i32_3 = arith.constant 0 : i32
    %10 = arith.cmpi ne, %9, %c0_i32_3 : i32
    scf.if %10 {
      %c0 = arith.constant 0 : index
      %c0_4 = arith.constant 0 : index
      %11 = vector.load %arg17[%c0, %c0_4] : memref<128x128xf32, #tpu.memory_space<vmem>>, vector<128x128xf32>
      %12 = vector.extract_strided_slice %11 {offsets = [0, 32], sizes = [128, 1], strides = [1, 1]} : vector<128x128xf32> to vector<128x1xf32>
      %cst = arith.constant 1.000000e+00 : f32
      %13 = vector.broadcast %cst : f32 to vector<128x1xf32>
      %14 = arith.maximumf %12, %13 : vector<128x1xf32>
      %cst_5 = arith.constant 1.000000e+00 : f32
      %15 = vector.broadcast %cst_5 : f32 to vector<128x1xf32>
      %16 = arith.divf %15, %14 : vector<128x1xf32>
      %17 = vector.broadcast %16 : vector<128x1xf32> to vector<128x128xf32>
      %18 = arith.mulf %11, %17 : vector<128x128xf32>
      %19 = arith.truncf %18 : vector<128x128xf32> to vector<128x128xbf16>
      %c0_6 = arith.constant 0 : index
      %c0_7 = arith.constant 0 : index
      %20 = vector.load %arg5[%c0_6, %c0_7] : memref<128x128xbf16, #tpu.memory_space<vmem>>, vector<128x128xbf16>
      %c0_8 = arith.constant 0 : index
      %c0_9 = arith.constant 0 : index
      %21 = vector.load %arg7[%c0_8, %c0_9] : memref<128x128xbf16, #tpu.memory_space<vmem>>, vector<128x128xbf16>
      %cst_10 = arith.constant dense<0.000000e+00> : vector<128x128xf32>
      %22 = tpu.matmul %20, %21, %cst_10 {dimension_numbers = #tpu.dot_dimension_numbers<[1], [0], [0], [1], [0, 0, 1, 1], [], []>} : vector<128x128xbf16>, vector<128x128xbf16>, vector<128x128xf32> -> vector<128x128xf32>
      %c0_11 = arith.constant 0 : index
      %c0_12 = arith.constant 0 : index
      %23 = vector.load %arg8[%c0_11, %c0_12] : memref<128x128xbf16, #tpu.memory_space<vmem>>, vector<128x128xbf16>
      %cst_13 = arith.constant dense<0.000000e+00> : vector<128x128xf32>
      %24 = tpu.matmul %19, %23, %cst_13 {dimension_numbers = #tpu.dot_dimension_numbers<[1], [0], [0], [1], [0, 0, 1, 1], [], []>} : vector<128x128xbf16>, vector<128x128xbf16>, vector<128x128xf32> -> vector<128x128xf32>
      %25 = arith.addf %22, %24 : vector<128x128xf32>
      %c0_14 = arith.constant 0 : index
      %c0_15 = arith.constant 0 : index
      %26 = vector.load %arg9[%c0_14, %c0_15] : memref<1x128xf32, #tpu.memory_space<vmem>>, vector<1x128xf32>
      %27 = vector.broadcast %26 : vector<1x128xf32> to vector<128x128xf32>
      %28 = arith.addf %25, %27 : vector<128x128xf32>
      %cst_16 = arith.constant 0.000000e+00 : f32
      %29 = vector.broadcast %cst_16 : f32 to vector<128x128xf32>
      %30 = arith.maximumf %28, %29 : vector<128x128xf32>
      %31 = arith.truncf %30 : vector<128x128xf32> to vector<128x128xbf16>
      %c0_17 = arith.constant 0 : index
      %c0_18 = arith.constant 0 : index
      %32 = vector.load %arg10[%c0_17, %c0_18] : memref<128x128xbf16, #tpu.memory_space<vmem>>, vector<128x128xbf16>
      %cst_19 = arith.constant dense<0.000000e+00> : vector<128x128xf32>
      %33 = tpu.matmul %31, %32, %cst_19 {dimension_numbers = #tpu.dot_dimension_numbers<[1], [0], [0], [1], [0, 0, 1, 1], [], []>} : vector<128x128xbf16>, vector<128x128xbf16>, vector<128x128xf32> -> vector<128x128xf32>
      %c0_20 = arith.constant 0 : index
      %c0_21 = arith.constant 0 : index
      %34 = vector.load %arg11[%c0_20, %c0_21] : memref<1x128xf32, #tpu.memory_space<vmem>>, vector<1x128xf32>
      %35 = vector.broadcast %34 : vector<1x128xf32> to vector<128x128xf32>
      %36 = arith.addf %33, %35 : vector<128x128xf32>
      %cst_22 = arith.constant 0.000000e+00 : f32
      %37 = vector.broadcast %cst_22 : f32 to vector<128x128xf32>
      %38 = arith.maximumf %36, %37 : vector<128x128xf32>
      %39 = arith.truncf %38 : vector<128x128xf32> to vector<128x128xbf16>
      %c0_23 = arith.constant 0 : index
      %c0_24 = arith.constant 0 : index
      %40 = vector.load %arg12[%c0_23, %c0_24] : memref<128x128xbf16, #tpu.memory_space<vmem>>, vector<128x128xbf16>
      %cst_25 = arith.constant dense<0.000000e+00> : vector<128x128xf32>
      %41 = tpu.matmul %39, %40, %cst_25 {dimension_numbers = #tpu.dot_dimension_numbers<[1], [0], [0], [1], [0, 0, 1, 1], [], []>} : vector<128x128xbf16>, vector<128x128xbf16>, vector<128x128xf32> -> vector<128x128xf32>
      %c0_26 = arith.constant 0 : index
      %c0_27 = arith.constant 0 : index
      %42 = vector.load %arg13[%c0_26, %c0_27] : memref<1x128xf32, #tpu.memory_space<vmem>>, vector<1x128xf32>
      %43 = vector.broadcast %42 : vector<1x128xf32> to vector<128x128xf32>
      %44 = arith.addf %41, %43 : vector<128x128xf32>
      %cst_28 = arith.constant 0.000000e+00 : f32
      %45 = vector.broadcast %cst_28 : f32 to vector<128x128xf32>
      %46 = arith.maximumf %44, %45 : vector<128x128xf32>
      %47 = arith.truncf %46 : vector<128x128xf32> to vector<128x128xbf16>
      %c0_29 = arith.constant 0 : index
      %c0_30 = arith.constant 0 : index
      %48 = vector.load %arg14[%c0_29, %c0_30] : memref<128x128xbf16, #tpu.memory_space<vmem>>, vector<128x128xbf16>
      %cst_31 = arith.constant dense<0.000000e+00> : vector<128x128xf32>
      %49 = tpu.matmul %47, %48, %cst_31 {dimension_numbers = #tpu.dot_dimension_numbers<[1], [0], [0], [1], [0, 0, 1, 1], [], []>} : vector<128x128xbf16>, vector<128x128xbf16>, vector<128x128xf32> -> vector<128x128xf32>
      %c0_32 = arith.constant 0 : index
      %c0_33 = arith.constant 0 : index
      %50 = vector.load %arg15[%c0_32, %c0_33] : memref<1x128xf32, #tpu.memory_space<vmem>>, vector<1x128xf32>
      %51 = vector.broadcast %50 : vector<1x128xf32> to vector<128x128xf32>
      %52 = arith.addf %49, %51 : vector<128x128xf32>
      %cst_34 = arith.constant 0.000000e+00 : f32
      %53 = vector.broadcast %cst_34 : f32 to vector<128x128xf32>
      %54 = arith.maximumf %52, %53 : vector<128x128xf32>
      %55 = arith.truncf %54 : vector<128x128xf32> to vector<128x128xbf16>
      %c0_35 = arith.constant 0 : index
      %c0_36 = arith.constant 0 : index
      %56 = vector.load %arg16[%c0_35, %c0_36] : memref<128x128xbf16, #tpu.memory_space<vmem>>, vector<128x128xbf16>
      tpu.vector_store %arg16[%c0_35, %c0_36], %55 {strides = array<i32>} : memref<128x128xbf16, #tpu.memory_space<vmem>>, vector<128x128xbf16>,
    } else {
    }
    return
  }
  func.func @transform_0(%arg0: i32, %arg1: i32, %arg2: memref<1xi32, #tpu.memory_space<smem>>, %arg3: memref<1xi32, #tpu.memory_space<smem>>) -> (i32, i32) {
    %0 = arith.index_cast %arg0 : i32 to index
    %1 = memref.load %arg2[%0] : memref<1xi32, #tpu.memory_space<smem>>
    %2 = arith.index_cast %arg0 : i32 to index
    %3 = memref.load %arg3[%2] : memref<1xi32, #tpu.memory_space<smem>>
    %c1_i32 = arith.constant 1 : i32
    %4 = arith.subi %3, %c1_i32 : i32
    %c0_i32 = arith.constant 0 : i32
    %5 = arith.maxsi %4, %c0_i32 : i32
    %6 = arith.minsi %arg1, %5 : i32
    %7 = arith.addi %1, %6 : i32
    %c0_i32_0 = arith.constant 0 : i32
    %c0_i32_1 = arith.constant 0 : i32
    return %c0_i32_0, %7 : i32, i32
  }
  func.func @transform_1(%arg0: i32, %arg1: i32, %arg2: memref<1xi32, #tpu.memory_space<smem>>, %arg3: memref<1xi32, #tpu.memory_space<smem>>) -> (i32, i32) {
    %c0_i32 = arith.constant 0 : i32
    %c0_i32_0 = arith.constant 0 : i32
    return %arg0, %c0_i32 : i32, i32
  }
  func.func @transform_2(%arg0: i32, %arg1: i32, %arg2: memref<1xi32, #tpu.memory_space<smem>>, %arg3: memref<1xi32, #tpu.memory_space<smem>>) -> (i32, i32) {
    %0 = arith.index_cast %arg0 : i32 to index
    %1 = memref.load %arg2[%0] : memref<1xi32, #tpu.memory_space<smem>>
    %2 = arith.index_cast %arg0 : i32 to index
    %3 = memref.load %arg3[%2] : memref<1xi32, #tpu.memory_space<smem>>
    %c1_i32 = arith.constant 1 : i32
    %4 = arith.subi %3, %c1_i32 : i32
    %c0_i32 = arith.constant 0 : i32
    %5 = arith.maxsi %4, %c0_i32 : i32
    %6 = arith.minsi %arg1, %5 : i32
    %7 = arith.addi %1, %6 : i32
    %c0_i32_0 = arith.constant 0 : i32
    %c0_i32_1 = arith.constant 0 : i32
    return %7, %c0_i32_0 : i32, i32
  }
  func.func @transform_3(%arg0: i32, %arg1: i32, %arg2: memref<1xi32, #tpu.memory_space<smem>>, %arg3: memref<1xi32, #tpu.memory_space<smem>>) -> (i32, i32) {
    %c0_i32 = arith.constant 0 : i32
    %c0_i32_0 = arith.constant 0 : i32
    %c0_i32_1 = arith.constant 0 : i32
    return %c0_i32, %c0_i32_0 : i32, i32
  }
  func.func @transform_4(%arg0: i32, %arg1: i32, %arg2: memref<1xi32, #tpu.memory_space<smem>>, %arg3: memref<1xi32, #tpu.memory_space<smem>>) -> (i32, i32) {
    %c0_i32 = arith.constant 0 : i32
    %c0_i32_0 = arith.constant 0 : i32
    %c0_i32_1 = arith.constant 0 : i32
    return %c0_i32, %c0_i32_0 : i32, i32
  }
  func.func @transform_5(%arg0: i32, %arg1: i32, %arg2: memref<1xi32, #tpu.memory_space<smem>>, %arg3: memref<1xi32, #tpu.memory_space<smem>>) -> (i32, i32) {
    %c0_i32 = arith.constant 0 : i32
    %c0_i32_0 = arith.constant 0 : i32
    %c0_i32_1 = arith.constant 0 : i32
    return %c0_i32, %c0_i32_0 : i32, i32
  }
  func.func @transform_6(%arg0: i32, %arg1: i32, %arg2: memref<1xi32, #tpu.memory_space<smem>>, %arg3: memref<1xi32, #tpu.memory_space<smem>>) -> (i32, i32) {
    %c0_i32 = arith.constant 0 : i32
    %c0_i32_0 = arith.constant 0 : i32
    %c0_i32_1 = arith.constant 0 : i32
    return %c0_i32, %c0_i32_0 : i32, i32
  }
  func.func @transform_7(%arg0: i32, %arg1: i32, %arg2: memref<1xi32, #tpu.memory_space<smem>>, %arg3: memref<1xi32, #tpu.memory_space<smem>>) -> (i32, i32) {
    %c0_i32 = arith.constant 0 : i32
    %c0_i32_0 = arith.constant 0 : i32
    %c0_i32_1 = arith.constant 0 : i32
    return %c0_i32, %c0_i32_0 : i32, i32
  }
  func.func @transform_8(%arg0: i32, %arg1: i32, %arg2: memref<1xi32, #tpu.memory_space<smem>>, %arg3: memref<1xi32, #tpu.memory_space<smem>>) -> (i32, i32) {
    %c0_i32 = arith.constant 0 : i32
    %c0_i32_0 = arith.constant 0 : i32
    %c0_i32_1 = arith.constant 0 : i32
    return %c0_i32, %c0_i32_0 : i32, i32
  }
  func.func @transform_9(%arg0: i32, %arg1: i32, %arg2: memref<1xi32, #tpu.memory_space<smem>>, %arg3: memref<1xi32, #tpu.memory_space<smem>>) -> (i32, i32) {
    %c0_i32 = arith.constant 0 : i32
    %c0_i32_0 = arith.constant 0 : i32
    %c0_i32_1 = arith.constant 0 : i32
    return %c0_i32, %c0_i32_0 : i32, i32
  }
  func.func @transform_10(%arg0: i32, %arg1: i32, %arg2: memref<1xi32, #tpu.memory_space<smem>>, %arg3: memref<1xi32, #tpu.memory_space<smem>>) -> (i32, i32) {
    %c0_i32 = arith.constant 0 : i32
    %c0_i32_0 = arith.constant 0 : i32
    %c0_i32_1 = arith.constant 0 : i32
    return %c0_i32, %c0_i32_0 : i32, i32
  }
  func.func @transform_11(%arg0: i32, %arg1: i32, %arg2: memref<1xi32, #tpu.memory_space<smem>>, %arg3: memref<1xi32, #tpu.memory_space<smem>>) -> (i32, i32) {
    %c0_i32 = arith.constant 0 : i32
    %c0_i32_0 = arith.constant 0 : i32
    %c0_i32_1 = arith.constant 0 : i32
    return %c0_i32, %c0_i32_0 : i32, i32
  }
  func.func @transform_12(%arg0: i32, %arg1: i32, %arg2: memref<1xi32, #tpu.memory_space<smem>>, %arg3: memref<1xi32, #tpu.memory_space<smem>>) -> (i32, i32) {
    %c0_i32 = arith.constant 0 : i32
    %c0_i32_0 = arith.constant 0 : i32
    return %arg0, %c0_i32 : i32, i32
  }
}

</mosaic_0001>

<bundles_post_ra>
// kernel: tpu_custom_call.1
= control target key start
LH: loop header
LB: loop body
LE: loop exit
PB: predicated region body
PF: predicated region fallthrough
CT: control target
= control target key end

     0   :  { %21 = vsyncpa [#allocation7], 0  ;;  %s7841_s0 = inlined_call_operand.<no memory space> [shape: s32[1], index: 0, kind: input, shape index: {}]   ;;  %s7842_s1 = inlined_call_operand.<no memory space> [shape: s32[1], index: 1, kind: input, shape index: {}]   ;;  %s7843_s2 = inlined_call_operand.hbm [shape: s32[1,2048], index: 2, kind: input, shape index: {}]   ;;  %s7844_s3 = inlined_call_operand.hbm [shape: bf16[128,128], index: 3, kind: input, shape index: {}]   ;;  %s7845_s4 = inlined_call_operand.hbm [shape: bf16[2048,128], index: 4, kind: input, shape index: {}]   ;;  %s7846_s5 = inlined_call_operand.hbm [shape: bf16[128,128], index: 5, kind: input, shape index: {}]   ;;  %s7847_s6 = inlined_call_operand.hbm [shape: bf16[128,128], index: 6, kind: input, shape index: {}]   ;;  %s7848_s7 = inlined_call_operand.vmem [shape: f32[1,128], index: 7, kind: input, shape index: {}]   ;;  %s7849_s8 = inlined_call_operand.hbm [shape: bf16[128,128], index: 8, kind: input, shape index: {}]   ;;  %s7850_s9 = inlined_call_operand.vmem [shape: f32[1,128], index: 9, kind: input, shape index: {}]   ;;  %s7851_s10 = inlined_call_operand.hbm [shape: bf16[128,128], index: 10, kind: input, shape index: {}]   ;;  %s7852_s11 = inlined_call_operand.vmem [shape: f32[1,128], index: 11, kind: input, shape index: {}]   ;;  %s7853_s12 = inlined_call_operand.hbm [shape: bf16[128,128], index: 12, kind: input, shape index: {}]   ;;  %s7854_s13 = inlined_call_operand.vmem [shape: f32[1,128], index: 13, kind: input, shape index: {}]   ;;  %s7855_s14 = inlined_call_operand.hbm [shape: bf16[128,128], index: 14, kind: output, shape index: {}]  }
   0x1   :  { %22 = vsyncpa [#allocation10], 0 }
   0x2   :  { %23 = vsyncpa [#allocation13], 0 }
   0x3   :  { %24 = vsyncpa [#allocation16], 0 }
   0x4   :  { %25 = vsyncpa [#allocation19], 0 }
   0x5   :  { %26 = vsyncpa [#allocation8], 0  ;;  %s6354_s29 = smov [#allocation9]   ;;  %s6140_s17 = scalar_lea.hbm %s7844_s3, 1024 }
   0x6   :  { %s53_s30 = sshll.u32 %s6354_s29, 4  ;;  %p6141_p0 = scmp.ne.s32.totalorder %s7844_s3, %s6140_s17  ;;  %s54_s30 = int_to_ptr.vmem [resolvable:$true] %s53_s30 }
   0x7   :  { %p6144_p1 = scmp.lt.u32.totalorder %s6140_s17, %s7844_s3 }
   0x9   :  { %p6146_p2 = pnand %p6144_p1, %p6141_p0 }
   0xb   :  { %6149 = shalt.err (!%p6146_p2)
}
   0xc   :  { %s6150_s22 = scalar_lea.vmem %s54_s30, 1024  ;;  %p6155_p4 = scmp.lt.s32.totalorder %s54_s30, %s54_s30 }
   0xd   :  { %p6151_p3 = scmp.ne.s32.totalorder %s54_s30, %s6150_s22  ;;  %p6156_p5 = scmp.lt.s32.totalorder %s6150_s22, %s6150_s22 }
   0xf   :  { %p6157_p6 = por %p6156_p5, %p6155_p4 }
  0x11   :  { %p6158_p7 = pnand %p6157_p6, %p6151_p3 }
  0x13   :  { %6161 = shalt.err (!%p6158_p7)
}
  0x14   :  { %s7856_s23 = smov 64   ;;  %s7858_s24 = smov 4  }
  0x15   :  { %59 = dma.hbm_to_vmem [thread:$0]  %s7844_s3, 1024, %s54_s30, [#allocation10], %s7856_s23, %s7856_s23, %s7858_s24  }
  0x16   :  { %s6357_s27 = smov [#allocation12]   ;;  %s6358_s29 = smov [#allocation15]  }
  0x17   :  { %s88_s28 = sshll.u32 %s6357_s27, 4  ;;  %s114_s15 = sshll.u32 %s6358_s29, 4  ;;  %s89_s28 = int_to_ptr.vmem [resolvable:$true] %s88_s28  ;;  %s115_s15 = int_to_ptr.vmem [resolvable:$true] %s114_s15 }
  0x18   :  { %s6162_s18 = scalar_lea.hbm %s7846_s5, 1024 }
  0x19   :  { %p6163_p8 = scmp.ne.s32.totalorder %s7846_s5, %s6162_s18  ;;  %p6166_p9 = scmp.lt.u32.totalorder %s6162_s18, %s7846_s5 }
  0x1b   :  { %p6168_p10 = pnand %p6166_p9, %p6163_p8 }
  0x1d   :  { %6171 = shalt.err (!%p6168_p10)
}
  0x1e   :  { %s6172_s3 = scalar_lea.vmem %s89_s28, 1024  ;;  %p6177_p12 = scmp.lt.s32.totalorder %s89_s28, %s89_s28 }
  0x1f   :  { %p6173_p11 = scmp.ne.s32.totalorder %s89_s28, %s6172_s3  ;;  %p6178_p13 = scmp.lt.s32.totalorder %s6172_s3, %s6172_s3 }
  0x21   :  { %p6179_p0 = por %p6178_p13, %p6177_p12 }
  0x23   :  { %p6180_p1 = pnand %p6179_p0, %p6173_p11 }
  0x25   :  { %6183 = shalt.err (!%p6180_p1)
}
  0x26   :  { %94 = dma.hbm_to_vmem [thread:$0]  %s7846_s5, 1024, %s89_s28, [#allocation13], %s7856_s23, %s7856_s23, %s7858_s24  }
  0x27   :  { %s4343_s29 = sadd.s32 4294967295, %s7842_s1  ;;  %s6184_s18 = scalar_lea.hbm %s7849_s8, 1024 }
  0x28   :  { %p6185_p2 = scmp.ne.s32.totalorder %s7849_s8, %s6184_s18  ;;  %p6188_p3 = scmp.lt.u32.totalorder %s6184_s18, %s7849_s8 }
  0x2a   :  { %p6190_p4 = pnand %p6188_p3, %p6185_p2 }
  0x2c   :  { %6193 = shalt.err (!%p6190_p4)
}
  0x2d   :  { %s6194_s5 = scalar_lea.vmem %s115_s15, 1024  ;;  %p6199_p6 = scmp.lt.s32.totalorder %s115_s15, %s115_s15 }
  0x2e   :  { %p6195_p5 = scmp.ne.s32.totalorder %s115_s15, %s6194_s5  ;;  %p6200_p7 = scmp.lt.s32.totalorder %s6194_s5, %s6194_s5 }
  0x30   :  { %p6201_p8 = por %p6200_p7, %p6199_p6 }
  0x32   :  { %p6202_p9 = pnand %p6201_p8, %p6195_p5 }
  0x34   :  { %6205 = shalt.err (!%p6202_p9)
}
  0x35   :  { %120 = dma.hbm_to_vmem [thread:$0]  %s7849_s8, 1024, %s115_s15, [#allocation16], %s7856_s23, %s7856_s23, %s7858_s24  }
  0x36   :  { %p32_p10 = scmp.gt.s32.totalorder %s4343_s29, 0  ;;  %s6359_s30 = smov [#allocation6]  }
  0x37   :  { %s44_s25 = sshll.u32 %s6359_s30, 4  ;;  %s6360_s26 = smov [#allocation11]   ;;  %s6491_s25 = int_to_ptr.vmem [resolvable:$true] %s44_s25 }
  0x38   :  { %s7921_s29 = smov (!%p32_p10, %s4343_s29), 0  ;;  %s76_s27 = sshll.u32 %s6360_s26, 4  ;;  %s6493_s27 = int_to_ptr.vmem [resolvable:$true] %s76_s27 }
  0x39   :  { %s7923_s29 = smov (%p32_p10, %s7921_s29), 0  ;;  %s6361_s19 = smov [#allocation14]  }
  0x3a   :  { %s36_s18 = sadd.s32 %s7923_s29, %s7841_s0  ;;  %s6498_s20 = sshll.u32 %s6361_s19, 4  ;;  %s101_s20 = int_to_ptr.vmem [resolvable:$true] %s6498_s20 }
  0x3b   :  { %s5064_s21 = sshll.u32 %s36_s18, 8  ;;  %s5068_s8 = sshll.u32 %s36_s18, 14 }
  0x3c   :  { %s42_s5 = scalar_lea.hbm %s7843_s2, %s5064_s21  ;;  %s6506_s30 = scalar_lea.hbm %s7845_s4, %s5068_s8 }
  0x3d   :  { %s6206_s26 = scalar_lea.hbm %s42_s5, 256  ;;  %s6208_s0 = scalar_lea.hbm %s7843_s2, 256 }
  0x3e   :  { %p6207_p11 = scmp.ne.s32.totalorder %s42_s5, %s6206_s26  ;;  %p6209_p12 = scmp.lt.u32.totalorder %s42_s5, %s7843_s2 }
  0x3f   :  { %p6210_p13 = scmp.lt.u32.totalorder %s6208_s0, %s6206_s26  ;;  %p6212_p1 = scmp.lt.u32.totalorder %s6206_s26, %s42_s5 }
  0x41   :  { %p6211_p0 = por %p6210_p13, %p6209_p12 }
  0x43   :  { %p6213_p2 = por %p6212_p1, %p6211_p0 }
  0x45   :  { %p6214_p3 = pnand %p6213_p2, %p6207_p11 }
  0x47   :  { %6217 = shalt.err (!%p6214_p3)
}
  0x48   :  { %s6218_s17 = scalar_lea.vmem %s6491_s25, 256  ;;  %p6223_p5 = scmp.lt.s32.totalorder %s6491_s25, %s6491_s25 }
  0x49   :  { %p6219_p4 = scmp.ne.s32.totalorder %s6491_s25, %s6218_s17  ;;  %p6224_p6 = scmp.lt.s32.totalorder %s6218_s17, %s6218_s17 }
  0x4b   :  { %p6225_p7 = por %p6224_p6, %p6223_p5 }
  0x4d   :  { %p6226_p8 = pnand %p6225_p7, %p6219_p4 }
  0x4f   :  { %6229 = shalt.err (!%p6226_p8)
}
  0x50   :  { %47 = dma.hbm_to_vmem [thread:$0]  %s42_s5, 256, %s6491_s25, [#allocation7]  }
  0x51   :  { %s6230_s2 = scalar_lea.hbm %s6506_s30, 16384  ;;  %s6232_s18 = scalar_lea.hbm %s7845_s4, 16384 }
  0x52   :  { %p6231_p9 = scmp.ne.s32.totalorder %s6506_s30, %s6230_s2  ;;  %p6233_p10 = scmp.lt.u32.totalorder %s6506_s30, %s7845_s4 }
  0x53   :  { %p6234_p11 = scmp.lt.u32.totalorder %s6232_s18, %s6230_s2  ;;  %p6236_p13 = scmp.lt.u32.totalorder %s6230_s2, %s6506_s30 }
  0x55   :  { %p6235_p12 = por %p6234_p11, %p6233_p10 }
  0x57   :  { %p6237_p0 = por %p6236_p13, %p6235_p12 }
  0x59   :  { %p6238_p1 = pnand %p6237_p0, %p6231_p9 }
  0x5b   :  { %6241 = shalt.err (!%p6238_p1)
}
  0x5c   :  { %s6242_s25 = scalar_lea.vmem %s6493_s27, 16384  ;;  %p6247_p3 = scmp.lt.s32.totalorder %s6493_s27, %s6493_s27 }
  0x5d   :  { %p6243_p2 = scmp.ne.s32.totalorder %s6493_s27, %s6242_s25  ;;  %p6248_p4 = scmp.lt.s32.totalorder %s6242_s25, %s6242_s25 }
  0x5f   :  { %p6249_p5 = por %p6248_p4, %p6247_p3 }
  0x61   :  { %p6250_p6 = pnand %p6249_p5, %p6243_p2 }
  0x63   :  { %6253 = shalt.err (!%p6250_p6)
}
  0x64   :  { %s7860_s8 = smov 4   ;;  %s7861_s15 = smov 64  }
  0x65   :  { %82 = dma.hbm_to_vmem [thread:$0]  %s6506_s30, 16384, %s6493_s27, [#allocation10], %s7861_s15, %s7861_s15, %s7860_s8  }
  0x66   :  { %s6254_s5 = scalar_lea.hbm %s7847_s6, 1024 }
  0x67   :  { %p6255_p7 = scmp.ne.s32.totalorder %s7847_s6, %s6254_s5  ;;  %p6258_p8 = scmp.lt.u32.totalorder %s6254_s5, %s7847_s6 }
  0x69   :  { %p6260_p9 = pnand %p6258_p8, %p6255_p7 }
  0x6b   :  { %6263 = shalt.err (!%p6260_p9)
}
  0x6c   :  { %s6264_s29 = scalar_lea.vmem %s101_s20, 1024  ;;  %p6269_p11 = scmp.lt.s32.totalorder %s101_s20, %s101_s20 }
  0x6d   :  { %p6265_p10 = scmp.ne.s32.totalorder %s101_s20, %s6264_s29  ;;  %p6270_p12 = scmp.lt.s32.totalorder %s6264_s29, %s6264_s29 }
  0x6f   :  { %p6271_p13 = por %p6270_p12, %p6269_p11 }
  0x71   :  { %p6272_p0 = pnand %p6271_p13, %p6265_p10 }
  0x73   :  { %6275 = shalt.err (!%p6272_p0)
}
  0x74   :  { %106 = dma.hbm_to_vmem [thread:$0]  %s7847_s6, 1024, %s101_s20, [#allocation13], %s7861_s15, %s7861_s15, %s7860_s8  }
  0x75   :  { %s6362_s16 = smov [#allocation17]   ;;  %s6363_s2 = smov [#allocation18]  }
  0x76   :  { %s128_s17 = sshll.u32 %s6362_s16, 4  ;;  %s142_s23 = sshll.u32 %s6363_s2, 4  ;;  %s129_s17 = int_to_ptr.vmem [resolvable:$true] %s128_s17  ;;  %s143_s23 = int_to_ptr.vmem [resolvable:$true] %s142_s23 }
  0x77   :  { %s6276_s19 = scalar_lea.hbm %s7851_s10, 1024 }
  0x78   :  { %p6277_p1 = scmp.ne.s32.totalorder %s7851_s10, %s6276_s19  ;;  %p6280_p2 = scmp.lt.u32.totalorder %s6276_s19, %s7851_s10 }
  0x7a   :  { %p6282_p3 = pnand %p6280_p2, %p6277_p1 }
  0x7c   :  { %6285 = shalt.err (!%p6282_p3)
}
  0x7d   :  { %s6286_s6 = scalar_lea.vmem %s129_s17, 1024  ;;  %p6291_p5 = scmp.lt.s32.totalorder %s129_s17, %s129_s17 }
  0x7e   :  { %p6287_p4 = scmp.ne.s32.totalorder %s129_s17, %s6286_s6  ;;  %p6292_p6 = scmp.lt.s32.totalorder %s6286_s6, %s6286_s6 }
  0x80   :  { %p6293_p7 = por %p6292_p6, %p6291_p5 }
  0x82   :  { %p6294_p8 = pnand %p6293_p7, %p6287_p4 }
  0x84   :  { %6297 = shalt.err (!%p6294_p8)
}
  0x85   :  { %134 = dma.hbm_to_vmem [thread:$0]  %s7851_s10, 1024, %s129_s17, [#allocation16], %s7861_s15, %s7861_s15, %s7860_s8  }
  0x86   :  { %s6298_s26 = scalar_lea.hbm %s7853_s12, 1024 }
  0x87   :  { %p6299_p9 = scmp.ne.s32.totalorder %s7853_s12, %s6298_s26  ;;  %p6302_p10 = scmp.lt.u32.totalorder %s6298_s26, %s7853_s12 }
  0x89   :  { %p6304_p11 = pnand %p6302_p10, %p6299_p9 }
  0x8b   :  { %6307 = shalt.err (!%p6304_p11)
}
  0x8c   :  { %s6308_s16 = scalar_lea.vmem %s143_s23, 1024  ;;  %p6313_p13 = scmp.lt.s32.totalorder %s143_s23, %s143_s23 }
  0x8d   :  { %p6309_p12 = scmp.ne.s32.totalorder %s143_s23, %s6308_s16  ;;  %p6314_p0 = scmp.lt.s32.totalorder %s6308_s16, %s6308_s16 }
  0x8f   :  { %p6315_p1 = por %p6314_p0, %p6313_p13 }
  0x91   :  { %p6316_p2 = pnand %p6315_p1, %p6309_p12 }
  0x93   :  { %6319 = shalt.err (!%p6316_p2)
}
  0x94   :  { %148 = dma.hbm_to_vmem [thread:$0]  %s7853_s12, 1024, %s143_s23, [#allocation19], %s7861_s15, %s7861_s15, %s7860_s8  }
  0x95   :  { %6342 = dma.done.wait [#allocation7], 256  }
  0x96   :  { %6343 = vsyncadd [#allocation7], 4294967040 }
  0x97   :  { %6344 = dma.done.wait [#allocation10], 17408  }
  0x98   :  { %6345 = vsyncadd [#allocation10], 4294949888 }
  0x99   :  { %6346 = dma.done.wait [#allocation13], 2048  }
  0x9a   :  { %6347 = vsyncadd [#allocation13], 4294965248 }
  0x9b   :  { %6348 = dma.done.wait [#allocation16], 2048  }
  0x9c   :  { %6349 = vsyncadd [#allocation16], 4294965248 }
  0x9d   :  { %6350 = dma.done.wait [#allocation19], 1024  }
  0x9e   :  { %6351 = vsyncadd [#allocation19], 4294966272  ;;  %v6364_v0 = vmov 0.0   ;;  %p4352_p3 = scmp.le.s32.totalorder %s7842_s1, 0 }
  0x9f   :  { %198 = vst [vmem:[#allocation2] sm:$0xff] %v6364_v0  ;;  %199 = vst [vmem:[#allocation2 + $0x8] sm:$0xff] %v6364_v0  ;;  %v5930_v1 = vld [vmem:[#allocation11 + $0x40] sm:$0xff] (!%p4352_p3)   ;;  %v5934_v5 = vld [vmem:[#allocation11 + $0x48] sm:$0xff] (!%p4352_p3)   ;;  %v220_v21 = vlaneseq (!%p4352_p3)  ;;  %v6365_v51 = vmov (!%p4352_p3), 1.0|1.0  }
  0xa0   :  { %200 = vst [vmem:[#allocation2 + $0x10] sm:$0xff] %v6364_v0  ;;  %201 = vst [vmem:[#allocation2 + $0x18] sm:$0xff] %v6364_v0  ;;  %218 = sbr.rel (%p4352_p3) target bundleno = 665 (0x299), region = 89  ;;  %v5931_v2 = vld [vmem:[#allocation11 + $0xc0] sm:$0xff] (!%p4352_p3)   ;;  %5132 = vmatprep.subr.bf16.mxu0 (!%p4352_p3), %v5930_v1  ;;  %v5935_v6 = vld [vmem:[#allocation11 + $0xc8] sm:$0xff] (!%p4352_p3)  }
  0xa1   :  { %202 = vst [vmem:[#allocation2 + $0x20] sm:$0xff] %v6364_v0  ;;  %203 = vst [vmem:[#allocation2 + $0x28] sm:$0xff] %v6364_v0  ;;  %v5932_v3 = vld [vmem:[#allocation11] sm:$0xff] (!%p4352_p3)   ;;  %5196 = vmatprep.subr.bf16.mxu1 (!%p4352_p3), %v5931_v2  ;;  %v5936_v7 = vld [vmem:[#allocation11 + $0x8] sm:$0xff] (!%p4352_p3)   ;;  %v6587_v26 = vshrl.u32 (!%p4352_p3), %v220_v21, 7 }
  0xa2   :  { %204 = vst [vmem:[#allocation2 + $0x30] sm:$0xff] %v6364_v0  ;;  %205 = vst [vmem:[#allocation2 + $0x38] sm:$0xff] %v6364_v0  ;;  %v5933_v4 = vld [vmem:[#allocation11 + $0x80] sm:$0xff] (!%p4352_p3)   ;;  %5133 = vmatpush3.bf16.msra.mxu0 (!%p4352_p3), %v5932_v3  ;;  %v5937_v8 = vld [vmem:[#allocation11 + $0x88] sm:$0xff] (!%p4352_p3)  }
  0xa3   :  { %206 = vst [vmem:[#allocation2 + $0x40] sm:$0xff] %v6364_v0  ;;  %207 = vst [vmem:[#allocation2 + $0x48] sm:$0xff] %v6364_v0  ;;  %5197 = vmatpush3.bf16.msra.mxu1 (!%p4352_p3), %v5933_v4  ;;  %5134 = vmatprep.subr.bf16.mxu0 (!%p4352_p3), %v5934_v5  ;;  %v5938_v9 = vld [vmem:[#allocation11 + $0x50] sm:$0xff] (!%p4352_p3)   ;;  %v5942_v13 = vld [vmem:[#allocation11 + $0x58] sm:$0xff] (!%p4352_p3)   ;;  %v262_v31 = vsub.s32 (!%p4352_p3), 1, %v6587_v26  ;;  %v270_v33 = vsub.s32 (!%p4352_p3), 3, %v6587_v26 }
  0xa4   :  { %208 = vst [vmem:[#allocation2 + $0x50] sm:$0xff] %v6364_v0  ;;  %209 = vst [vmem:[#allocation2 + $0x58] sm:$0xff] %v6364_v0  ;;  %5198 = vmatprep.subr.bf16.mxu1 (!%p4352_p3), %v5935_v6  ;;  %v5939_v10 = vld [vmem:[#allocation11 + $0xd0] sm:$0xff] (!%p4352_p3)   ;;  %v5943_v14 = vld [vmem:[#allocation11 + $0xd8] sm:$0xff] (!%p4352_p3)   ;;  %v258_v35 = vsub.s32 (!%p4352_p3), 0, %v6587_v26  ;;  %v266_v37 = vsub.s32 (!%p4352_p3), 2, %v6587_v26 }
  0xa5   :  { %210 = vst [vmem:[#allocation2 + $0x60] sm:$0xff] %v6364_v0  ;;  %211 = vst [vmem:[#allocation2 + $0x68] sm:$0xff] %v6364_v0  ;;  %v5940_v11 = vld [vmem:[#allocation11 + $0x10] sm:$0xff] (!%p4352_p3)   ;;  %v5944_v15 = vld [vmem:[#allocation11 + $0x18] sm:$0xff] (!%p4352_p3)   ;;  %v6594_v39 = vadd.s32 (!%p4352_p3), 8, %v6587_v26  ;;  %v6599_v41 = vadd.s32 (!%p4352_p3), 16, %v6587_v26 }
  0xa6   :  { %212 = vst [vmem:[#allocation2 + $0x70] sm:$0xff] %v6364_v0  ;;  %213 = vst [vmem:[#allocation2 + $0x78] sm:$0xff] %v6364_v0  ;;  %5135 = vmatpush3.bf16.msra.mxu0 (!%p4352_p3), %v5936_v7  ;;  %v5941_v12 = vld [vmem:[#allocation11 + $0x90] sm:$0xff] (!%p4352_p3)   ;;  %v5945_v16 = vld [vmem:[#allocation11 + $0x98] sm:$0xff] (!%p4352_p3)   ;;  %v6617_v46 = vadd.s32 (!%p4352_p3), 24, %v6587_v26  ;;  %v6651_v53 = vadd.s32 (!%p4352_p3), 32, %v6587_v26 }
  0xa7   :  { %5199 = vmatpush3.bf16.msra.mxu1 %v5937_v8  ;;  %5136 = vmatprep.subr.bf16.mxu0 %v5938_v9  ;;  %v5946_v17 = vld [vmem:[#allocation11 + $0x60] sm:$0xff]   ;;  %v5950_v22 = vld [vmem:[#allocation11 + $0x68] sm:$0xff]   ;;  %v5954_v27 = vld [vmem:[#allocation11 + $0x70] sm:$0xff]   ;;  %v6654_v54 = vadd.s32 40, %v6587_v26  ;;  %v6694_v61 = vadd.s32 48, %v6587_v26  ;;  %v6697_v62 = vadd.s32 56, %v6587_v26 }
  0xa8   :  { %5200 = vmatprep.subr.bf16.mxu1 %v5939_v10  ;;  %v5947_v18 = vld [vmem:[#allocation11 + $0xe0] sm:$0xff]   ;;  %v5951_v23 = vld [vmem:[#allocation11 + $0xe8] sm:$0xff]   ;;  %v5955_v28 = vld [vmem:[#allocation11 + $0xf0] sm:$0xff]   ;;  %v6736_v9 = vadd.s32 64, %v6587_v26  ;;  %v6739_v10 = vadd.s32 72, %v6587_v26  ;;  %v274_v58 = vsub.s32 4, %v6587_v26 }
  0xa9   :  { %v5948_v19 = vld [vmem:[#allocation11 + $0x20] sm:$0xff]   ;;  %v5952_v24 = vld [vmem:[#allocation11 + $0x28] sm:$0xff]   ;;  %v5956_v29 = vld [vmem:[#allocation11 + $0x30] sm:$0xff]   ;;  %v282_v59 = vsub.s32 6, %v6587_v26 }
  0xaa   :  { %5137 = vmatpush3.bf16.msra.mxu0 %v5940_v11  ;;  %v5949_v20 = vld [vmem:[#allocation11 + $0xa0] sm:$0xff]   ;;  %v5953_v25 = vld [vmem:[#allocation11 + $0xa8] sm:$0xff]   ;;  %v5957_v30 = vld [vmem:[#allocation11 + $0xb0] sm:$0xff]  }
  0xab   :  { %5201 = vmatpush3.bf16.msra.mxu1 %v5941_v12  ;;  %5138 = vmatprep.subr.bf16.mxu0 %v5942_v13  ;;  %v5958_v32 = vld [vmem:[#allocation11 + $0x78] sm:$0xff]   ;;  %v6596_v40 = vld [vmem:[#allocation6] sm:$0xff]  ;;  %v5962_v45 = vld [vmem:[#allocation11 + $0x140] sm:$0xff]  }
  0xac   :  { %5202 = vmatprep.subr.bf16.mxu1 %v5943_v14  ;;  %v5959_v34 = vld [vmem:[#allocation11 + $0xf8] sm:$0xff]   ;;  %v6604_v42 = vrot.slane %v6596_v40, %v262_v31  ;;  %v6609_v43 = vrot.slane %v6596_v40, %v270_v33  ;;  %v6614_v44 = vrot.slane %v6596_v40, %v258_v35  ;;  %v6622_v47 = vrot.slane %v6596_v40, %v266_v37  ;;  %v5963_v48 = vld [vmem:[#allocation11 + $0x100] sm:$0xff]   ;;  %v5966_v52 = vld [vmem:[#allocation11 + $0x148] sm:$0xff]  }
  0xad   :  { %v5960_v36 = vld [vmem:[#allocation11 + $0x38] sm:$0xff]   ;;  %v5964_v49 = vld [vmem:[#allocation11 + $0x1c0] sm:$0xff]   ;;  %v5967_v55 = vld [vmem:[#allocation11 + $0x108] sm:$0xff]  }
  0xae   :  { %5139 = vmatpush3.bf16.msra.mxu0 %v5944_v15  ;;  %v5961_v38 = vld [vmem:[#allocation11 + $0xb8] sm:$0xff]   ;;  %vm321_vm0 = vcmp.eq.s32.totalorder %v6587_v26, %v6604_v42  ;;  %vm337_vm1 = vcmp.eq.s32.totalorder %v6594_v39, %v6604_v42  ;;  %vm323_vm2 = vcmp.eq.s32.totalorder %v6587_v26, %v6609_v43  ;;  %vm339_vm3 = vcmp.eq.s32.totalorder %v6594_v39, %v6609_v43  ;;  %v5965_v50 = vld [vmem:[#allocation11 + $0x180] sm:$0xff]   ;;  %v5968_v56 = vld [vmem:[#allocation11 + $0x1c8] sm:$0xff]  }
  0xaf   :  { %5203 = vmatpush3.bf16.msra.mxu1 %v5945_v16  ;;  %5140 = vmatprep.subr.bf16.mxu0 %v5946_v17  ;;  %vm4737_vm4 = vmpackc.low %vm337_vm1, %vm321_vm0  ;;  %vm320_vm5 = vcmp.eq.s32.totalorder %v6587_v26, %v6614_v44  ;;  %vm336_vm6 = vcmp.eq.s32.totalorder %v6594_v39, %v6614_v44  ;;  %vm322_vm7 = vcmp.eq.s32.totalorder %v6587_v26, %v6622_v47  ;;  %v5969_v57 = vld [vmem:[#allocation11 + $0x188] sm:$0xff]   ;;  %v5970_v60 = vld [vmem:[#allocation11 + $0x150] sm:$0xff]   ;;  %v6776_v17 = vadd.s32 80, %v6587_v26 }
  0xb0   :  { %5204 = vmatprep.subr.bf16.mxu1 %v5947_v18  ;;  %vm338_vm8 = vcmp.eq.s32.totalorder %v6594_v39, %v6622_v47  ;;  %4738 = vmatprep.mubr.msk.bf16.mxu0 %vm4737_vm4, %v6365_v51  ;;  %vm4769_vm9 = vmpackc.low %vm339_vm3, %vm323_vm2  ;;  %vm353_vm10 = vcmp.eq.s32.totalorder %v6599_v41, %v6604_v42  ;;  %vm369_vm11 = vcmp.eq.s32.totalorder %v6617_v46, %v6604_v42  ;;  %v5971_v63 = vld [vmem:[#allocation11 + $0x110] sm:$0xff]   ;;  %v5974_v4 = vld [vmem:[#allocation11 + $0x158] sm:$0xff]   ;;  %v6779_v18 = vadd.s32 88, %v6587_v26 }
  0xb1   :  { %4770 = vmatprep.mubr.msk.bf16.mxu1 %vm4769_vm9, %v6365_v51  ;;  %vm4739_vm12 = vmpackc.low %vm336_vm6, %vm320_vm5  ;;  %vm355_vm13 = vcmp.eq.s32.totalorder %v6599_v41, %v6609_v43  ;;  %vm371_vm14 = vcmp.eq.s32.totalorder %v6617_v46, %v6609_v43  ;;  %vm352_vm1 = vcmp.eq.s32.totalorder %v6599_v41, %v6614_v44  ;;  %vm368_vm2 = vcmp.eq.s32.totalorder %v6617_v46, %v6614_v44  ;;  %v5972_v0 = vld [vmem:[#allocation11 + $0x1d0] sm:$0xff]   ;;  %v5975_v6 = vld [vmem:[#allocation11 + $0x118] sm:$0xff]  }
  0xb2   :  { %5141 = vmatpush3.bf16.msra.mxu0 %v5948_v19  ;;  %vm4771_vm15 = vmpackc.low %vm338_vm8, %vm322_vm7  ;;  %vm354_vm4 = vcmp.eq.s32.totalorder %v6599_v41, %v6622_v47  ;;  %vm370_vm5 = vcmp.eq.s32.totalorder %v6617_v46, %v6622_v47  ;;  %vm385_vm6 = vcmp.eq.s32.totalorder %v6651_v53, %v6604_v42  ;;  %vm401_vm7 = vcmp.eq.s32.totalorder %v6654_v54, %v6604_v42  ;;  %v5973_v1 = vld [vmem:[#allocation11 + $0x190] sm:$0xff]   ;;  %v5976_v7 = vld [vmem:[#allocation11 + $0x1d8] sm:$0xff]  }
  0xb3   :  { %5205 = vmatpush3.bf16.msra.mxu1 %v5949_v20  ;;  %5142 = vmatprep.subr.bf16.mxu0 %v5950_v22  ;;  %vm4741_vm0 = vmpackc.low %vm369_vm11, %vm353_vm10  ;;  %vm387_vm9 = vcmp.eq.s32.totalorder %v6651_v53, %v6609_v43  ;;  %vm403_vm10 = vcmp.eq.s32.totalorder %v6654_v54, %v6609_v43  ;;  %v5977_v8 = vld [vmem:[#allocation11 + $0x198] sm:$0xff]   ;;  %v5978_v11 = vld [vmem:[#allocation11 + $0x160] sm:$0xff]  }
  0xb4   :  { %5206 = vmatprep.subr.bf16.mxu1 %v5951_v23  ;;  %vm4773_vm3 = vmpackc.low %vm371_vm14, %vm355_vm13  ;;  %vm384_vm14 = vcmp.eq.s32.totalorder %v6651_v53, %v6614_v44  ;;  %v5979_v12 = vld [vmem:[#allocation11 + $0x120] sm:$0xff]   ;;  %v5982_v19 = vld [vmem:[#allocation11 + $0x168] sm:$0xff]  }
  0xb5   :  { %vm6681_vm8 = vmpackc.low %vm368_vm2, %vm352_vm1  ;;  %vm402_vm1 = vcmp.eq.s32.totalorder %v6654_v54, %v6622_v47  ;;  %vm417_vm2 = vcmp.eq.s32.totalorder %v6694_v61, %v6604_v42  ;;  %v5980_v13 = vld [vmem:[#allocation11 + $0x1e0] sm:$0xff]   ;;  %v5983_v20 = vld [vmem:[#allocation11 + $0x128] sm:$0xff]  }
  0xb6   :  { %5143 = vmatpush3.bf16.msra.mxu0 %v5952_v24  ;;  %vm6689_vm11 = vmpackc.low %vm370_vm5, %vm354_vm4  ;;  %v5981_v15 = vld [vmem:[#allocation11 + $0x1a0] sm:$0xff]   ;;  %v5984_v21 = vld [vmem:[#allocation11 + $0x1e8] sm:$0xff]  }
  0xb7   :  { %5207 = vmatpush3.bf16.msra.mxu1 %v5953_v25  ;;  %5144 = vmatprep.subr.bf16.mxu0 %v5954_v27  ;;  %vm4777_vm13 = vmpackc.low %vm403_vm10, %vm387_vm9  ;;  %vm416_vm10 = vcmp.eq.s32.totalorder %v6694_v61, %v6614_v44  ;;  %v5985_v22 = vld [vmem:[#allocation11 + $0x1a8] sm:$0xff]   ;;  %v5986_v25 = vld [vmem:[#allocation11 + $0x170] sm:$0xff]  }
  0xb8   :  { %5208 = vmatprep.subr.bf16.mxu1 %v5955_v28  ;;  %v5987_v28 = vld [vmem:[#allocation11 + $0x130] sm:$0xff]   ;;  %v6007_v24 = vld [vmem:[#allocation11 + $0x218] sm:$0xff]   ;;  %v6010_v27 = vld [vmem:[#allocation11 + $0x260] sm:$0xff]  }
  0xb9   :  { %v6003_v16 = vld [vmem:[#allocation11 + $0x210] sm:$0xff]   ;;  %v6022_v2 = vld [vmem:[#allocation11 + $0x278] sm:$0xff]   ;;  %v6042_v23 = vld [vmem:[#allocation11 + $0x360] sm:$0xff]  }
  0xba   :  { %5145 = vmatpush3.bf16.msra.mxu0 %v5956_v29  ;;  %v5988_v29 = vld [vmem:[#allocation11 + $0x1f0] sm:$0xff]   ;;  %v6024_v3 = vld [vmem:[#allocation11 + $0x2f8] sm:$0xff]  }
  0xbb   :  { %5209 = vmatpush3.bf16.msra.mxu1 %v5957_v30  ;;  %5146 = vmatprep.subr.bf16.mxu0 %v5958_v32  ;;  %v5989_v30 = vld [vmem:[#allocation11 + $0x1b0] sm:$0xff]   ;;  %v6818_v32 = vadd.s32 96, %v6587_v26  ;;  %v6025_v5 = vld [vmem:[#allocation11 + $0x2b8] sm:$0xff]  }
  0xbc   :  { %5210 = vmatprep.subr.bf16.mxu1 %v5959_v34  ;;  %v6821_v34 = vadd.s32 104, %v6587_v26  ;;  %v6036_v14 = vld [vmem:[#allocation11 + $0x3d0] sm:$0xff]  }
  0xbe   :  { %5147 = vmatpush3.bf16.msra.mxu0 %v5960_v36  ;;  %v5990_v36 = vld [vmem:[#allocation11 + $0x178] sm:$0xff]  }
  0xbf   :  { %5211 = vmatpush3.bf16.msra.mxu1 %v5961_v38  ;;  %5260 = vmatprep.subr.bf16.mxu0 %v5962_v45  ;;  %v5991_v38 = vld [vmem:[#allocation11 + $0x138] sm:$0xff]  }
  0xc0   :  { %5324 = vmatprep.subr.bf16.mxu1 %v5964_v49  ;;  %v5992_v45 = vld [vmem:[#allocation11 + $0x1f8] sm:$0xff]   ;;  %v5994_v49 = vld [vmem:[#allocation11 + $0x240] sm:$0xff]  }
  0xc1   :  { %4740 = vmatmul.mubr.msk.bf16.vlgmr.msra.gmra.mrb[0].mxu0 %vm4739_vm12, %v6365_v51  ;;  %vm4745_vm12 = vmpackc.low %vm401_vm7, %vm385_vm6  ;;  %vm419_vm7 = vcmp.eq.s32.totalorder %v6694_v61, %v6609_v43 }
  0xc2   :  { %4772 = vmatmul.mubr.msk.bf16.vlgmr.msra.gmra.mrb[0].mxu1 %vm4771_vm15, %v6365_v51  ;;  %5261 = vmatpush3.bf16.msra.mxu0 %v5963_v48  ;;  %vm400_vm15 = vcmp.eq.s32.totalorder %v6654_v54, %v6614_v44  ;;  %v5993_v48 = vld [vmem:[#allocation11 + $0x1b8] sm:$0xff]  }
  0xc3   :  { %5325 = vmatpush3.bf16.msra.mxu1 %v5965_v50  ;;  %4742 = vmatprep.mubr.msk.bf16.mxu0 %vm4741_vm0, %v6365_v51  ;;  %vm386_vm0 = vcmp.eq.s32.totalorder %v6651_v53, %v6622_v47  ;;  %vm6719_vm4 = vmpackc.low %vm400_vm15, %vm384_vm14  ;;  %vm449_vm14 = vcmp.eq.s32.totalorder %v6736_v9, %v6604_v42  ;;  %vm465_vm15 = vcmp.eq.s32.totalorder %v6739_v10, %v6604_v42  ;;  %v6850_v50 = vadd.s32 112, %v6587_v26 }
  0xc4   :  { %4774 = vmatprep.mubr.msk.bf16.mxu1 %vm4773_vm3, %v6365_v51  ;;  %5262 = vmatprep.subr.bf16.mxu0 %v5966_v52  ;;  %vm433_vm3 = vcmp.eq.s32.totalorder %v6697_v62, %v6604_v42  ;;  %vm6723_vm5 = vmpackc.low %vm402_vm1, %vm386_vm0  ;;  %vm451_vm1 = vcmp.eq.s32.totalorder %v6736_v9, %v6609_v43  ;;  %v6853_v52 = vadd.s32 120, %v6587_v26 }
  0xc5   :  { %5326 = vmatprep.subr.bf16.mxu1 %v5968_v56  ;;  %vm6727_vm6 = vmpackc.low %vm433_vm3, %vm417_vm2  ;;  %vm467_vm2 = vcmp.eq.s32.totalorder %v6739_v10, %v6609_v43  ;;  %v278_v56 = vsub.s32 5, %v6587_v26 }
  0xc6   :  { %5263 = vmatpush3.bf16.msra.mxu0 %v5967_v55  ;;  %v5996_v55 = vld [vmem:[#allocation11 + $0x2c0] sm:$0xff]  }
  0xc7   :  { %5327 = vmatpush3.bf16.msra.mxu1 %v5969_v57  ;;  %5264 = vmatprep.subr.bf16.mxu0 %v5970_v60  ;;  %v286_v57 = vsub.s32 7, %v6587_v26  ;;  %v6904_v60 = vrot.slane %v6596_v40, %v274_v58 }
  0xc8   :  { %5328 = vmatprep.subr.bf16.mxu1 %v5972_v0  ;;  %v6019_v0 = vld [vmem:[#allocation11 + $0x230] sm:$0xff]  }
  0xc9   :  { %4744 = vmatmul.mubr.msk.bf16.gmra.mrb[4].mxu0 %vm6681_vm8, %v6365_v51  ;;  %vm435_vm8 = vcmp.eq.s32.totalorder %v6697_v62, %v6609_v43 }
  0xca   :  { %4776 = vmatmul.mubr.msk.bf16.gmra.mrb[4].mxu1 %vm6689_vm11, %v6365_v51  ;;  %4746 = vmatprep.mubr.msk.bf16.mxu0 %vm4745_vm12, %v6365_v51  ;;  %vm4781_vm9 = vmpackc.low %vm435_vm8, %vm419_vm7  ;;  %vm432_vm11 = vcmp.eq.s32.totalorder %v6697_v62, %v6614_v44  ;;  %vm418_vm12 = vcmp.eq.s32.totalorder %v6694_v61, %v6622_v47  ;;  %vm464_vm7 = vcmp.eq.s32.totalorder %v6739_v10, %v6614_v44 }
  0xcb   :  { %4778 = vmatprep.mubr.msk.bf16.mxu1 %vm4777_vm13, %v6365_v51  ;;  %5265 = vmatpush3.bf16.msra.mxu0 %v5971_v63  ;;  %vm434_vm13 = vcmp.eq.s32.totalorder %v6697_v62, %v6622_v47  ;;  %vm6763_vm0 = vmpackc.low %vm432_vm11, %vm416_vm10  ;;  %vm450_vm8 = vcmp.eq.s32.totalorder %v6736_v9, %v6622_v47  ;;  %vm481_vm10 = vcmp.eq.s32.totalorder %v6776_v17, %v6604_v42  ;;  %v5995_v63 = vld [vmem:[#allocation11 + $0x200] sm:$0xff]  }
  0xcc   :  { %5329 = vmatpush3.bf16.msra.mxu1 %v5973_v1  ;;  %5266 = vmatprep.subr.bf16.mxu0 %v5974_v4  ;;  %vm6771_vm3 = vmpackc.low %vm434_vm13, %vm418_vm12  ;;  %vm497_vm11 = vcmp.eq.s32.totalorder %v6779_v18, %v6604_v42  ;;  %v5997_v1 = vld [vmem:[#allocation11 + $0x280] sm:$0xff]   ;;  %v5998_v4 = vld [vmem:[#allocation11 + $0x248] sm:$0xff]  }
  0xcd   :  { %5330 = vmatprep.subr.bf16.mxu1 %v5976_v7  ;;  %v6000_v7 = vld [vmem:[#allocation11 + $0x2c8] sm:$0xff]  }
  0xcf   :  { %5267 = vmatpush3.bf16.msra.mxu0 %v5975_v6  ;;  %v5999_v6 = vld [vmem:[#allocation11 + $0x208] sm:$0xff]  }
  0xd0   :  { %5331 = vmatpush3.bf16.msra.mxu1 %v5977_v8  ;;  %5268 = vmatprep.subr.bf16.mxu0 %v5978_v11  ;;  %v6001_v8 = vld [vmem:[#allocation11 + $0x288] sm:$0xff]  }
  0xd1   :  { %4748 = vmatmul.mubr.msk.bf16.gmra.mrb[8].mxu0 %vm6719_vm4, %v6365_v51  ;;  %5332 = vmatprep.subr.bf16.mxu1 %v5980_v13  ;;  %vm4753_vm4 = vmpackc.low %vm465_vm15, %vm449_vm14  ;;  %vm483_vm15 = vcmp.eq.s32.totalorder %v6776_v17, %v6609_v43  ;;  %v6004_v13 = vld [vmem:[#allocation11 + $0x2d0] sm:$0xff]  }
  0xd2   :  { %4780 = vmatmul.mubr.msk.bf16.gmra.mrb[8].mxu1 %vm6723_vm5, %v6365_v51  ;;  %4750 = vmatprep.mubr.msk.bf16.mxu0 %vm6727_vm6, %v6365_v51  ;;  %vm4785_vm5 = vmpackc.low %vm467_vm2, %vm451_vm1  ;;  %vm448_vm6 = vcmp.eq.s32.totalorder %v6736_v9, %v6614_v44  ;;  %vm480_vm2 = vcmp.eq.s32.totalorder %v6776_v17, %v6614_v44 }
  0xd3   :  { %4782 = vmatprep.mubr.msk.bf16.mxu1 %vm4781_vm9, %v6365_v51  ;;  %5269 = vmatpush3.bf16.msra.mxu0 %v5979_v12  ;;  %vm466_vm9 = vcmp.eq.s32.totalorder %v6739_v10, %v6622_v47  ;;  %vm6801_vm12 = vmpackc.low %vm464_vm7, %vm448_vm6  ;;  %vm513_vm6 = vcmp.eq.s32.totalorder %v6818_v32, %v6604_v42  ;;  %vm529_vm7 = vcmp.eq.s32.totalorder %v6821_v34, %v6604_v42  ;;  %v6002_v12 = vld [vmem:[#allocation11 + $0x250] sm:$0xff]  }
  0xd4   :  { %5333 = vmatpush3.bf16.msra.mxu1 %v5981_v15  ;;  %5270 = vmatprep.subr.bf16.mxu0 %v5982_v19  ;;  %vm6805_vm13 = vmpackc.low %vm466_vm9, %vm450_vm8  ;;  %vm515_vm9 = vcmp.eq.s32.totalorder %v6818_v32, %v6609_v43  ;;  %v6035_v15 = vld [vmem:[#allocation11 + $0x310] sm:$0xff]   ;;  %v6038_v19 = vld [vmem:[#allocation11 + $0x358] sm:$0xff]  }
  0xd5   :  { %5334 = vmatprep.subr.bf16.mxu1 %v5984_v21  ;;  %vm6809_vm14 = vmpackc.low %vm497_vm11, %vm481_vm10  ;;  %vm531_vm10 = vcmp.eq.s32.totalorder %v6821_v34, %v6609_v43  ;;  %v6006_v21 = vld [vmem:[#allocation11 + $0x258] sm:$0xff]  }
  0xd7   :  { %5271 = vmatpush3.bf16.msra.mxu0 %v5983_v20  ;;  %v6005_v20 = vld [vmem:[#allocation11 + $0x290] sm:$0xff]  }
  0xd8   :  { %5335 = vmatpush3.bf16.msra.mxu1 %v5985_v22  ;;  %5272 = vmatprep.subr.bf16.mxu0 %v5986_v25  ;;  %v6008_v22 = vld [vmem:[#allocation11 + $0x2d8] sm:$0xff]  }
  0xd9   :  { %4752 = vmatmul.mubr.msk.bf16.gmra.mrb[12].mxu0 %vm6763_vm0, %v6365_v51  ;;  %vm499_vm0 = vcmp.eq.s32.totalorder %v6779_v18, %v6609_v43  ;;  %5336 = vmatprep.subr.bf16.mxu1 %v5988_v29  ;;  %v6009_v25 = vld [vmem:[#allocation11 + $0x298] sm:$0xff]   ;;  %v6012_v29 = vld [vmem:[#allocation11 + $0x2e0] sm:$0xff]  }
  0xda   :  { %4784 = vmatmul.mubr.msk.bf16.gmra.mrb[12].mxu1 %vm6771_vm3, %v6365_v51  ;;  %4754 = vmatprep.mubr.msk.bf16.mxu0 %vm4753_vm4, %v6365_v51  ;;  %vm4789_vm1 = vmpackc.low %vm499_vm0, %vm483_vm15  ;;  %vm496_vm3 = vcmp.eq.s32.totalorder %v6779_v18, %v6614_v44  ;;  %vm482_vm4 = vcmp.eq.s32.totalorder %v6776_v17, %v6622_v47  ;;  %vm528_vm15 = vcmp.eq.s32.totalorder %v6821_v34, %v6614_v44 }
  0xdb   :  { %4786 = vmatprep.mubr.msk.bf16.mxu1 %vm4785_vm5, %v6365_v51  ;;  %5273 = vmatpush3.bf16.msra.mxu0 %v5987_v28  ;;  %vm498_vm5 = vcmp.eq.s32.totalorder %v6779_v18, %v6622_v47  ;;  %vm4759_vm8 = vmpackc.low %vm496_vm3, %vm480_vm2  ;;  %vm514_vm0 = vcmp.eq.s32.totalorder %v6818_v32, %v6622_v47  ;;  %vm545_vm2 = vcmp.eq.s32.totalorder %v6850_v50, %v6604_v42  ;;  %v6046_v28 = vld [vmem:[#allocation11 + $0x368] sm:$0xff]  }
  0xdc   :  { %5337 = vmatpush3.bf16.msra.mxu1 %v5989_v30  ;;  %5274 = vmatprep.subr.bf16.mxu0 %v5990_v36  ;;  %vm4791_vm11 = vmpackc.low %vm498_vm5, %vm482_vm4  ;;  %vm561_vm3 = vcmp.eq.s32.totalorder %v6853_v52, %v6604_v42  ;;  %vm547_vm5 = vcmp.eq.s32.totalorder %v6850_v50, %v6609_v43  ;;  %v6881_v42 = vrot.slane %v6596_v40, %v278_v56  ;;  %v6011_v30 = vld [vmem:[#allocation11 + $0x220] sm:$0xff]  }
  0xdd   :  { %5338 = vmatprep.subr.bf16.mxu1 %v5992_v45  ;;  %v6013_v36 = vld [vmem:[#allocation11 + $0x2a0] sm:$0xff]   ;;  %v6052_v45 = vld [vmem:[#allocation11 + $0x3f0] sm:$0xff]  }
  0xdf   :  { %5275 = vmatpush3.bf16.msra.mxu0 %v5991_v38  ;;  %v6014_v38 = vld [vmem:[#allocation11 + $0x268] sm:$0xff]  }
  0xe0   :  { %5339 = vmatpush3.bf16.msra.mxu1 %v5993_v48  ;;  %5388 = vmatprep.subr.bf16.mxu0 %v5994_v49  ;;  %v6016_v48 = vld [vmem:[#allocation11 + $0x2e8] sm:$0xff]   ;;  %v6053_v49 = vld [vmem:[#allocation11 + $0x3b0] sm:$0xff]  }
  0xe1   :  { %4756 = vmatmul.mubr.msk.bf16.gmra.mrb[16].mxu0 %vm6801_vm12, %v6365_v51  ;;  %vm4761_vm12 = vmpackc.low %vm529_vm7, %vm513_vm6  ;;  %5452 = vmatprep.subr.bf16.mxu1 %v5996_v55  ;;  %vm563_vm6 = vcmp.eq.s32.totalorder %v6853_v52, %v6609_v43  ;;  %v6888_v43 = vrot.slane %v6596_v40, %v286_v57  ;;  %v6015_v55 = vld [vmem:[#allocation11 + $0x228] sm:$0xff]  }
  0xe2   :  { %4788 = vmatmul.mubr.msk.bf16.gmra.mrb[16].mxu1 %vm6805_vm13, %v6365_v51  ;;  %4758 = vmatprep.mubr.msk.bf16.mxu0 %vm6809_vm14, %v6365_v51  ;;  %vm4793_vm13 = vmpackc.low %vm531_vm10, %vm515_vm9  ;;  %vm512_vm14 = vcmp.eq.s32.totalorder %v6818_v32, %v6614_v44  ;;  %vm544_vm10 = vcmp.eq.s32.totalorder %v6850_v50, %v6614_v44 }
  0xe3   :  { %4790 = vmatprep.mubr.msk.bf16.mxu1 %vm4789_vm1, %v6365_v51  ;;  %vm530_vm1 = vcmp.eq.s32.totalorder %v6821_v34, %v6622_v47  ;;  %vm4763_vm4 = vmpackc.low %vm528_vm15, %vm512_vm14  ;;  %vm325_vm14 = vcmp.eq.s32.totalorder %v6587_v26, %v6881_v42  ;;  %vm341_vm15 = vcmp.eq.s32.totalorder %v6594_v39, %v6881_v42 }
  0xe4   :  { %vm4795_vm7 = vmpackc.low %vm530_vm1, %vm514_vm0  ;;  %vm327_vm1 = vcmp.eq.s32.totalorder %v6587_v26, %v6888_v43 }
  0xe5   :  { %vm4797_vm9 = vmpackc.low %vm563_vm6, %vm547_vm5  ;;  %vm324_vm5 = vcmp.eq.s32.totalorder %v6587_v26, %v6904_v60  ;;  %vm340_vm6 = vcmp.eq.s32.totalorder %v6594_v39, %v6904_v60 }
  0xe9   :  { %4760 = vmatmul.mubr.msk.bf16.gmra.mrb[20].mxu0 %vm4759_vm8, %v6365_v51  ;;  %vm4765_vm8 = vmpackc.low %vm561_vm3, %vm545_vm2  ;;  %vm343_vm2 = vcmp.eq.s32.totalorder %v6594_v39, %v6888_v43 }
  0xea   :  { %4792 = vmatmul.mubr.msk.bf16.gmra.mrb[20].mxu1 %vm4791_vm11, %v6365_v51  ;;  %4762 = vmatprep.mubr.msk.bf16.mxu0 %vm4761_vm12, %v6365_v51  ;;  %vm560_vm11 = vcmp.eq.s32.totalorder %v6853_v52, %v6614_v44  ;;  %vm546_vm12 = vcmp.eq.s32.totalorder %v6850_v50, %v6622_v47  ;;  %v6913_v44 = vrot.slane %v6596_v40, %v282_v59  ;;  %v6017_v40 = vld [vmem:[#allocation11 + $0x2a8] sm:$0xff]  }
  0xeb   :  { %4794 = vmatprep.mubr.msk.bf16.mxu1 %vm4793_vm13, %v6365_v51  ;;  %vm562_vm13 = vcmp.eq.s32.totalorder %v6853_v52, %v6622_v47  ;;  %vm4767_vm0 = vmpackc.low %vm560_vm11, %vm544_vm10  ;;  %vm357_vm10 = vcmp.eq.s32.totalorder %v6599_v41, %v6881_v42  ;;  %vm373_vm11 = vcmp.eq.s32.totalorder %v6617_v46, %v6881_v42  ;;  %v6018_v47 = vld [vmem:[#allocation11 + $0x270] sm:$0xff]  }
  0xec   :  { %vm4799_vm3 = vmpackc.low %vm562_vm13, %vm546_vm12  ;;  %vm359_vm13 = vcmp.eq.s32.totalorder %v6599_v41, %v6888_v43 }
  0xed   :  { %vm6934_vm12 = vmpackc.low %vm340_vm6, %vm324_vm5  ;;  %vm374_vm5 = vcmp.eq.s32.totalorder %v6617_v46, %v6913_v44 }
  0xf1   :  { %4764 = vmatmul.mubr.msk.bf16.gmra.mrb[24].mxu0 %vm4763_vm4, %v6365_v51  ;;  %vm4801_vm4 = vmpackc.low %vm341_vm15, %vm325_vm14  ;;  %vm375_vm14 = vcmp.eq.s32.totalorder %v6617_v46, %v6888_v43 }
  0xf2   :  { %4796 = vmatmul.mubr.msk.bf16.gmra.mrb[24].mxu1 %vm4795_vm7, %v6365_v51  ;;  %4766 = vmatprep.mubr.msk.bf16.mxu0 %vm4765_vm8, %v6365_v51  ;;  %vm4833_vm7 = vmpackc.low %vm343_vm2, %vm327_vm1  ;;  %vm326_vm8 = vcmp.eq.s32.totalorder %v6587_v26, %v6913_v44  ;;  %vm372_vm1 = vcmp.eq.s32.totalorder %v6617_v46, %v6904_v60 }
  0xf3   :  { %4798 = vmatprep.mubr.msk.bf16.mxu1 %vm4797_vm9, %v6365_v51  ;;  %vm342_vm9 = vcmp.eq.s32.totalorder %v6594_v39, %v6913_v44  ;;  %vm6951_vm2 = vmpackc.low %vm373_vm11, %vm357_vm10  ;;  %vm391_vm11 = vcmp.eq.s32.totalorder %v6651_v53, %v6888_v43 }
  0xf4   :  { %vm6943_vm15 = vmpackc.low %vm342_vm9, %vm326_vm8  ;;  %vm405_vm8 = vcmp.eq.s32.totalorder %v6654_v54, %v6881_v42 }
  0xf9   :  { %4768 = vmatmul.mubr.msk.bf16.gmra.mrb[28].mxu0 %vm4767_vm0, %v6365_v51  ;;  %vm356_vm0 = vcmp.eq.s32.totalorder %v6599_v41, %v6904_v60 }
  0xfa   :  { %4800 = vmatmul.mubr.msk.bf16.gmra.mrb[28].mxu1 %vm4799_vm3, %v6365_v51  ;;  %4802 = vmatprep.mubr.msk.bf16.mxu0 %vm4801_vm4, %v6365_v51  ;;  %vm6955_vm3 = vmpackc.low %vm375_vm14, %vm359_vm13  ;;  %vm358_vm4 = vcmp.eq.s32.totalorder %v6599_v41, %v6913_v44  ;;  %vm407_vm13 = vcmp.eq.s32.totalorder %v6654_v54, %v6888_v43  ;;  %vm404_vm14 = vcmp.eq.s32.totalorder %v6654_v54, %v6904_v60 }
  0xfb   :  { %4834 = vmatprep.mubr.msk.bf16.mxu1 %vm4833_vm7, %v6365_v51  ;;  %vm6963_vm6 = vmpackc.low %vm372_vm1, %vm356_vm0  ;;  %vm389_vm7 = vcmp.eq.s32.totalorder %v6651_v53, %v6881_v42  ;;  %vm406_vm0 = vcmp.eq.s32.totalorder %v6654_v54, %v6913_v44 }
  0xfc   :  { %vm6971_vm9 = vmpackc.low %vm374_vm5, %vm358_vm4  ;;  %vm421_vm4 = vcmp.eq.s32.totalorder %v6694_v61, %v6881_v42  ;;  %vm437_vm5 = vcmp.eq.s32.totalorder %v6697_v62, %v6881_v42 }
  0xfd   :  { %vm6981_vm10 = vmpackc.low %vm405_vm8, %vm389_vm7  ;;  %vm423_vm8 = vcmp.eq.s32.totalorder %v6694_v61, %v6888_v43 }
  0xfe   :  { %vm7003_vm1 = vmpackc.low %vm407_vm13, %vm391_vm11  ;;  %vm439_vm11 = vcmp.eq.s32.totalorder %v6697_v62, %v6888_v43  ;;  %vm422_vm13 = vcmp.eq.s32.totalorder %v6694_v61, %v6913_v44 }
  0xff   :  { %vm7028_vm7 = vmpackc.low %vm437_vm5, %vm421_vm4 }
 0x101   :  { %4804 = vmatmul.mubr.msk.bf16.vlgmr.msra.gmra.mrb[32].mxu0 %vm6934_vm12, %v6365_v51  ;;  %vm388_vm12 = vcmp.eq.s32.totalorder %v6651_v53, %v6904_v60 }
 0x102   :  { %4836 = vmatmul.mubr.msk.bf16.vlgmr.msra.gmra.mrb[32].mxu1 %vm6943_vm15, %v6365_v51  ;;  %5389 = vmatpush3.bf16.msra.mxu0 %v5995_v63  ;;  %vm390_vm15 = vcmp.eq.s32.totalorder %v6651_v53, %v6913_v44  ;;  %v6020_v63 = vld [vmem:[#allocation11 + $0x2f0] sm:$0xff]  }
 0x103   :  { %5453 = vmatpush3.bf16.msra.mxu1 %v5997_v1  ;;  %4806 = vmatprep.mubr.msk.bf16.mxu0 %vm6951_vm2, %v6365_v51  ;;  %vm7007_vm2 = vmpackc.low %vm404_vm14, %vm388_vm12  ;;  %vm438_vm12 = vcmp.eq.s32.totalorder %v6697_v62, %v6913_v44  ;;  %v6021_v1 = vld [vmem:[#allocation11 + $0x2b0] sm:$0xff]  }
 0x104   :  { %4838 = vmatprep.mubr.msk.bf16.mxu1 %vm6955_vm3, %v6365_v51  ;;  %5390 = vmatprep.subr.bf16.mxu0 %v5998_v4  ;;  %vm7011_vm3 = vmpackc.low %vm406_vm0, %vm390_vm15  ;;  %vm453_vm0 = vcmp.eq.s32.totalorder %v6736_v9, %v6881_v42  ;;  %v6023_v4 = vld [vmem:[#allocation11 + $0x238] sm:$0xff]  }
 0x105   :  { %5454 = vmatprep.subr.bf16.mxu1 %v6000_v7  ;;  %vm7064_vm15 = vmpackc.low %vm438_vm12, %vm422_vm13  ;;  %vm487_vm12 = vcmp.eq.s32.totalorder %v6776_v17, %v6888_v43  ;;  %v6028_v7 = vld [vmem:[#allocation11 + $0x3c0] sm:$0xff]  }
 0x106   :  { %5391 = vmatpush3.bf16.msra.mxu0 %v5999_v6  ;;  %v6026_v6 = vld [vmem:[#allocation11 + $0x340] sm:$0xff]  }
 0x107   :  { %5455 = vmatpush3.bf16.msra.mxu1 %v6001_v8  ;;  %5392 = vmatprep.subr.bf16.mxu0 %v6002_v12  ;;  %v7142_v8 = vld [vmem:[#allocation6 + $0x8] sm:$0xff]  ;;  %v6033_v12 = vld [vmem:[#allocation11 + $0x388] sm:$0xff]  }
 0x108   :  { %5456 = vmatprep.subr.bf16.mxu1 %v6004_v13  ;;  %v7151_v11 = vrot.slane %v7142_v8, %v262_v31  ;;  %v7181_v31 = vrot.slane %v7142_v8, %v258_v35  ;;  %v6027_v35 = vld [vmem:[#allocation11 + $0x300] sm:$0xff]   ;;  %v6034_v13 = vld [vmem:[#allocation11 + $0x350] sm:$0xff]  }
 0x109   :  { %4808 = vmatmul.mubr.msk.bf16.gmra.mrb[36].mxu0 %vm6963_vm6, %v6365_v51  ;;  %vm7039_vm6 = vmpackc.low %vm439_vm11, %vm423_vm8  ;;  %vm468_vm8 = vcmp.eq.s32.totalorder %v6739_v10, %v6904_v60  ;;  %vm454_vm11 = vcmp.eq.s32.totalorder %v6736_v9, %v6913_v44 }
 0x10a   :  { %4840 = vmatmul.mubr.msk.bf16.gmra.mrb[36].mxu1 %vm6971_vm9, %v6365_v51  ;;  %4810 = vmatprep.mubr.msk.bf16.mxu0 %vm6981_vm10, %v6365_v51  ;;  %vm420_vm9 = vcmp.eq.s32.totalorder %v6694_v61, %v6904_v60  ;;  %vm436_vm10 = vcmp.eq.s32.totalorder %v6697_v62, %v6904_v60 }
 0x10b   :  { %4842 = vmatprep.mubr.msk.bf16.mxu1 %vm7003_vm1, %v6365_v51  ;;  %5393 = vmatpush3.bf16.msra.mxu0 %v6003_v16  ;;  %vm7054_vm14 = vmpackc.low %vm436_vm10, %vm420_vm9  ;;  %vm469_vm1 = vcmp.eq.s32.totalorder %v6739_v10, %v6881_v42  ;;  %vm485_vm9 = vcmp.eq.s32.totalorder %v6776_v17, %v6881_v42  ;;  %vm501_vm10 = vcmp.eq.s32.totalorder %v6779_v18, %v6881_v42  ;;  %v6037_v16 = vld [vmem:[#allocation11 + $0x390] sm:$0xff]  }
 0x10c   :  { %5457 = vmatpush3.bf16.msra.mxu1 %v6005_v20  ;;  %5394 = vmatprep.subr.bf16.mxu0 %v6006_v21  ;;  %vm4817_vm4 = vmpackc.low %vm469_vm1, %vm453_vm0  ;;  %v6040_v20 = vld [vmem:[#allocation11 + $0x3d8] sm:$0xff]  }
 0x10d   :  { %5458 = vmatprep.subr.bf16.mxu1 %v6008_v22  ;;  %vm4821_vm0 = vmpackc.low %vm501_vm10, %vm485_vm9  ;;  %vm535_vm9 = vcmp.eq.s32.totalorder %v6821_v34, %v6888_v43  ;;  %v6039_v21 = vld [vmem:[#allocation11 + $0x318] sm:$0xff]  }
 0x10e   :  { %v6041_v22 = vld [vmem:[#allocation11 + $0x398] sm:$0xff]  }
 0x10f   :  { %5395 = vmatpush3.bf16.msra.mxu0 %v6007_v24  ;;  %v6044_v24 = vld [vmem:[#allocation11 + $0x3e0] sm:$0xff]  }
 0x110   :  { %5459 = vmatpush3.bf16.msra.mxu1 %v6009_v25  ;;  %5396 = vmatprep.subr.bf16.mxu0 %v6010_v27  ;;  %v6043_v25 = vld [vmem:[#allocation11 + $0x320] sm:$0xff]  }
 0x111   :  { %4812 = vmatmul.mubr.msk.bf16.gmra.mrb[40].mxu0 %vm7007_vm2, %v6365_v51  ;;  %5460 = vmatprep.subr.bf16.mxu1 %v6012_v29  ;;  %vm455_vm2 = vcmp.eq.s32.totalorder %v6736_v9, %v6888_v43  ;;  %v6045_v27 = vld [vmem:[#allocation11 + $0x3a0] sm:$0xff]   ;;  %v6048_v29 = vld [vmem:[#allocation11 + $0x3e8] sm:$0xff]  }
 0x112   :  { %4844 = vmatmul.mubr.msk.bf16.gmra.mrb[40].mxu1 %vm7011_vm3, %v6365_v51  ;;  %4814 = vmatprep.mubr.msk.bf16.mxu0 %vm7028_vm7, %v6365_v51  ;;  %vm471_vm3 = vcmp.eq.s32.totalorder %v6739_v10, %v6888_v43  ;;  %vm452_vm7 = vcmp.eq.s32.totalorder %v6736_v9, %v6904_v60 }
 0x113   :  { %4846 = vmatprep.mubr.msk.bf16.mxu1 %vm7039_vm6, %v6365_v51  ;;  %5397 = vmatpush3.bf16.msra.mxu0 %v6011_v30  ;;  %vm4849_vm5 = vmpackc.low %vm471_vm3, %vm455_vm2  ;;  %vm470_vm6 = vcmp.eq.s32.totalorder %v6739_v10, %v6913_v44  ;;  %vm484_vm2 = vcmp.eq.s32.totalorder %v6776_v17, %v6904_v60  ;;  %vm500_vm3 = vcmp.eq.s32.totalorder %v6779_v18, %v6904_v60  ;;  %v6047_v30 = vld [vmem:[#allocation11 + $0x328] sm:$0xff]  }
 0x114   :  { %5461 = vmatpush3.bf16.msra.mxu1 %v6013_v36  ;;  %5398 = vmatprep.subr.bf16.mxu0 %v6014_v38  ;;  %vm4819_vm13 = vmpackc.low %vm468_vm8, %vm452_vm7  ;;  %vm517_vm7 = vcmp.eq.s32.totalorder %v6818_v32, %v6881_v42  ;;  %vm533_vm8 = vcmp.eq.s32.totalorder %v6821_v34, %v6881_v42  ;;  %v6049_v36 = vld [vmem:[#allocation11 + $0x3a8] sm:$0xff]   ;;  %v6050_v38 = vld [vmem:[#allocation11 + $0x370] sm:$0xff]  }
 0x115   :  { %5462 = vmatprep.subr.bf16.mxu1 %v6016_v48  ;;  %v6051_v48 = vld [vmem:[#allocation11 + $0x330] sm:$0xff]  }
 0x117   :  { %5399 = vmatpush3.bf16.msra.mxu0 %v6015_v55  ;;  %v6054_v55 = vld [vmem:[#allocation11 + $0x378] sm:$0xff]  }
 0x118   :  { %5463 = vmatpush3.bf16.msra.mxu1 %v6017_v40  ;;  %5400 = vmatprep.subr.bf16.mxu0 %v6018_v47  ;;  %v6056_v40 = vld [vmem:[#allocation11 + $0x3f8] sm:$0xff]  }
 0x119   :  { %4816 = vmatmul.mubr.msk.bf16.gmra.mrb[44].mxu0 %vm7054_vm14, %v6365_v51  ;;  %5464 = vmatprep.subr.bf16.mxu1 %v6020_v63  ;;  %vm503_vm14 = vcmp.eq.s32.totalorder %v6779_v18, %v6888_v43  ;;  %v6055_v47 = vld [vmem:[#allocation11 + $0x338] sm:$0xff]  }
 0x11a   :  { %4848 = vmatmul.mubr.msk.bf16.gmra.mrb[44].mxu1 %vm7064_vm15, %v6365_v51  ;;  %4818 = vmatprep.mubr.msk.bf16.mxu0 %vm4817_vm4, %v6365_v51  ;;  %vm4851_vm15 = vmpackc.low %vm470_vm6, %vm454_vm11  ;;  %vm486_vm4 = vcmp.eq.s32.totalorder %v6776_v17, %v6913_v44  ;;  %vm519_vm6 = vcmp.eq.s32.totalorder %v6818_v32, %v6888_v43  ;;  %v6057_v63 = vld [vmem:[#allocation11 + $0x3b8] sm:$0xff]  }
 0x11b   :  { %4850 = vmatprep.mubr.msk.bf16.mxu1 %vm4849_vm5, %v6365_v51  ;;  %5401 = vmatpush3.bf16.msra.mxu0 %v6019_v0  ;;  %vm4853_vm1 = vmpackc.low %vm503_vm14, %vm487_vm12  ;;  %vm502_vm5 = vcmp.eq.s32.totalorder %v6779_v18, %v6913_v44  ;;  %vm516_vm14 = vcmp.eq.s32.totalorder %v6818_v32, %v6904_v60  ;;  %v7337_v0 = vrot.slane %v7142_v8, %v278_v56 }
 0x11c   :  { %5465 = vmatpush3.bf16.msra.mxu1 %v6021_v1  ;;  %5402 = vmatprep.subr.bf16.mxu0 %v6022_v2  ;;  %vm4823_vm11 = vmpackc.low %vm500_vm3, %vm484_vm2  ;;  %vm549_vm2 = vcmp.eq.s32.totalorder %v6850_v50, %v6881_v42  ;;  %vm565_vm3 = vcmp.eq.s32.totalorder %v6853_v52, %v6881_v42  ;;  %v7157_v42 = vrot.slane %v7142_v8, %v270_v33 }
 0x11d   :  { %5466 = vmatprep.subr.bf16.mxu1 %v6024_v3  ;;  %vm4855_vm10 = vmpackc.low %vm502_vm5, %vm486_vm4  ;;  %vm551_vm5 = vcmp.eq.s32.totalorder %v6850_v50, %v6888_v43  ;;  %v7186_v33 = vrot.slane %v7142_v8, %v266_v37  ;;  %v6029_v37 = vld [vmem:[#allocation11 + $0x380] sm:$0xff]   ;;  %v7343_v1 = vrot.slane %v7142_v8, %v286_v57  ;;  %v7367_v56 = vrot.slane %v7142_v8, %v274_v58 }
 0x11e   :  { %vm4857_vm12 = vmpackc.low %vm535_vm9, %vm519_vm6  ;;  %vm548_vm9 = vcmp.eq.s32.totalorder %v6850_v50, %v6904_v60  ;;  %v7372_v57 = vrot.slane %v7142_v8, %v282_v59 }
 0x11f   :  { %5403 = vmatpush3.bf16.msra.mxu0 %v6023_v4 }
 0x120   :  { %5467 = vmatpush3.bf16.msra.mxu1 %v6025_v5  ;;  %5516 = vmatprep.subr.bf16.mxu0 %v6026_v6 }
 0x121   :  { %4820 = vmatmul.mubr.msk.bf16.gmra.mrb[48].mxu0 %vm4819_vm13, %v6365_v51  ;;  %5580 = vmatprep.subr.bf16.mxu1 %v6028_v7  ;;  %vm4825_vm13 = vmpackc.low %vm533_vm8, %vm517_vm7  ;;  %vm567_vm7 = vcmp.eq.s32.totalorder %v6853_v52, %v6888_v43  ;;  %v6030_v43 = vld [vmem:[#allocation11 + $0x348] sm:$0xff]  }
 0x122   :  { %4852 = vmatmul.mubr.msk.bf16.gmra.mrb[48].mxu1 %vm4851_vm15, %v6365_v51  ;;  %4822 = vmatprep.mubr.msk.bf16.mxu0 %vm4821_vm0, %v6365_v51  ;;  %vm532_vm15 = vcmp.eq.s32.totalorder %v6821_v34, %v6904_v60  ;;  %vm518_vm0 = vcmp.eq.s32.totalorder %v6818_v32, %v6913_v44  ;;  %vm4861_vm6 = vmpackc.low %vm567_vm7, %vm551_vm5  ;;  %vm328_vm7 = vcmp.eq.s32.totalorder %v6587_v26, %v7181_v31 }
 0x123   :  { %4854 = vmatprep.mubr.msk.bf16.mxu1 %vm4853_vm1, %v6365_v51  ;;  %vm534_vm1 = vcmp.eq.s32.totalorder %v6821_v34, %v6913_v44  ;;  %vm4827_vm4 = vmpackc.low %vm532_vm15, %vm516_vm14  ;;  %vm329_vm14 = vcmp.eq.s32.totalorder %v6587_v26, %v7151_v11  ;;  %vm345_vm15 = vcmp.eq.s32.totalorder %v6594_v39, %v7151_v11 }
 0x124   :  { %vm4859_vm8 = vmpackc.low %vm534_vm1, %vm518_vm0  ;;  %vm331_vm1 = vcmp.eq.s32.totalorder %v6587_v26, %v7157_v42 }
 0x129   :  { %4824 = vmatmul.mubr.msk.bf16.gmra.mrb[52].mxu0 %vm4823_vm11, %v6365_v51  ;;  %vm4829_vm11 = vmpackc.low %vm565_vm3, %vm549_vm2  ;;  %vm347_vm2 = vcmp.eq.s32.totalorder %v6594_v39, %v7157_v42 }
 0x12a   :  { %4856 = vmatmul.mubr.msk.bf16.gmra.mrb[52].mxu1 %vm4855_vm10, %v6365_v51  ;;  %4826 = vmatprep.mubr.msk.bf16.mxu0 %vm4825_vm13, %v6365_v51  ;;  %vm564_vm10 = vcmp.eq.s32.totalorder %v6853_v52, %v6904_v60  ;;  %vm550_vm13 = vcmp.eq.s32.totalorder %v6850_v50, %v6913_v44  ;;  %vm4897_vm5 = vmpackc.low %vm347_vm2, %vm331_vm1  ;;  %v6032_v60 = vld [vmem:[#allocation11 + $0x3c8] sm:$0xff]   ;;  %vm360_vm2 = vcmp.eq.s32.totalorder %v6599_v41, %v7181_v31 }
 0x12b   :  { %4858 = vmatprep.mubr.msk.bf16.mxu1 %vm4857_vm12, %v6365_v51  ;;  %vm566_vm12 = vcmp.eq.s32.totalorder %v6853_v52, %v6913_v44  ;;  %vm4831_vm0 = vmpackc.low %vm564_vm10, %vm548_vm9  ;;  %vm361_vm9 = vcmp.eq.s32.totalorder %v6599_v41, %v7151_v11  ;;  %vm377_vm10 = vcmp.eq.s32.totalorder %v6617_v46, %v7151_v11  ;;  %v6031_v44 = vld [vmem:[#allocation11 + $0x308] sm:$0xff]  }
 0x12c   :  { %vm4863_vm3 = vmpackc.low %vm566_vm12, %vm550_vm13  ;;  %vm363_vm12 = vcmp.eq.s32.totalorder %v6599_v41, %v7157_v42 }
 0x131   :  { %4828 = vmatmul.mubr.msk.bf16.gmra.mrb[56].mxu0 %vm4827_vm4, %v6365_v51  ;;  %vm4865_vm4 = vmpackc.low %vm345_vm15, %vm329_vm14  ;;  %vm379_vm14 = vcmp.eq.s32.totalorder %v6617_v46, %v7157_v42 }
 0x132   :  { %4860 = vmatmul.mubr.msk.bf16.gmra.mrb[56].mxu1 %vm4859_vm8, %v6365_v51  ;;  %4830 = vmatprep.mubr.msk.bf16.mxu0 %vm4829_vm11, %v6365_v51  ;;  %vm344_vm8 = vcmp.eq.s32.totalorder %v6594_v39, %v7181_v31  ;;  %vm330_vm11 = vcmp.eq.s32.totalorder %v6587_v26, %v7186_v33  ;;  %vm4901_vm1 = vmpackc.low %vm379_vm14, %vm363_vm12  ;;  %vm392_vm14 = vcmp.eq.s32.totalorder %v6651_v53, %v7181_v31 }
 0x133   :  { %4862 = vmatprep.mubr.msk.bf16.mxu1 %vm4861_vm6, %v6365_v51  ;;  %vm346_vm6 = vcmp.eq.s32.totalorder %v6594_v39, %v7186_v33  ;;  %vm4867_vm13 = vmpackc.low %vm344_vm8, %vm328_vm7  ;;  %vm393_vm7 = vcmp.eq.s32.totalorder %v6651_v53, %v7151_v11  ;;  %vm409_vm8 = vcmp.eq.s32.totalorder %v6654_v54, %v7151_v11 }
 0x134   :  { %vm4899_vm15 = vmpackc.low %vm346_vm6, %vm330_vm11  ;;  %vm395_vm6 = vcmp.eq.s32.totalorder %v6651_v53, %v7157_v42 }
 0x139   :  { %4832 = vmatmul.mubr.msk.bf16.gmra.mrb[60].mxu0 %vm4831_vm0, %v6365_v51  ;;  %vm4869_vm0 = vmpackc.low %vm377_vm10, %vm361_vm9  ;;  %vm411_vm9 = vcmp.eq.s32.totalorder %v6654_v54, %v7157_v42 }
 0x13a   :  { %4864 = vmatmul.mubr.msk.bf16.gmra.mrb[60].mxu1 %vm4863_vm3, %v6365_v51  ;;  %4866 = vmatprep.mubr.msk.bf16.mxu0 %vm4865_vm4, %v6365_v51  ;;  %vm376_vm3 = vcmp.eq.s32.totalorder %v6617_v46, %v7181_v31  ;;  %vm362_vm4 = vcmp.eq.s32.totalorder %v6599_v41, %v7186_v33  ;;  %vm4905_vm12 = vmpackc.low %vm411_vm9, %vm395_vm6  ;;  %vm424_vm9 = vcmp.eq.s32.totalorder %v6694_v61, %v7181_v31 }
 0x13b   :  { %4898 = vmatprep.mubr.msk.bf16.mxu1 %vm4897_vm5, %v6365_v51  ;;  %vm378_vm5 = vcmp.eq.s32.totalorder %v6617_v46, %v7186_v33  ;;  %vm4871_vm11 = vmpackc.low %vm376_vm3, %vm360_vm2  ;;  %vm425_vm2 = vcmp.eq.s32.totalorder %v6694_v61, %v7151_v11  ;;  %vm441_vm3 = vcmp.eq.s32.totalorder %v6697_v62, %v7151_v11 }
 0x13c   :  { %vm4903_vm10 = vmpackc.low %vm378_vm5, %vm362_vm4  ;;  %vm427_vm5 = vcmp.eq.s32.totalorder %v6694_v61, %v7157_v42 }
 0x141   :  { %4868 = vmatmul.mubr.msk.bf16.vlgmr.msra.gmra.mrb[64].mxu0 %vm4867_vm13, %v6365_v51  ;;  %vm4873_vm13 = vmpackc.low %vm409_vm8, %vm393_vm7  ;;  %vm443_vm7 = vcmp.eq.s32.totalorder %v6697_v62, %v7157_v42 }
 0x142   :  { %4900 = vmatmul.mubr.msk.bf16.vlgmr.msra.gmra.mrb[64].mxu1 %vm4899_vm15, %v6365_v51  ;;  %5517 = vmatpush3.bf16.msra.mxu0 %v6027_v35  ;;  %vm408_vm15 = vcmp.eq.s32.totalorder %v6654_v54, %v7181_v31  ;;  %vm4909_vm6 = vmpackc.low %vm443_vm7, %vm427_vm5  ;;  %vm456_vm7 = vcmp.eq.s32.totalorder %v6736_v9, %v7181_v31 }
 0x143   :  { %5581 = vmatpush3.bf16.msra.mxu1 %v6029_v37  ;;  %4870 = vmatprep.mubr.msk.bf16.mxu0 %vm4869_vm0, %v6365_v51  ;;  %vm394_vm0 = vcmp.eq.s32.totalorder %v6651_v53, %v7186_v33  ;;  %vm4875_vm4 = vmpackc.low %vm408_vm15, %vm392_vm14  ;;  %vm457_vm14 = vcmp.eq.s32.totalorder %v6736_v9, %v7151_v11  ;;  %vm473_vm15 = vcmp.eq.s32.totalorder %v6739_v10, %v7151_v11 }
 0x144   :  { %4902 = vmatprep.mubr.msk.bf16.mxu1 %vm4901_vm1, %v6365_v51  ;;  %5518 = vmatprep.subr.bf16.mxu0 %v6030_v43  ;;  %vm410_vm1 = vcmp.eq.s32.totalorder %v6654_v54, %v7186_v33 }
 0x145   :  { %5582 = vmatprep.subr.bf16.mxu1 %v6032_v60  ;;  %vm4907_vm8 = vmpackc.low %vm410_vm1, %vm394_vm0  ;;  %vm459_vm1 = vcmp.eq.s32.totalorder %v6736_v9, %v7157_v42 }
 0x146   :  { %5519 = vmatpush3.bf16.msra.mxu0 %v6031_v44 }
 0x147   :  { %5583 = vmatpush3.bf16.msra.mxu1 %v6033_v12  ;;  %5520 = vmatprep.subr.bf16.mxu0 %v6034_v13 }
 0x148   :  { %5584 = vmatprep.subr.bf16.mxu1 %v6036_v14 }
 0x149   :  { %4872 = vmatmul.mubr.msk.bf16.gmra.mrb[68].mxu0 %vm4871_vm11, %v6365_v51  ;;  %vm4877_vm11 = vmpackc.low %vm441_vm3, %vm425_vm2  ;;  %vm475_vm2 = vcmp.eq.s32.totalorder %v6739_v10, %v7157_v42 }
 0x14a   :  { %4904 = vmatmul.mubr.msk.bf16.gmra.mrb[68].mxu1 %vm4903_vm10, %v6365_v51  ;;  %4874 = vmatprep.mubr.msk.bf16.mxu0 %vm4873_vm13, %v6365_v51  ;;  %vm440_vm10 = vcmp.eq.s32.totalorder %v6697_v62, %v7181_v31  ;;  %vm426_vm13 = vcmp.eq.s32.totalorder %v6694_v61, %v7186_v33  ;;  %vm4913_vm5 = vmpackc.low %vm475_vm2, %vm459_vm1  ;;  %vm488_vm2 = vcmp.eq.s32.totalorder %v6776_v17, %v7181_v31 }
 0x14b   :  { %4906 = vmatprep.mubr.msk.bf16.mxu1 %vm4905_vm12, %v6365_v51  ;;  %5521 = vmatpush3.bf16.msra.mxu0 %v6035_v15  ;;  %vm442_vm12 = vcmp.eq.s32.totalorder %v6697_v62, %v7186_v33  ;;  %vm4879_vm0 = vmpackc.low %vm440_vm10, %vm424_vm9  ;;  %vm489_vm9 = vcmp.eq.s32.totalorder %v6776_v17, %v7151_v11  ;;  %vm505_vm10 = vcmp.eq.s32.totalorder %v6779_v18, %v7151_v11 }
 0x14c   :  { %5585 = vmatpush3.bf16.msra.mxu1 %v6037_v16  ;;  %5522 = vmatprep.subr.bf16.mxu0 %v6038_v19  ;;  %vm4911_vm3 = vmpackc.low %vm442_vm12, %vm426_vm13  ;;  %vm491_vm12 = vcmp.eq.s32.totalorder %v6776_v17, %v7157_v42 }
 0x14d   :  { %5586 = vmatprep.subr.bf16.mxu1 %v6040_v20 }
 0x14f   :  { %5523 = vmatpush3.bf16.msra.mxu0 %v6039_v21 }
 0x150   :  { %5587 = vmatpush3.bf16.msra.mxu1 %v6041_v22  ;;  %5524 = vmatprep.subr.bf16.mxu0 %v6042_v23 }
 0x151   :  { %4876 = vmatmul.mubr.msk.bf16.gmra.mrb[72].mxu0 %vm4875_vm4, %v6365_v51  ;;  %5588 = vmatprep.subr.bf16.mxu1 %v6044_v24  ;;  %vm4881_vm4 = vmpackc.low %vm473_vm15, %vm457_vm14  ;;  %vm507_vm14 = vcmp.eq.s32.totalorder %v6779_v18, %v7157_v42 }
 0x152   :  { %4908 = vmatmul.mubr.msk.bf16.gmra.mrb[72].mxu1 %vm4907_vm8, %v6365_v51  ;;  %4878 = vmatprep.mubr.msk.bf16.mxu0 %vm4877_vm11, %v6365_v51  ;;  %vm472_vm8 = vcmp.eq.s32.totalorder %v6739_v10, %v7181_v31  ;;  %vm458_vm11 = vcmp.eq.s32.totalorder %v6736_v9, %v7186_v33  ;;  %vm4917_vm1 = vmpackc.low %vm507_vm14, %vm491_vm12  ;;  %vm520_vm14 = vcmp.eq.s32.totalorder %v6818_v32, %v7181_v31 }
 0x153   :  { %4910 = vmatprep.mubr.msk.bf16.mxu1 %vm4909_vm6, %v6365_v51  ;;  %5525 = vmatpush3.bf16.msra.mxu0 %v6043_v25  ;;  %vm474_vm6 = vcmp.eq.s32.totalorder %v6739_v10, %v7186_v33  ;;  %vm4883_vm13 = vmpackc.low %vm472_vm8, %vm456_vm7  ;;  %vm521_vm7 = vcmp.eq.s32.totalorder %v6818_v32, %v7151_v11  ;;  %vm537_vm8 = vcmp.eq.s32.totalorder %v6821_v34, %v7151_v11 }
 0x154   :  { %5589 = vmatpush3.bf16.msra.mxu1 %v6045_v27  ;;  %5526 = vmatprep.subr.bf16.mxu0 %v6046_v28  ;;  %vm4915_vm15 = vmpackc.low %vm474_vm6, %vm458_vm11  ;;  %vm523_vm6 = vcmp.eq.s32.totalorder %v6818_v32, %v7157_v42 }
 0x155   :  { %5590 = vmatprep.subr.bf16.mxu1 %v6048_v29 }
 0x157   :  { %5527 = vmatpush3.bf16.msra.mxu0 %v6047_v30 }
 0x158   :  { %5591 = vmatpush3.bf16.msra.mxu1 %v6049_v36  ;;  %5528 = vmatprep.subr.bf16.mxu0 %v6050_v38 }
 0x159   :  { %4880 = vmatmul.mubr.msk.bf16.gmra.mrb[76].mxu0 %vm4879_vm0, %v6365_v51  ;;  %5592 = vmatprep.subr.bf16.mxu1 %v6052_v45  ;;  %vm4885_vm0 = vmpackc.low %vm505_vm10, %vm489_vm9  ;;  %vm539_vm9 = vcmp.eq.s32.totalorder %v6821_v34, %v7157_v42 }
 0x15a   :  { %4912 = vmatmul.mubr.msk.bf16.gmra.mrb[76].mxu1 %vm4911_vm3, %v6365_v51  ;;  %4882 = vmatprep.mubr.msk.bf16.mxu0 %vm4881_vm4, %v6365_v51  ;;  %vm504_vm3 = vcmp.eq.s32.totalorder %v6779_v18, %v7181_v31  ;;  %vm490_vm4 = vcmp.eq.s32.totalorder %v6776_v17, %v7186_v33  ;;  %vm4921_vm12 = vmpackc.low %vm539_vm9, %vm523_vm6  ;;  %vm552_vm9 = vcmp.eq.s32.totalorder %v6850_v50, %v7181_v31 }
 0x15b   :  { %4914 = vmatprep.mubr.msk.bf16.mxu1 %vm4913_vm5, %v6365_v51  ;;  %5529 = vmatpush3.bf16.msra.mxu0 %v6051_v48  ;;  %vm506_vm5 = vcmp.eq.s32.totalorder %v6779_v18, %v7186_v33  ;;  %vm4887_vm11 = vmpackc.low %vm504_vm3, %vm488_vm2  ;;  %vm553_vm2 = vcmp.eq.s32.totalorder %v6850_v50, %v7151_v11  ;;  %vm569_vm3 = vcmp.eq.s32.totalorder %v6853_v52, %v7151_v11 }
 0x15c   :  { %5593 = vmatpush3.bf16.msra.mxu1 %v6053_v49  ;;  %5530 = vmatprep.subr.bf16.mxu0 %v6054_v55  ;;  %vm4919_vm10 = vmpackc.low %vm506_vm5, %vm490_vm4  ;;  %vm555_vm5 = vcmp.eq.s32.totalorder %v6850_v50, %v7157_v42 }
 0x15d   :  { %5594 = vmatprep.subr.bf16.mxu1 %v6056_v40 }
 0x15f   :  { %5531 = vmatpush3.bf16.msra.mxu0 %v6055_v47 }
 0x160   :  { %5595 = vmatpush3.bf16.msra.mxu1 %v6057_v63 }
 0x161   :  { %4884 = vmatmul.mubr.msk.bf16.gmra.mrb[80].mxu0 %vm4883_vm13, %v6365_v51  ;;  %vm4889_vm13 = vmpackc.low %vm537_vm8, %vm521_vm7  ;;  %vm571_vm7 = vcmp.eq.s32.totalorder %v6853_v52, %v7157_v42 }
 0x162   :  { %4916 = vmatmul.mubr.msk.bf16.gmra.mrb[80].mxu1 %vm4915_vm15, %v6365_v51  ;;  %4886 = vmatprep.mubr.msk.bf16.mxu0 %vm4885_vm0, %v6365_v51  ;;  %vm536_vm15 = vcmp.eq.s32.totalorder %v6821_v34, %v7181_v31  ;;  %vm522_vm0 = vcmp.eq.s32.totalorder %v6818_v32, %v7186_v33  ;;  %vm4925_vm6 = vmpackc.low %vm571_vm7, %vm555_vm5  ;;  %vm332_vm7 = vcmp.eq.s32.totalorder %v6587_v26, %v7367_v56 }
 0x163   :  { %4918 = vmatprep.mubr.msk.bf16.mxu1 %vm4917_vm1, %v6365_v51  ;;  %vm538_vm1 = vcmp.eq.s32.totalorder %v6821_v34, %v7186_v33  ;;  %vm4891_vm4 = vmpackc.low %vm536_vm15, %vm520_vm14  ;;  %vm333_vm14 = vcmp.eq.s32.totalorder %v6587_v26, %v7337_v0  ;;  %vm349_vm15 = vcmp.eq.s32.totalorder %v6594_v39, %v7337_v0 }
 0x164   :  { %vm4923_vm8 = vmpackc.low %vm538_vm1, %vm522_vm0  ;;  %vm335_vm1 = vcmp.eq.s32.totalorder %v6587_v26, %v7343_v1 }
 0x169   :  { %4888 = vmatmul.mubr.msk.bf16.gmra.mrb[84].mxu0 %vm4887_vm11, %v6365_v51  ;;  %vm4893_vm11 = vmpackc.low %vm569_vm3, %vm553_vm2  ;;  %vm351_vm2 = vcmp.eq.s32.totalorder %v6594_v39, %v7343_v1 }
 0x16a   :  { %4920 = vmatmul.mubr.msk.bf16.gmra.mrb[84].mxu1 %vm4919_vm10, %v6365_v51  ;;  %4890 = vmatprep.mubr.msk.bf16.mxu0 %vm4889_vm13, %v6365_v51  ;;  %vm568_vm10 = vcmp.eq.s32.totalorder %v6853_v52, %v7181_v31  ;;  %vm554_vm13 = vcmp.eq.s32.totalorder %v6850_v50, %v7186_v33  ;;  %vm4961_vm5 = vmpackc.low %vm351_vm2, %vm335_vm1  ;;  %vm364_vm2 = vcmp.eq.s32.totalorder %v6599_v41, %v7367_v56 }
 0x16b   :  { %4922 = vmatprep.mubr.msk.bf16.mxu1 %vm4921_vm12, %v6365_v51  ;;  %vm570_vm12 = vcmp.eq.s32.totalorder %v6853_v52, %v7186_v33  ;;  %vm4895_vm0 = vmpackc.low %vm568_vm10, %vm552_vm9  ;;  %vm365_vm9 = vcmp.eq.s32.totalorder %v6599_v41, %v7337_v0  ;;  %vm381_vm10 = vcmp.eq.s32.totalorder %v6617_v46, %v7337_v0 }
 0x16c   :  { %vm4927_vm3 = vmpackc.low %vm570_vm12, %vm554_vm13  ;;  %vm367_vm12 = vcmp.eq.s32.totalorder %v6599_v41, %v7343_v1 }
 0x171   :  { %4892 = vmatmul.mubr.msk.bf16.gmra.mrb[88].mxu0 %vm4891_vm4, %v6365_v51  ;;  %vm4929_vm4 = vmpackc.low %vm349_vm15, %vm333_vm14  ;;  %vm383_vm14 = vcmp.eq.s32.totalorder %v6617_v46, %v7343_v1 }
 0x172   :  { %4924 = vmatmul.mubr.msk.bf16.gmra.mrb[88].mxu1 %vm4923_vm8, %v6365_v51  ;;  %4894 = vmatprep.mubr.msk.bf16.mxu0 %vm4893_vm11, %v6365_v51  ;;  %vm348_vm8 = vcmp.eq.s32.totalorder %v6594_v39, %v7367_v56  ;;  %vm334_vm11 = vcmp.eq.s32.totalorder %v6587_v26, %v7372_v57  ;;  %vm4965_vm1 = vmpackc.low %vm383_vm14, %vm367_vm12  ;;  %vm396_vm14 = vcmp.eq.s32.totalorder %v6651_v53, %v7367_v56 }
 0x173   :  { %4926 = vmatprep.mubr.msk.bf16.mxu1 %vm4925_vm6, %v6365_v51  ;;  %vm350_vm6 = vcmp.eq.s32.totalorder %v6594_v39, %v7372_v57  ;;  %vm4931_vm13 = vmpackc.low %vm348_vm8, %vm332_vm7  ;;  %vm397_vm7 = vcmp.eq.s32.totalorder %v6651_v53, %v7337_v0  ;;  %vm413_vm8 = vcmp.eq.s32.totalorder %v6654_v54, %v7337_v0 }
 0x174   :  { %vm4963_vm15 = vmpackc.low %vm350_vm6, %vm334_vm11  ;;  %vm399_vm6 = vcmp.eq.s32.totalorder %v6651_v53, %v7343_v1 }
 0x179   :  { %4896 = vmatmul.mubr.msk.bf16.gmra.mrb[92].mxu0 %vm4895_vm0, %v6365_v51  ;;  %vm4933_vm0 = vmpackc.low %vm381_vm10, %vm365_vm9  ;;  %vm415_vm9 = vcmp.eq.s32.totalorder %v6654_v54, %v7343_v1 }
 0x17a   :  { %4928 = vmatmul.mubr.msk.bf16.gmra.mrb[92].mxu1 %vm4927_vm3, %v6365_v51  ;;  %4930 = vmatprep.mubr.msk.bf16.mxu0 %vm4929_vm4, %v6365_v51  ;;  %vm380_vm3 = vcmp.eq.s32.totalorder %v6617_v46, %v7367_v56  ;;  %vm366_vm4 = vcmp.eq.s32.totalorder %v6599_v41, %v7372_v57  ;;  %vm4969_vm12 = vmpackc.low %vm415_vm9, %vm399_vm6  ;;  %vm428_vm9 = vcmp.eq.s32.totalorder %v6694_v61, %v7367_v56 }
 0x17b   :  { %4962 = vmatprep.mubr.msk.bf16.mxu1 %vm4961_vm5, %v6365_v51  ;;  %vm382_vm5 = vcmp.eq.s32.totalorder %v6617_v46, %v7372_v57  ;;  %vm4935_vm11 = vmpackc.low %vm380_vm3, %vm364_vm2  ;;  %vm429_vm2 = vcmp.eq.s32.totalorder %v6694_v61, %v7337_v0  ;;  %vm445_vm3 = vcmp.eq.s32.totalorder %v6697_v62, %v7337_v0 }
 0x17c   :  { %vm4967_vm10 = vmpackc.low %vm382_vm5, %vm366_vm4  ;;  %vm431_vm5 = vcmp.eq.s32.totalorder %v6694_v61, %v7343_v1 }
 0x181   :  { %4932 = vmatmul.mubr.msk.bf16.vlgmr.msra.gmra.mrb[96].mxu0 %vm4931_vm13, %v6365_v51  ;;  %vm4937_vm13 = vmpackc.low %vm413_vm8, %vm397_vm7  ;;  %vm447_vm7 = vcmp.eq.s32.totalorder %v6697_v62, %v7343_v1 }
 0x182   :  { %4964 = vmatmul.mubr.msk.bf16.vlgmr.msra.gmra.mrb[96].mxu1 %vm4963_vm15, %v6365_v51  ;;  %4934 = vmatprep.mubr.msk.bf16.mxu0 %vm4933_vm0, %v6365_v51  ;;  %vm412_vm15 = vcmp.eq.s32.totalorder %v6654_v54, %v7367_v56  ;;  %vm398_vm0 = vcmp.eq.s32.totalorder %v6651_v53, %v7372_v57  ;;  %vm4973_vm6 = vmpackc.low %vm447_vm7, %vm431_vm5  ;;  %vm460_vm7 = vcmp.eq.s32.totalorder %v6736_v9, %v7367_v56 }
 0x183   :  { %4966 = vmatprep.mubr.msk.bf16.mxu1 %vm4965_vm1, %v6365_v51  ;;  %vm414_vm1 = vcmp.eq.s32.totalorder %v6654_v54, %v7372_v57  ;;  %vm4939_vm4 = vmpackc.low %vm412_vm15, %vm396_vm14  ;;  %vm461_vm14 = vcmp.eq.s32.totalorder %v6736_v9, %v7337_v0  ;;  %vm477_vm15 = vcmp.eq.s32.totalorder %v6739_v10, %v7337_v0 }
 0x184   :  { %vm4971_vm8 = vmpackc.low %vm414_vm1, %vm398_vm0  ;;  %vm463_vm1 = vcmp.eq.s32.totalorder %v6736_v9, %v7343_v1 }
 0x189   :  { %4936 = vmatmul.mubr.msk.bf16.gmra.mrb[100].mxu0 %vm4935_vm11, %v6365_v51  ;;  %vm4941_vm11 = vmpackc.low %vm445_vm3, %vm429_vm2  ;;  %vm479_vm2 = vcmp.eq.s32.totalorder %v6739_v10, %v7343_v1 }
 0x18a   :  { %4968 = vmatmul.mubr.msk.bf16.gmra.mrb[100].mxu1 %vm4967_vm10, %v6365_v51  ;;  %4938 = vmatprep.mubr.msk.bf16.mxu0 %vm4937_vm13, %v6365_v51  ;;  %vm444_vm10 = vcmp.eq.s32.totalorder %v6697_v62, %v7367_v56  ;;  %vm430_vm13 = vcmp.eq.s32.totalorder %v6694_v61, %v7372_v57  ;;  %vm4977_vm5 = vmpackc.low %vm479_vm2, %vm463_vm1  ;;  %vm492_vm2 = vcmp.eq.s32.totalorder %v6776_v17, %v7367_v56 }
 0x18b   :  { %4970 = vmatprep.mubr.msk.bf16.mxu1 %vm4969_vm12, %v6365_v51  ;;  %vm446_vm12 = vcmp.eq.s32.totalorder %v6697_v62, %v7372_v57  ;;  %vm7450_vm0 = vmpackc.low %vm444_vm10, %vm428_vm9  ;;  %vm493_vm9 = vcmp.eq.s32.totalorder %v6776_v17, %v7337_v0  ;;  %vm509_vm10 = vcmp.eq.s32.totalorder %v6779_v18, %v7337_v0 }
 0x18c   :  { %vm4975_vm3 = vmpackc.low %vm446_vm12, %vm430_vm13  ;;  %vm495_vm12 = vcmp.eq.s32.totalorder %v6776_v17, %v7343_v1 }
 0x191   :  { %4940 = vmatmul.mubr.msk.bf16.gmra.mrb[104].mxu0 %vm4939_vm4, %v6365_v51  ;;  %vm4945_vm4 = vmpackc.low %vm477_vm15, %vm461_vm14  ;;  %vm511_vm14 = vcmp.eq.s32.totalorder %v6779_v18, %v7343_v1 }
 0x192   :  { %4972 = vmatmul.mubr.msk.bf16.gmra.mrb[104].mxu1 %vm4971_vm8, %v6365_v51  ;;  %4942 = vmatprep.mubr.msk.bf16.mxu0 %vm4941_vm11, %v6365_v51  ;;  %vm476_vm8 = vcmp.eq.s32.totalorder %v6739_v10, %v7367_v56  ;;  %vm462_vm11 = vcmp.eq.s32.totalorder %v6736_v9, %v7372_v57  ;;  %vm4981_vm1 = vmpackc.low %vm511_vm14, %vm495_vm12  ;;  %vm524_vm14 = vcmp.eq.s32.totalorder %v6818_v32, %v7367_v56 }
 0x193   :  { %4974 = vmatprep.mubr.msk.bf16.mxu1 %vm4973_vm6, %v6365_v51  ;;  %vm478_vm6 = vcmp.eq.s32.totalorder %v6739_v10, %v7372_v57  ;;  %vm7480_vm13 = vmpackc.low %vm476_vm8, %vm460_vm7  ;;  %vm525_vm7 = vcmp.eq.s32.totalorder %v6818_v32, %v7337_v0  ;;  %vm541_vm8 = vcmp.eq.s32.totalorder %v6821_v34, %v7337_v0 }
 0x194   :  { %v5148_v26 = vpop.f32.mrb[0].mxu0  ;;  %vm4979_vm15 = vmpackc.low %vm478_vm6, %vm462_vm11  ;;  %vm527_vm6 = vcmp.eq.s32.totalorder %v6818_v32, %v7343_v1 }
 0x195   :  { %v5212_v39 = vpop.f32.mrb[0].mxu1  ;;  %v5149_v41 = vpop.f32.mrb[1].mxu0 }
 0x196   :  { %v5150_v53 = vadd.f32 %v5149_v41, %v5148_v26  ;;  %v5213_v54 = vpop.f32.mrb[1].mxu1  ;;  %v5151_v61 = vpop.f32.mrb[2].mxu0 }
 0x197   :  { %v5214_v62 = vadd.f32 %v5213_v54, %v5212_v39  ;;  %v5215_v58 = vpop.f32.mrb[2].mxu1  ;;  %v5152_v59 = vpop.f32.mrb[3].mxu0 }
 0x198   :  { %v5153_v2 = vadd.f32 %v5152_v59, %v5151_v61  ;;  %v5216_v3 = vpop.f32.mrb[3].mxu1 }
 0x199   :  { %v7458_v4 = vadd.f32 %v5214_v62, %v5150_v53  ;;  %v5217_v5 = vadd.f32 %v5216_v3, %v5215_v58  ;;  %4944 = vmatmul.mubr.msk.bf16.gmra.mrb[108].mxu0 %vm7450_vm0, %v6365_v51  ;;  %vm4949_vm0 = vmpackc.low %vm509_vm10, %vm493_vm9  ;;  %vm543_vm9 = vcmp.eq.s32.totalorder %v6821_v34, %v7343_v1 }
 0x19a   :  { %4976 = vmatmul.mubr.msk.bf16.gmra.mrb[108].mxu1 %vm4975_vm3, %v6365_v51  ;;  %4946 = vmatprep.mubr.msk.bf16.mxu0 %vm4945_vm4, %v6365_v51  ;;  %vm508_vm3 = vcmp.eq.s32.totalorder %v6779_v18, %v7367_v56  ;;  %vm494_vm4 = vcmp.eq.s32.totalorder %v6776_v17, %v7372_v57  ;;  %vm4985_vm12 = vmpackc.low %vm543_vm9, %vm527_vm6  ;;  %vm556_vm9 = vcmp.eq.s32.totalorder %v6850_v50, %v7367_v56 }
 0x19b   :  { %v7469_v6 = vadd.f32 %v5217_v5, %v5153_v2  ;;  %4978 = vmatprep.mubr.msk.bf16.mxu1 %vm4977_vm5, %v6365_v51  ;;  %vm510_vm5 = vcmp.eq.s32.totalorder %v6779_v18, %v7372_v57  ;;  %vm7510_vm11 = vmpackc.low %vm508_vm3, %vm492_vm2  ;;  %vm557_vm2 = vcmp.eq.s32.totalorder %v6850_v50, %v7337_v0  ;;  %vm573_vm3 = vcmp.eq.s32.totalorder %v6853_v52, %v7337_v0 }
 0x19c   :  { %v5154_v7 = vpop.f32.mrb[4].mxu0  ;;  %vm4983_vm10 = vmpackc.low %vm510_vm5, %vm494_vm4  ;;  %vm559_vm5 = vcmp.eq.s32.totalorder %v6850_v50, %v7343_v1 }
 0x19d   :  { %v5218_v8 = vpop.f32.mrb[4].mxu1  ;;  %v5155_v11 = vpop.f32.mrb[5].mxu0 }
 0x19e   :  { %v5156_v9 = vadd.f32 %v5155_v11, %v5154_v7  ;;  %v5219_v10 = vpop.f32.mrb[5].mxu1  ;;  %v5157_v31 = vpop.f32.mrb[6].mxu0 }
 0x19f   :  { %v5220_v33 = vadd.f32 %v5219_v10, %v5218_v8  ;;  %v5221_v35 = vpop.f32.mrb[6].mxu1  ;;  %v5158_v37 = vpop.f32.mrb[7].mxu0 }
 0x1a0   :  { %v5159_v43 = vadd.f32 %v5158_v37, %v5157_v31  ;;  %v5222_v60 = vpop.f32.mrb[7].mxu1 }
 0x1a1   :  { %v7488_v44 = vadd.f32 %v5220_v33, %v5156_v9  ;;  %v5223_v12 = vadd.f32 %v5222_v60, %v5221_v35  ;;  %4948 = vmatmul.mubr.msk.bf16.gmra.mrb[112].mxu0 %vm7480_vm13, %v6365_v51  ;;  %vm4953_vm13 = vmpackc.low %vm541_vm8, %vm525_vm7  ;;  %vm575_vm7 = vcmp.eq.s32.totalorder %v6853_v52, %v7343_v1 }
 0x1a2   :  { %4980 = vmatmul.mubr.msk.bf16.gmra.mrb[112].mxu1 %vm4979_vm15, %v6365_v51  ;;  %4950 = vmatprep.mubr.msk.bf16.mxu0 %vm4949_vm0, %v6365_v51  ;;  %vm540_vm15 = vcmp.eq.s32.totalorder %v6821_v34, %v7367_v56  ;;  %vm526_vm0 = vcmp.eq.s32.totalorder %v6818_v32, %v7372_v57  ;;  %vm4989_vm6 = vmpackc.low %vm575_vm7, %vm559_vm5 }
 0x1a3   :  { %v7499_v13 = vadd.f32 %v5223_v12, %v5159_v43  ;;  %4982 = vmatprep.mubr.msk.bf16.mxu1 %vm4981_vm1, %v6365_v51  ;;  %vm542_vm1 = vcmp.eq.s32.totalorder %v6821_v34, %v7372_v57  ;;  %vm7540_vm4 = vmpackc.low %vm540_vm15, %vm524_vm14 }
 0x1a4   :  { %v5160_v14 = vpop.f32.mrb[8].mxu0  ;;  %vm4987_vm8 = vmpackc.low %vm542_vm1, %vm526_vm0 }
 0x1a5   :  { %v5224_v15 = vpop.f32.mrb[8].mxu1  ;;  %v5161_v16 = vpop.f32.mrb[9].mxu0 }
 0x1a6   :  { %v5162_v17 = vadd.f32 %v5161_v16, %v5160_v14  ;;  %v5225_v18 = vpop.f32.mrb[9].mxu1  ;;  %v5163_v20 = vpop.f32.mrb[10].mxu0 }
 0x1a7   :  { %v5226_v21 = vadd.f32 %v5225_v18, %v5224_v15  ;;  %v5227_v22 = vpop.f32.mrb[10].mxu1  ;;  %v5164_v23 = vpop.f32.mrb[11].mxu0 }
 0x1a8   :  { %v5165_v24 = vadd.f32 %v5164_v23, %v5163_v20  ;;  %v5228_v25 = vpop.f32.mrb[11].mxu1 }
 0x1a9   :  { %v7518_v27 = vadd.f32 %v5226_v21, %v5162_v17  ;;  %v5229_v28 = vadd.f32 %v5228_v25, %v5227_v22  ;;  %4952 = vmatmul.mubr.msk.bf16.gmra.mrb[116].mxu0 %vm7510_vm11, %v6365_v51  ;;  %vm4957_vm11 = vmpackc.low %vm573_vm3, %vm557_vm2 }
 0x1aa   :  { %4984 = vmatmul.mubr.msk.bf16.gmra.mrb[116].mxu1 %vm4983_vm10, %v6365_v51  ;;  %4954 = vmatprep.mubr.msk.bf16.mxu0 %vm4953_vm13, %v6365_v51  ;;  %vm572_vm10 = vcmp.eq.s32.totalorder %v6853_v52, %v7367_v56  ;;  %vm558_vm13 = vcmp.eq.s32.totalorder %v6850_v50, %v7372_v57 }
 0x1ab   :  { %v7529_v29 = vadd.f32 %v5229_v28, %v5165_v24  ;;  %4986 = vmatprep.mubr.msk.bf16.mxu1 %vm4985_vm12, %v6365_v51  ;;  %vm574_vm12 = vcmp.eq.s32.totalorder %v6853_v52, %v7372_v57  ;;  %vm4959_vm14 = vmpackc.low %vm572_vm10, %vm556_vm9 }
 0x1ac   :  { %v5166_v30 = vpop.f32.mrb[12].mxu0  ;;  %vm4991_vm15 = vmpackc.low %vm574_vm12, %vm558_vm13 }
 0x1ad   :  { %v5230_v36 = vpop.f32.mrb[12].mxu1  ;;  %v5167_v38 = vpop.f32.mrb[13].mxu0 }
 0x1ae   :  { %v5168_v32 = vadd.f32 %v5167_v38, %v5166_v30  ;;  %v5231_v34 = vpop.f32.mrb[13].mxu1  ;;  %v5169_v48 = vpop.f32.mrb[14].mxu0 }
 0x1af   :  { %v5232_v49 = vadd.f32 %v5231_v34, %v5230_v36  ;;  %v5233_v55 = vpop.f32.mrb[14].mxu1  ;;  %v5170_v40 = vpop.f32.mrb[15].mxu0 }
 0x1b0   :  { %v5171_v47 = vadd.f32 %v5170_v40, %v5169_v48  ;;  %v5234_v63 = vpop.f32.mrb[15].mxu1 }
 0x1b1   :  { %v7548_v0 = vadd.f32 %v5232_v49, %v5168_v32  ;;  %v5235_v26 = vadd.f32 %v5234_v63, %v5233_v55  ;;  %4956 = vmatmul.mubr.msk.bf16.gmra.mrb[120].mxu0 %vm7540_vm4, %v6365_v51 }
 0x1b2   :  { %4988 = vmatmul.mubr.msk.bf16.gmra.mrb[120].mxu1 %vm4987_vm8, %v6365_v51  ;;  %4958 = vmatprep.mubr.msk.bf16.mxu0 %vm4957_vm11, %v6365_v51 }
 0x1b3   :  { %v7555_v1 = vadd.f32 %v5235_v26, %v5171_v47  ;;  %4990 = vmatprep.mubr.msk.bf16.mxu1 %vm4989_vm6, %v6365_v51 }
 0x1b4   :  { %v5172_v39 = vpop.f32.mrb[16].mxu0 }
 0x1b5   :  { %v5236_v41 = vpop.f32.mrb[16].mxu1  ;;  %v5173_v46 = vpop.f32.mrb[17].mxu0 }
 0x1b6   :  { %v5174_v53 = vadd.f32 %v5173_v46, %v5172_v39  ;;  %v5237_v54 = vpop.f32.mrb[17].mxu1  ;;  %v5175_v61 = vpop.f32.mrb[18].mxu0 }
 0x1b7   :  { %v5238_v62 = vadd.f32 %v5237_v54, %v5236_v41  ;;  %v5239_v58 = vpop.f32.mrb[18].mxu1  ;;  %v5176_v59 = vpop.f32.mrb[19].mxu0 }
 0x1b8   :  { %v5177_v2 = vadd.f32 %v5176_v59, %v5175_v61  ;;  %v5240_v3 = vpop.f32.mrb[19].mxu1 }
 0x1b9   :  { %v7566_v56 = vadd.f32 %v5238_v62, %v5174_v53  ;;  %v5241_v5 = vadd.f32 %v5240_v3, %v5239_v58  ;;  %4960 = vmatmul.mubr.msk.bf16.gmra.mrb[124].mxu0 %vm4959_vm14, %v6365_v51 }
 0x1ba   :  { %4992 = vmatmul.mubr.msk.bf16.gmra.mrb[124].mxu1 %vm4991_vm15, %v6365_v51 }
 0x1bb   :  { %v7570_v50 = vadd.f32 %v5241_v5, %v5177_v2 }
 0x1bc   :  { %v5178_v52 = vpop.f32.mrb[20].mxu0 }
 0x1bd   :  { %v5242_v57 = vpop.f32.mrb[20].mxu1  ;;  %v5179_v7 = vpop.f32.mrb[21].mxu0 }
 0x1be   :  { %v5180_v8 = vadd.f32 %v5179_v7, %v5178_v52  ;;  %v5243_v11 = vpop.f32.mrb[21].mxu1  ;;  %v5181_v42 = vpop.f32.mrb[22].mxu0 }
 0x1bf   :  { %v5244_v9 = vadd.f32 %v5243_v11, %v5242_v57  ;;  %v5245_v10 = vpop.f32.mrb[22].mxu1  ;;  %v5182_v31 = vpop.f32.mrb[23].mxu0 }
 0x1c0   :  { %v5183_v33 = vadd.f32 %v5182_v31, %v5181_v42  ;;  %v5246_v35 = vpop.f32.mrb[23].mxu1 }
 0x1c1   :  { %v7572_v37 = vadd.f32 %v5244_v9, %v5180_v8  ;;  %v5247_v43 = vadd.f32 %v5246_v35, %v5245_v10 }
 0x1c3   :  { %v7574_v60 = vadd.f32 %v5247_v43, %v5183_v33 }
 0x1c4   :  { %v5184_v12 = vpop.f32.mrb[24].mxu0 }
 0x1c5   :  { %v5248_v51 = vpop.f32.mrb[24].mxu1  ;;  %v5185_v14 = vpop.f32.mrb[25].mxu0 }
 0x1c6   :  { %v5186_v15 = vadd.f32 %v5185_v14, %v5184_v12  ;;  %v5249_v16 = vpop.f32.mrb[25].mxu1  ;;  %v5187_v19 = vpop.f32.mrb[26].mxu0 }
 0x1c7   :  { %v5250_v17 = vadd.f32 %v5249_v16, %v5248_v51  ;;  %v5251_v18 = vpop.f32.mrb[26].mxu1  ;;  %v5188_v20 = vpop.f32.mrb[27].mxu0 }
 0x1c8   :  { %v5189_v21 = vadd.f32 %v5188_v20, %v5187_v19  ;;  %v5252_v22 = vpop.f32.mrb[27].mxu1 }
 0x1c9   :  { %v7576_v23 = vadd.f32 %v5250_v17, %v5186_v15  ;;  %v5253_v24 = vadd.f32 %v5252_v22, %v5251_v18 }
 0x1cb   :  { %v7578_v25 = vadd.f32 %v5253_v24, %v5189_v21 }
 0x1cc   :  { %v5190_v28 = vpop.f32.mrb[28].mxu0 }
 0x1cd   :  { %v5254_v30 = vpop.f32.mrb[28].mxu1  ;;  %v5191_v36 = vpop.f32.mrb[29].mxu0 }
 0x1ce   :  { %v5192_v38 = vadd.f32 %v5191_v36, %v5190_v28  ;;  %v5255_v45 = vpop.f32.mrb[29].mxu1  ;;  %v5193_v32 = vpop.f32.mrb[30].mxu0 }
 0x1cf   :  { %v5256_v34 = vadd.f32 %v5255_v45, %v5254_v30  ;;  %v5257_v48 = vpop.f32.mrb[30].mxu1  ;;  %v5194_v49 = vpop.f32.mrb[31].mxu0 }
 0x1d0   :  { %v5195_v55 = vadd.f32 %v5194_v49, %v5193_v32  ;;  %v5258_v40 = vpop.f32.mrb[31].mxu1 }
 0x1d1   :  { %v7580_v47 = vadd.f32 %v5256_v34, %v5192_v38  ;;  %v5259_v63 = vadd.f32 %v5258_v40, %v5257_v48 }
 0x1d3   :  { %v7582_v26 = vadd.f32 %v5259_v63, %v5195_v55 }
 0x1d4   :  { %v5276_v39 = vpop.f32.mrb[32].mxu0 }
 0x1d5   :  { %v5340_v41 = vpop.f32.mrb[32].mxu1  ;;  %v5277_v46 = vpop.f32.mrb[33].mxu0 }
 0x1d6   :  { %v5278_v53 = vadd.f32 %v5277_v46, %v5276_v39  ;;  %v5341_v54 = vpop.f32.mrb[33].mxu1  ;;  %v5279_v61 = vpop.f32.mrb[34].mxu0 }
 0x1d7   :  { %v5342_v62 = vadd.f32 %v5341_v54, %v5340_v41  ;;  %v5343_v58 = vpop.f32.mrb[34].mxu1  ;;  %v5280_v59 = vpop.f32.mrb[35].mxu0 }
 0x1d8   :  { %v2485_v2 = vadd.f32 %v5278_v53, %v7458_v4  ;;  %v5281_v3 = vadd.f32 %v5280_v59, %v5279_v61  ;;  %v5344_v5 = vpop.f32.mrb[35].mxu1 }
 0x1d9   :  { %v5345_v52 = vadd.f32 %v5344_v5, %v5343_v58 }
 0x1da   :  { %v7585_v57 = vadd.f32 %v5342_v62, %v2485_v2  ;;  %v2488_v7 = vadd.f32 %v5281_v3, %v7469_v6 }
 0x1dc   :  { %v7588_v8 = vadd.f32 %v5345_v52, %v2488_v7  ;;  %v5282_v11 = vpop.f32.mrb[36].mxu0 }
 0x1dd   :  { %v5346_v42 = vpop.f32.mrb[36].mxu1  ;;  %v5283_v9 = vpop.f32.mrb[37].mxu0 }
 0x1de   :  { %v5284_v10 = vadd.f32 %v5283_v9, %v5282_v11  ;;  %v5347_v31 = vpop.f32.mrb[37].mxu1  ;;  %v5285_v33 = vpop.f32.mrb[38].mxu0 }
 0x1df   :  { %v5348_v35 = vadd.f32 %v5347_v31, %v5346_v42  ;;  %v5349_v43 = vpop.f32.mrb[38].mxu1  ;;  %v5286_v12 = vpop.f32.mrb[39].mxu0 }
 0x1e0   :  { %v2493_v4 = vadd.f32 %v5284_v10, %v7488_v44  ;;  %v5287_v51 = vadd.f32 %v5286_v12, %v5285_v33  ;;  %v5350_v14 = vpop.f32.mrb[39].mxu1 }
 0x1e1   :  { %v5351_v15 = vadd.f32 %v5350_v14, %v5349_v43 }
 0x1e2   :  { %v7591_v16 = vadd.f32 %v5348_v35, %v2493_v4  ;;  %v2496_v6 = vadd.f32 %v5287_v51, %v7499_v13 }
 0x1e4   :  { %v7594_v19 = vadd.f32 %v5351_v15, %v2496_v6  ;;  %v5288_v17 = vpop.f32.mrb[40].mxu0 }
 0x1e5   :  { %v5352_v18 = vpop.f32.mrb[40].mxu1  ;;  %v5289_v20 = vpop.f32.mrb[41].mxu0 }
 0x1e6   :  { %v5290_v21 = vadd.f32 %v5289_v20, %v5288_v17  ;;  %v5353_v22 = vpop.f32.mrb[41].mxu1  ;;  %v5291_v24 = vpop.f32.mrb[42].mxu0 }
 0x1e7   :  { %v5354_v28 = vadd.f32 %v5353_v22, %v5352_v18  ;;  %v5355_v30 = vpop.f32.mrb[42].mxu1  ;;  %v5292_v36 = vpop.f32.mrb[43].mxu0 }
 0x1e8   :  { %v2501_v44 = vadd.f32 %v5290_v21, %v7518_v27  ;;  %v5293_v38 = vadd.f32 %v5292_v36, %v5291_v24  ;;  %v5356_v45 = vpop.f32.mrb[43].mxu1 }
 0x1e9   :  { %v5357_v32 = vadd.f32 %v5356_v45, %v5355_v30 }
 0x1ea   :  { %v7597_v34 = vadd.f32 %v5354_v28, %v2501_v44  ;;  %v2504_v13 = vadd.f32 %v5293_v38, %v7529_v29 }
 0x1ec   :  { %v7600_v48 = vadd.f32 %v5357_v32, %v2504_v13  ;;  %v5294_v49 = vpop.f32.mrb[44].mxu0 }
 0x1ed   :  { %v5358_v55 = vpop.f32.mrb[44].mxu1  ;;  %v5295_v40 = vpop.f32.mrb[45].mxu0 }
 0x1ee   :  { %v5296_v63 = vadd.f32 %v5295_v40, %v5294_v49  ;;  %v5359_v39 = vpop.f32.mrb[45].mxu1  ;;  %v5297_v41 = vpop.f32.mrb[46].mxu0 }
 0x1ef   :  { %v5360_v46 = vadd.f32 %v5359_v39, %v5358_v55  ;;  %v5361_v53 = vpop.f32.mrb[46].mxu1  ;;  %v5298_v54 = vpop.f32.mrb[47].mxu0 }
 0x1f0   :  { %v2509_v27 = vadd.f32 %v5296_v63, %v7548_v0  ;;  %v5299_v61 = vadd.f32 %v5298_v54, %v5297_v41  ;;  %v5362_v62 = vpop.f32.mrb[47].mxu1 }
 0x1f1   :  { %v5363_v58 = vadd.f32 %v5362_v62, %v5361_v53 }
 0x1f2   :  { %v7603_v59 = vadd.f32 %v5360_v46, %v2509_v27  ;;  %v2512_v29 = vadd.f32 %v5299_v61, %v7555_v1 }
 0x1f4   :  { %v7606_v2 = vadd.f32 %v5363_v58, %v2512_v29  ;;  %v5300_v3 = vpop.f32.mrb[48].mxu0 }
 0x1f5   :  { %v5364_v5 = vpop.f32.mrb[48].mxu1  ;;  %v5301_v52 = vpop.f32.mrb[49].mxu0 }
 0x1f6   :  { %v5302_v7 = vadd.f32 %v5301_v52, %v5300_v3  ;;  %v5365_v11 = vpop.f32.mrb[49].mxu1  ;;  %v5303_v42 = vpop.f32.mrb[50].mxu0 }
 0x1f7   :  { %v5366_v9 = vadd.f32 %v5365_v11, %v5364_v5  ;;  %v5367_v10 = vpop.f32.mrb[50].mxu1  ;;  %v5304_v31 = vpop.f32.mrb[51].mxu0 }
 0x1f8   :  { %v2517_v0 = vadd.f32 %v5302_v7, %v7566_v56  ;;  %v5305_v33 = vadd.f32 %v5304_v31, %v5303_v42  ;;  %v5368_v35 = vpop.f32.mrb[51].mxu1 }
 0x1f9   :  { %v5369_v43 = vadd.f32 %v5368_v35, %v5367_v10 }
 0x1fa   :  { %v7609_v12 = vadd.f32 %v5366_v9, %v2517_v0  ;;  %v2520_v1 = vadd.f32 %v5305_v33, %v7570_v50 }
 0x1fc   :  { %v7612_v4 = vadd.f32 %v5369_v43, %v2520_v1  ;;  %v5306_v51 = vpop.f32.mrb[52].mxu0 }
 0x1fd   :  { %v5370_v14 = vpop.f32.mrb[52].mxu1  ;;  %v5307_v15 = vpop.f32.mrb[53].mxu0 }
 0x1fe   :  { %v5308_v6 = vadd.f32 %v5307_v15, %v5306_v51  ;;  %v5371_v17 = vpop.f32.mrb[53].mxu1  ;;  %v5309_v18 = vpop.f32.mrb[54].mxu0 }
 0x1ff   :  { %v5372_v20 = vadd.f32 %v5371_v17, %v5370_v14  ;;  %v5373_v21 = vpop.f32.mrb[54].mxu1  ;;  %v5310_v22 = vpop.f32.mrb[55].mxu0 }
 0x200   :  { %v2525_v56 = vadd.f32 %v5308_v6, %v7572_v37  ;;  %v5311_v24 = vadd.f32 %v5310_v22, %v5309_v18  ;;  %v5374_v28 = vpop.f32.mrb[55].mxu1 }
 0x201   :  { %v5375_v30 = vadd.f32 %v5374_v28, %v5373_v21 }
 0x202   :  { %v7615_v36 = vadd.f32 %v5372_v20, %v2525_v56  ;;  %v2528_v50 = vadd.f32 %v5311_v24, %v7574_v60 }
 0x204   :  { %v7618_v44 = vadd.f32 %v5375_v30, %v2528_v50  ;;  %v5312_v38 = vpop.f32.mrb[56].mxu0 }
 0x205   :  { %v5376_v45 = vpop.f32.mrb[56].mxu1  ;;  %v5313_v32 = vpop.f32.mrb[57].mxu0 }
 0x206   :  { %v5314_v13 = vadd.f32 %v5313_v32, %v5312_v38  ;;  %v5377_v49 = vpop.f32.mrb[57].mxu1  ;;  %v5315_v55 = vpop.f32.mrb[58].mxu0 }
 0x207   :  { %v5378_v40 = vadd.f32 %v5377_v49, %v5376_v45  ;;  %v5379_v63 = vpop.f32.mrb[58].mxu1  ;;  %v5316_v39 = vpop.f32.mrb[59].mxu0 }
 0x208   :  { %v2533_v37 = vadd.f32 %v5314_v13, %v7576_v23  ;;  %v5317_v41 = vadd.f32 %v5316_v39, %v5315_v55  ;;  %v5380_v46 = vpop.f32.mrb[59].mxu1 }
 0x209   :  { %v5381_v53 = vadd.f32 %v5380_v46, %v5379_v63 }
 0x20a   :  { %v7621_v54 = vadd.f32 %v5378_v40, %v2533_v37  ;;  %v2536_v60 = vadd.f32 %v5317_v41, %v7578_v25 }
 0x20c   :  { %v7624_v27 = vadd.f32 %v5381_v53, %v2536_v60  ;;  %v5318_v61 = vpop.f32.mrb[60].mxu0 }
 0x20d   :  { %v5382_v62 = vpop.f32.mrb[60].mxu1  ;;  %v5319_v58 = vpop.f32.mrb[61].mxu0 }
 0x20e   :  { %v5320_v29 = vadd.f32 %v5319_v58, %v5318_v61  ;;  %v5383_v3 = vpop.f32.mrb[61].mxu1  ;;  %v5321_v5 = vpop.f32.mrb[62].mxu0 }
 0x20f   :  { %v5384_v52 = vadd.f32 %v5383_v3, %v5382_v62  ;;  %v5385_v7 = vpop.f32.mrb[62].mxu1  ;;  %v5322_v11 = vpop.f32.mrb[63].mxu0 }
 0x210   :  { %v2541_v23 = vadd.f32 %v5320_v29, %v7580_v47  ;;  %v5323_v42 = vadd.f32 %v5322_v11, %v5321_v5  ;;  %v5386_v9 = vpop.f32.mrb[63].mxu1 }
 0x211   :  { %v5387_v10 = vadd.f32 %v5386_v9, %v5385_v7 }
 0x212   :  { %v7627_v31 = vadd.f32 %v5384_v52, %v2541_v23  ;;  %v2544_v25 = vadd.f32 %v5323_v42, %v7582_v26 }
 0x214   :  { %v7630_v0 = vadd.f32 %v5387_v10, %v2544_v25  ;;  %v5404_v33 = vpop.f32.mrb[64].mxu0 }
 0x215   :  { %v5468_v35 = vpop.f32.mrb[64].mxu1  ;;  %v5405_v43 = vpop.f32.mrb[65].mxu0 }
 0x216   :  { %v5406_v1 = vadd.f32 %v5405_v43, %v5404_v33  ;;  %v5469_v51 = vpop.f32.mrb[65].mxu1  ;;  %v5407_v14 = vpop.f32.mrb[66].mxu0 }
 0x217   :  { %v5470_v15 = vadd.f32 %v5469_v51, %v5468_v35  ;;  %v5471_v6 = vpop.f32.mrb[66].mxu1  ;;  %v5408_v17 = vpop.f32.mrb[67].mxu0 }
 0x218   :  { %v2679_v47 = vadd.f32 %v5406_v1, %v7585_v57  ;;  %v5409_v18 = vadd.f32 %v5408_v17, %v5407_v14  ;;  %v5472_v20 = vpop.f32.mrb[67].mxu1 }
 0x219   :  { %v5473_v21 = vadd.f32 %v5472_v20, %v5471_v6 }
 0x21a   :  { %v7633_v22 = vadd.f32 %v5470_v15, %v2679_v47  ;;  %v2682_v26 = vadd.f32 %v5409_v18, %v7588_v8 }
 0x21c   :  { %v7636_v56 = vadd.f32 %v5473_v21, %v2682_v26  ;;  %v5410_v24 = vpop.f32.mrb[68].mxu0 }
 0x21d   :  { %v5474_v28 = vpop.f32.mrb[68].mxu1  ;;  %v5411_v30 = vpop.f32.mrb[69].mxu0 }
 0x21e   :  { %v5412_v50 = vadd.f32 %v5411_v30, %v5410_v24  ;;  %v5475_v38 = vpop.f32.mrb[69].mxu1  ;;  %v5413_v45 = vpop.f32.mrb[70].mxu0 }
 0x21f   :  { %v5476_v32 = vadd.f32 %v5475_v38, %v5474_v28  ;;  %v5477_v13 = vpop.f32.mrb[70].mxu1  ;;  %v5414_v49 = vpop.f32.mrb[71].mxu0 }
 0x220   :  { %v2687_v57 = vadd.f32 %v5412_v50, %v7591_v16  ;;  %v5415_v55 = vadd.f32 %v5414_v49, %v5413_v45  ;;  %v5478_v40 = vpop.f32.mrb[71].mxu1 }
 0x221   :  { %v5479_v63 = vadd.f32 %v5478_v40, %v5477_v13 }
 0x222   :  { %v7639_v39 = vadd.f32 %v5476_v32, %v2687_v57  ;;  %v2690_v8 = vadd.f32 %v5415_v55, %v7594_v19 }
 0x224   :  { %v7642_v37 = vadd.f32 %v5479_v63, %v2690_v8  ;;  %v5416_v41 = vpop.f32.mrb[72].mxu0 }
 0x225   :  { %v5480_v46 = vpop.f32.mrb[72].mxu1  ;;  %v5417_v53 = vpop.f32.mrb[73].mxu0 }
 0x226   :  { %v5418_v60 = vadd.f32 %v5417_v53, %v5416_v41  ;;  %v5481_v61 = vpop.f32.mrb[73].mxu1  ;;  %v5419_v62 = vpop.f32.mrb[74].mxu0 }
 0x227   :  { %v5482_v58 = vadd.f32 %v5481_v61, %v5480_v46  ;;  %v5483_v29 = vpop.f32.mrb[74].mxu1  ;;  %v5420_v3 = vpop.f32.mrb[75].mxu0 }
 0x228   :  { %v2695_v16 = vadd.f32 %v5418_v60, %v7597_v34  ;;  %v5421_v5 = vadd.f32 %v5420_v3, %v5419_v62  ;;  %v5484_v52 = vpop.f32.mrb[75].mxu1 }
 0x229   :  { %v5485_v7 = vadd.f32 %v5484_v52, %v5483_v29 }
 0x22a   :  { %v7645_v11 = vadd.f32 %v5482_v58, %v2695_v16  ;;  %v2698_v19 = vadd.f32 %v5421_v5, %v7600_v48 }
 0x22c   :  { %v7648_v23 = vadd.f32 %v5485_v7, %v2698_v19  ;;  %v5422_v42 = vpop.f32.mrb[76].mxu0 }
 0x22d   :  { %v5486_v9 = vpop.f32.mrb[76].mxu1  ;;  %v5423_v10 = vpop.f32.mrb[77].mxu0 }
 0x22e   :  { %v5424_v25 = vadd.f32 %v5423_v10, %v5422_v42  ;;  %v5487_v33 = vpop.f32.mrb[77].mxu1  ;;  %v5425_v35 = vpop.f32.mrb[78].mxu0 }
 0x22f   :  { %v5488_v43 = vadd.f32 %v5487_v33, %v5486_v9  ;;  %v5489_v1 = vpop.f32.mrb[78].mxu1  ;;  %v5426_v51 = vpop.f32.mrb[79].mxu0 }
 0x230   :  { %v2703_v34 = vadd.f32 %v5424_v25, %v7603_v59  ;;  %v5427_v14 = vadd.f32 %v5426_v51, %v5425_v35  ;;  %v5490_v15 = vpop.f32.mrb[79].mxu1 }
 0x231   :  { %v5491_v6 = vadd.f32 %v5490_v15, %v5489_v1 }
 0x232   :  { %v7651_v17 = vadd.f32 %v5488_v43, %v2703_v34  ;;  %v2706_v48 = vadd.f32 %v5427_v14, %v7606_v2 }
 0x234   :  { %v7654_v47 = vadd.f32 %v5491_v6, %v2706_v48  ;;  %v5428_v18 = vpop.f32.mrb[80].mxu0 }
 0x235   :  { %v5492_v20 = vpop.f32.mrb[80].mxu1  ;;  %v5429_v21 = vpop.f32.mrb[81].mxu0 }
 0x236   :  { %v5430_v26 = vadd.f32 %v5429_v21, %v5428_v18  ;;  %v5493_v24 = vpop.f32.mrb[81].mxu1  ;;  %v5431_v28 = vpop.f32.mrb[82].mxu0 }
 0x237   :  { %v5494_v30 = vadd.f32 %v5493_v24, %v5492_v20  ;;  %v5495_v50 = vpop.f32.mrb[82].mxu1  ;;  %v5432_v38 = vpop.f32.mrb[83].mxu0 }
 0x238   :  { %v2711_v59 = vadd.f32 %v5430_v26, %v7609_v12  ;;  %v5433_v45 = vadd.f32 %v5432_v38, %v5431_v28  ;;  %v5496_v32 = vpop.f32.mrb[83].mxu1 }
 0x239   :  { %v5497_v13 = vadd.f32 %v5496_v32, %v5495_v50 }
 0x23a   :  { %v7657_v49 = vadd.f32 %v5494_v30, %v2711_v59  ;;  %v2714_v2 = vadd.f32 %v5433_v45, %v7612_v4 }
 0x23c   :  { %v7660_v57 = vadd.f32 %v5497_v13, %v2714_v2  ;;  %v5434_v55 = vpop.f32.mrb[84].mxu0 }
 0x23d   :  { %v5498_v40 = vpop.f32.mrb[84].mxu1  ;;  %v5435_v63 = vpop.f32.mrb[85].mxu0 }
 0x23e   :  { %v5436_v8 = vadd.f32 %v5435_v63, %v5434_v55  ;;  %v5499_v41 = vpop.f32.mrb[85].mxu1  ;;  %v5437_v46 = vpop.f32.mrb[86].mxu0 }
 0x23f   :  { %v5500_v53 = vadd.f32 %v5499_v41, %v5498_v40  ;;  %v5501_v60 = vpop.f32.mrb[86].mxu1  ;;  %v5438_v61 = vpop.f32.mrb[87].mxu0 }
 0x240   :  { %v2719_v12 = vadd.f32 %v5436_v8, %v7615_v36  ;;  %v5439_v62 = vadd.f32 %v5438_v61, %v5437_v46  ;;  %v5502_v58 = vpop.f32.mrb[87].mxu1 }
 0x241   :  { %v5503_v29 = vadd.f32 %v5502_v58, %v5501_v60  ;;  %v1216_v60 = vld [vmem:[#allocation2] sm:$0xff] }
 0x242   :  { %v7663_v3 = vadd.f32 %v5500_v53, %v2719_v12  ;;  %v2722_v4 = vadd.f32 %v5439_v62, %v7618_v44  ;;  %v1217_v62 = vld [vmem:[#allocation2 + $0x8] sm:$0xff] }
 0x244   :  { %v7666_v16 = vadd.f32 %v5503_v29, %v2722_v4  ;;  %v5440_v5 = vpop.f32.mrb[88].mxu0 }
 0x245   :  { %v5504_v52 = vpop.f32.mrb[88].mxu1  ;;  %v5441_v7 = vpop.f32.mrb[89].mxu0 }
 0x246   :  { %v5442_v19 = vadd.f32 %v5441_v7, %v5440_v5  ;;  %v5505_v42 = vpop.f32.mrb[89].mxu1  ;;  %v5443_v9 = vpop.f32.mrb[90].mxu0 }
 0x247   :  { %v5506_v10 = vadd.f32 %v5505_v42, %v5504_v52  ;;  %v5507_v25 = vpop.f32.mrb[90].mxu1  ;;  %v5444_v33 = vpop.f32.mrb[91].mxu0 }
 0x248   :  { %v2727_v36 = vadd.f32 %v5442_v19, %v7621_v54  ;;  %v5445_v35 = vadd.f32 %v5444_v33, %v5443_v9  ;;  %v5508_v43 = vpop.f32.mrb[91].mxu1 }
 0x249   :  { %v5509_v1 = vadd.f32 %v5508_v43, %v5507_v25 }
 0x24a   :  { %v7669_v51 = vadd.f32 %v5506_v10, %v2727_v36  ;;  %v2730_v44 = vadd.f32 %v5445_v35, %v7624_v27 }
 0x24c   :  { %v7672_v34 = vadd.f32 %v5509_v1, %v2730_v44  ;;  %v5446_v14 = vpop.f32.mrb[92].mxu0 }
 0x24d   :  { %v5510_v15 = vpop.f32.mrb[92].mxu1  ;;  %v5447_v6 = vpop.f32.mrb[93].mxu0 }
 0x24e   :  { %v5448_v48 = vadd.f32 %v5447_v6, %v5446_v14  ;;  %v5511_v18 = vpop.f32.mrb[93].mxu1  ;;  %v5449_v20 = vpop.f32.mrb[94].mxu0  ;;  %v1219_v14 = vld [vmem:[#allocation2 + $0x18] sm:$0xff] }
 0x24f   :  { %v5512_v21 = vadd.f32 %v5511_v18, %v5510_v15  ;;  %v5513_v26 = vpop.f32.mrb[94].mxu1  ;;  %v5450_v24 = vpop.f32.mrb[95].mxu0 }
 0x250   :  { %v2735_v54 = vadd.f32 %v5448_v48, %v7627_v31  ;;  %v5451_v28 = vadd.f32 %v5450_v24, %v5449_v20  ;;  %v5514_v30 = vpop.f32.mrb[95].mxu1 }
 0x251   :  { %v5515_v50 = vadd.f32 %v5514_v30, %v5513_v26 }
 0x252   :  { %v7675_v38 = vadd.f32 %v5512_v21, %v2735_v54  ;;  %v2738_v27 = vadd.f32 %v5451_v28, %v7630_v0 }
 0x254   :  { %v7678_v59 = vadd.f32 %v5515_v50, %v2738_v27  ;;  %v5532_v45 = vpop.f32.mrb[96].mxu0 }
 0x255   :  { %v5596_v32 = vpop.f32.mrb[96].mxu1  ;;  %v5533_v13 = vpop.f32.mrb[97].mxu0 }
 0x256   :  { %v5534_v2 = vadd.f32 %v5533_v13, %v5532_v45  ;;  %v5597_v55 = vpop.f32.mrb[97].mxu1  ;;  %v5535_v40 = vpop.f32.mrb[98].mxu0 }
 0x257   :  { %v5598_v63 = vadd.f32 %v5597_v55, %v5596_v32  ;;  %v5599_v8 = vpop.f32.mrb[98].mxu1  ;;  %v5536_v41 = vpop.f32.mrb[99].mxu0  ;;  %v1221_v55 = vld [vmem:[#allocation2 + $0x28] sm:$0xff] }
 0x258   :  { %v2873_v31 = vadd.f32 %v5534_v2, %v7633_v22  ;;  %v5537_v46 = vadd.f32 %v5536_v41, %v5535_v40  ;;  %v5600_v53 = vpop.f32.mrb[99].mxu1 }
 0x259   :  { %v5601_v61 = vadd.f32 %v5600_v53, %v5599_v8 }
 0x25a   :  { %v2970_v12 = vadd.f32 %v5598_v63, %v2873_v31  ;;  %v2876_v0 = vadd.f32 %v5537_v46, %v7636_v56  ;;  %v1218_v56 = vld [vmem:[#allocation2 + $0x10] sm:$0xff] }
 0x25c   :  { %v3032_v58 = vadd.f32 %v2970_v12, %v1216_v60  ;;  %v2973_v29 = vadd.f32 %v5601_v61, %v2876_v0  ;;  %v5538_v4 = vpop.f32.mrb[100].mxu0 }
 0x25d   :  { %v5602_v5 = vpop.f32.mrb[100].mxu1  ;;  %v5539_v52 = vpop.f32.mrb[101].mxu0 }
 0x25e   :  { %3048 = vst [vmem:[#allocation2] sm:$0xff] %v3032_v58  ;;  %v3033_v7 = vadd.f32 %v2973_v29, %v1217_v62  ;;  %v5540_v19 = vadd.f32 %v5539_v52, %v5538_v4  ;;  %v5603_v42 = vpop.f32.mrb[101].mxu1  ;;  %v5541_v9 = vpop.f32.mrb[102].mxu0 }
 0x25f   :  { %v5604_v10 = vadd.f32 %v5603_v42, %v5602_v5  ;;  %v5605_v22 = vpop.f32.mrb[102].mxu1  ;;  %v5542_v25 = vpop.f32.mrb[103].mxu0 }
 0x260   :  { %3049 = vst [vmem:[#allocation2 + $0x8] sm:$0xff] %v3033_v7  ;;  %v2881_v33 = vadd.f32 %v5540_v19, %v7639_v39  ;;  %v5543_v36 = vadd.f32 %v5542_v25, %v5541_v9  ;;  %v5606_v35 = vpop.f32.mrb[103].mxu1  ;;  %v1223_v7 = vld [vmem:[#allocation2 + $0x38] sm:$0xff] }
 0x261   :  { %v5607_v43 = vadd.f32 %v5606_v35, %v5605_v22 }
 0x262   :  { %v2978_v1 = vadd.f32 %v5604_v10, %v2881_v33  ;;  %v2884_v44 = vadd.f32 %v5543_v36, %v7642_v37  ;;  %v1220_v37 = vld [vmem:[#allocation2 + $0x20] sm:$0xff] }
 0x264   :  { %v3034_v15 = vadd.f32 %v2978_v1, %v1218_v56  ;;  %v2981_v6 = vadd.f32 %v5607_v43, %v2884_v44  ;;  %v5544_v48 = vpop.f32.mrb[104].mxu0 }
 0x265   :  { %v5608_v18 = vpop.f32.mrb[104].mxu1  ;;  %v5545_v20 = vpop.f32.mrb[105].mxu0 }
 0x266   :  { %3050 = vst [vmem:[#allocation2 + $0x10] sm:$0xff] %v3034_v15  ;;  %v3035_v21 = vadd.f32 %v2981_v6, %v1219_v14  ;;  %v5546_v26 = vadd.f32 %v5545_v20, %v5544_v48  ;;  %v5609_v24 = vpop.f32.mrb[105].mxu1  ;;  %v5547_v54 = vpop.f32.mrb[106].mxu0 }
 0x267   :  { %v5610_v28 = vadd.f32 %v5609_v24, %v5608_v18  ;;  %v5611_v39 = vpop.f32.mrb[106].mxu1  ;;  %v5548_v30 = vpop.f32.mrb[107].mxu0  ;;  %v1225_v18 = vld [vmem:[#allocation2 + $0x48] sm:$0xff] }
 0x268   :  { %3051 = vst [vmem:[#allocation2 + $0x18] sm:$0xff] %v3035_v21  ;;  %v2889_v50 = vadd.f32 %v5546_v26, %v7645_v11  ;;  %v5549_v27 = vadd.f32 %v5548_v30, %v5547_v54  ;;  %v5612_v45 = vpop.f32.mrb[107].mxu1 }
 0x269   :  { %v5613_v32 = vadd.f32 %v5612_v45, %v5611_v39 }
 0x26a   :  { %v2986_v13 = vadd.f32 %v5610_v28, %v2889_v50  ;;  %v2892_v2 = vadd.f32 %v5549_v27, %v7648_v23  ;;  %v1222_v23 = vld [vmem:[#allocation2 + $0x30] sm:$0xff] }
 0x26c   :  { %v3036_v40 = vadd.f32 %v2986_v13, %v1220_v37  ;;  %v2989_v63 = vadd.f32 %v5613_v32, %v2892_v2  ;;  %v5550_v8 = vpop.f32.mrb[108].mxu0 }
 0x26d   :  { %v5614_v41 = vpop.f32.mrb[108].mxu1  ;;  %v5551_v31 = vpop.f32.mrb[109].mxu0 }
 0x26e   :  { %3052 = vst [vmem:[#allocation2 + $0x20] sm:$0xff] %v3036_v40  ;;  %v3037_v46 = vadd.f32 %v2989_v63, %v1221_v55  ;;  %v5552_v53 = vadd.f32 %v5551_v31, %v5550_v8  ;;  %v5615_v60 = vpop.f32.mrb[109].mxu1  ;;  %v5553_v61 = vpop.f32.mrb[110].mxu0  ;;  %v1227_v63 = vld [vmem:[#allocation2 + $0x58] sm:$0xff] }
 0x26f   :  { %v5616_v12 = vadd.f32 %v5615_v60, %v5614_v41  ;;  %v5617_v11 = vpop.f32.mrb[110].mxu1  ;;  %v5554_v0 = vpop.f32.mrb[111].mxu0 }
 0x270   :  { %3053 = vst [vmem:[#allocation2 + $0x28] sm:$0xff] %v3037_v46  ;;  %v2897_v62 = vadd.f32 %v5552_v53, %v7651_v17  ;;  %v5555_v58 = vadd.f32 %v5554_v0, %v5553_v61  ;;  %v5618_v29 = vpop.f32.mrb[111].mxu1 }
 0x271   :  { %v5619_v4 = vadd.f32 %v5618_v29, %v5617_v11 }
 0x272   :  { %v2994_v5 = vadd.f32 %v5616_v12, %v2897_v62  ;;  %v2900_v52 = vadd.f32 %v5555_v58, %v7654_v47  ;;  %v1224_v47 = vld [vmem:[#allocation2 + $0x40] sm:$0xff] }
 0x274   :  { %v3038_v19 = vadd.f32 %v2994_v5, %v1222_v23  ;;  %v2997_v42 = vadd.f32 %v5619_v4, %v2900_v52  ;;  %v5556_v9 = vpop.f32.mrb[112].mxu0 }
 0x275   :  { %v5620_v10 = vpop.f32.mrb[112].mxu1  ;;  %v5557_v22 = vpop.f32.mrb[113].mxu0 }
 0x276   :  { %3054 = vst [vmem:[#allocation2 + $0x30] sm:$0xff] %v3038_v19  ;;  %v3039_v25 = vadd.f32 %v2997_v42, %v1223_v7  ;;  %v5558_v33 = vadd.f32 %v5557_v22, %v5556_v9  ;;  %v5621_v36 = vpop.f32.mrb[113].mxu1  ;;  %v5559_v35 = vpop.f32.mrb[114].mxu0  ;;  %v1229_v7 = vld [vmem:[#allocation2 + $0x68] sm:$0xff] }
 0x277   :  { %v5622_v56 = vadd.f32 %v5621_v36, %v5620_v10  ;;  %v5623_v17 = vpop.f32.mrb[114].mxu1  ;;  %v5560_v43 = vpop.f32.mrb[115].mxu0 }
 0x278   :  { %3055 = vst [vmem:[#allocation2 + $0x38] sm:$0xff] %v3039_v25  ;;  %v2905_v1 = vadd.f32 %v5558_v33, %v7657_v49  ;;  %v5561_v44 = vadd.f32 %v5560_v43, %v5559_v35  ;;  %v5624_v14 = vpop.f32.mrb[115].mxu1 }
 0x279   :  { %v5625_v15 = vadd.f32 %v5624_v14, %v5623_v17 }
 0x27a   :  { %v3002_v6 = vadd.f32 %v5622_v56, %v2905_v1  ;;  %v2908_v48 = vadd.f32 %v5561_v44, %v7660_v57  ;;  %v1226_v57 = vld [vmem:[#allocation2 + $0x50] sm:$0xff] }
 0x27c   :  { %v3040_v20 = vadd.f32 %v3002_v6, %v1224_v47  ;;  %v3005_v21 = vadd.f32 %v5625_v15, %v2908_v48  ;;  %v5562_v26 = vpop.f32.mrb[116].mxu0  ;;  %v1231_v6 = vld [vmem:[#allocation2 + $0x78] sm:$0xff] }
 0x27d   :  { %v5626_v24 = vpop.f32.mrb[116].mxu1  ;;  %v5563_v54 = vpop.f32.mrb[117].mxu0 }
 0x27e   :  { %3056 = vst [vmem:[#allocation2 + $0x40] sm:$0xff] %v3040_v20  ;;  %v3041_v28 = vadd.f32 %v3005_v21, %v1225_v18  ;;  %v5564_v39 = vadd.f32 %v5563_v54, %v5562_v26  ;;  %v5627_v30 = vpop.f32.mrb[117].mxu1  ;;  %v5565_v50 = vpop.f32.mrb[118].mxu0 }
 0x27f   :  { %v5628_v27 = vadd.f32 %v5627_v30, %v5626_v24  ;;  %v5629_v49 = vpop.f32.mrb[118].mxu1  ;;  %v5566_v45 = vpop.f32.mrb[119].mxu0 }
 0x280   :  { %3057 = vst [vmem:[#allocation2 + $0x48] sm:$0xff] %v3041_v28  ;;  %v2913_v37 = vadd.f32 %v5564_v39, %v7663_v3  ;;  %v5567_v32 = vadd.f32 %v5566_v45, %v5565_v50  ;;  %v5630_v13 = vpop.f32.mrb[119].mxu1 }
 0x281   :  { %v5631_v2 = vadd.f32 %v5630_v13, %v5629_v49 }
 0x282   :  { %v3010_v55 = vadd.f32 %v5628_v27, %v2913_v37  ;;  %v2916_v40 = vadd.f32 %v5567_v32, %v7666_v16  ;;  %v1228_v16 = vld [vmem:[#allocation2 + $0x60] sm:$0xff] }
 0x284   :  { %v3042_v8 = vadd.f32 %v3010_v55, %v1226_v57  ;;  %v3013_v41 = vadd.f32 %v5631_v2, %v2916_v40  ;;  %v5568_v31 = vpop.f32.mrb[120].mxu0 }
 0x285   :  { %v5632_v46 = vpop.f32.mrb[120].mxu1  ;;  %v5569_v53 = vpop.f32.mrb[121].mxu0 }
 0x286   :  { %3058 = vst [vmem:[#allocation2 + $0x50] sm:$0xff] %v3042_v8  ;;  %v3043_v60 = vadd.f32 %v3013_v41, %v1227_v63  ;;  %v5570_v61 = vadd.f32 %v5569_v53, %v5568_v31  ;;  %v5633_v12 = vpop.f32.mrb[121].mxu1  ;;  %v5571_v11 = vpop.f32.mrb[122].mxu0 }
 0x287   :  { %v5634_v0 = vadd.f32 %v5633_v12, %v5632_v46  ;;  %v5635_v3 = vpop.f32.mrb[122].mxu1  ;;  %v5572_v62 = vpop.f32.mrb[123].mxu0 }
 0x288   :  { %3059 = vst [vmem:[#allocation2 + $0x58] sm:$0xff] %v3043_v60  ;;  %v2921_v58 = vadd.f32 %v5570_v61, %v7669_v51  ;;  %v5573_v29 = vadd.f32 %v5572_v62, %v5571_v11  ;;  %v5636_v23 = vpop.f32.mrb[123].mxu1 }
 0x289   :  { %v5637_v4 = vadd.f32 %v5636_v23, %v5635_v3 }
 0x28a   :  { %v3018_v5 = vadd.f32 %v5634_v0, %v2921_v58  ;;  %v2924_v52 = vadd.f32 %v5573_v29, %v7672_v34  ;;  %v1230_v34 = vld [vmem:[#allocation2 + $0x70] sm:$0xff] }
 0x28c   :  { %v3044_v19 = vadd.f32 %v3018_v5, %v1228_v16  ;;  %v3021_v42 = vadd.f32 %v5637_v4, %v2924_v52  ;;  %v5574_v9 = vpop.f32.mrb[124].mxu0 }
 0x28d   :  { %v5638_v10 = vpop.f32.mrb[124].mxu1  ;;  %v5575_v22 = vpop.f32.mrb[125].mxu0 }
 0x28e   :  { %3060 = vst [vmem:[#allocation2 + $0x60] sm:$0xff] %v3044_v19  ;;  %v3045_v25 = vadd.f32 %v3021_v42, %v1229_v7  ;;  %v5576_v33 = vadd.f32 %v5575_v22, %v5574_v9  ;;  %v5639_v36 = vpop.f32.mrb[125].mxu1  ;;  %v5577_v35 = vpop.f32.mrb[126].mxu0 }
 0x28f   :  { %v5640_v56 = vadd.f32 %v5639_v36, %v5638_v10  ;;  %v5641_v51 = vpop.f32.mrb[126].mxu1  ;;  %v5578_v17 = vpop.f32.mrb[127].mxu0 }
 0x290   :  { %3061 = vst [vmem:[#allocation2 + $0x68] sm:$0xff] %v3045_v25  ;;  %v2929_v43 = vadd.f32 %v5576_v33, %v7675_v38  ;;  %v5579_v1 = vadd.f32 %v5578_v17, %v5577_v35  ;;  %v5642_v44 = vpop.f32.mrb[127].mxu1 }
 0x291   :  { %v5643_v14 = vadd.f32 %v5642_v44, %v5641_v51 }
 0x292   :  { %v3026_v47 = vadd.f32 %v5640_v56, %v2929_v43  ;;  %v2932_v15 = vadd.f32 %v5579_v1, %v7678_v59 }
 0x294   :  { %v3046_v48 = vadd.f32 %v3026_v47, %v1230_v34  ;;  %v3029_v18 = vadd.f32 %v5643_v14, %v2932_v15 }
 0x296   :  { %3062 = vst [vmem:[#allocation2 + $0x70] sm:$0xff] %v3046_v48  ;;  %v3047_v20 = vadd.f32 %v3029_v18, %v1231_v6 }
 0x298   :  { %3063 = vst [vmem:[#allocation2 + $0x78] sm:$0xff] %v3047_v20 }
 0x299 PF:  { %v7696_v21 = vld [vmem:[#allocation2 + $0x10] sm:$0xff]  ;;  %v7698_v26 = vld [vmem:[#allocation2] sm:$0xff]  ;;  %v7700_v24 = vld [vmem:[#allocation2 + $0x18] sm:$0xff]  ;;  %v6366_v38 = vmov 32  }
 0x29a   :  { %6059 = vset.pattern.permute.xlu1 %v6366_v38  ;;  %6058 = vset.pattern.permute.xlu0 %v6366_v38  ;;  %v3085_v54 = vmax.f32 %v7696_v21, 1.0  ;;  %v3083_v59 = vmax.f32 %v7698_v26, 1.0  ;;  %v3086_v28 = vmax.f32 %v7700_v24, 1.0  ;;  %v7705_v39 = vld [vmem:[#allocation2 + $0x8] sm:$0xff]  ;;  %v7710_v27 = vld [vmem:[#allocation2 + $0x20] sm:$0xff]  ;;  %v6060_v55 = vld [vmem:[#allocation14] sm:$0xff]  }
 0x29b   :  { %v3084_v30 = vmax.f32 %v7705_v39, 1.0  ;;  %v7708_v50 = vld [vmem:[#allocation2 + $0x28] sm:$0xff]  ;;  %v7712_v49 = vld [vmem:[#allocation2 + $0x38] sm:$0xff]  ;;  %v7714_v45 = vld [vmem:[#allocation2 + $0x30] sm:$0xff]  ;;  %v3087_v2 = vmax.f32 %v7710_v27, 1.0  ;;  %5724 = vmatprep.subr.bf16.mxu0 %v6060_v55 }
 0x29c   :  { %6108 = vrcp.f32 %v3085_v54  ;;  %v7716_v37 = vld [vmem:[#allocation2 + $0x48] sm:$0xff]  ;;  %v3088_v32 = vmax.f32 %v7708_v50, 1.0  ;;  %v7719_v13 = vld [vmem:[#allocation2 + $0x40] sm:$0xff]  ;;  %v3090_v40 = vmax.f32 %v7712_v49, 1.0  ;;  %v6061_v63 = vld [vmem:[#allocation14 + $0x8] sm:$0xff]   ;;  %v3089_v8 = vmax.f32 %v7714_v45, 1.0  ;;  %5725 = vmatpush3.bf16.msra.mxu0 %v6060_v55 }
 0x29d   :  { %6110 = vrcp.f32 %v3083_v59  ;;  %v7721_v57 = vld [vmem:[#allocation2 + $0x58] sm:$0xff]  ;;  %v7726_v41 = vld [vmem:[#allocation2 + $0x50] sm:$0xff]  ;;  %v3092_v31 = vmax.f32 %v7716_v37, 1.0  ;;  %v3091_v46 = vmax.f32 %v7719_v13, 1.0  ;;  %5726 = vmatprep.subr.bf16.mxu0 %v6061_v63  ;;  %v6062_v60 = vld [vmem:[#allocation14 + $0x10] sm:$0xff]  }
 0x29e   :  { %6112 = vrcp.f32 %v3086_v28  ;;  %v3094_v53 = vmax.f32 %v7721_v57, 1.0  ;;  %v3093_v61 = vmax.f32 %v7726_v41, 1.0  ;;  %v7732_v12 = vld [vmem:[#allocation2 + $0x68] sm:$0xff]  ;;  %v7734_v0 = vld [vmem:[#allocation2 + $0x60] sm:$0xff]  ;;  %v6064_v5 = vld [vmem:[#allocation14 + $0x20] sm:$0xff]  }
 0x29f   :  { %6114 = vrcp.f32 %v3084_v30  ;;  %v3096_v62 = vmax.f32 %v7732_v12, 1.0  ;;  %v6063_v58 = vld [vmem:[#allocation14 + $0x18] sm:$0xff]   ;;  %v7737_v16 = vld [vmem:[#allocation2 + $0x78] sm:$0xff]  ;;  %v3095_v4 = vmax.f32 %v7734_v0, 1.0  ;;  %v7740_v19 = vld [vmem:[#allocation2 + $0x70] sm:$0xff] }
 0x2a0   :  { %6116 = vrcp.f32 %v3088_v32  ;;  %5727 = vmatpush3.bf16.msra.mxu0 %v6061_v63  ;;  %v3098_v42 = vmax.f32 %v7737_v16, 1.0  ;;  %v6065_v9 = vld [vmem:[#allocation14 + $0x28] sm:$0xff]   ;;  %v3097_v25 = vmax.f32 %v7740_v19, 1.0  ;;  %v6066_v33 = vld [vmem:[#allocation14 + $0x30] sm:$0xff]   ;;  %v6067_v56 = vld [vmem:[#allocation14 + $0x38] sm:$0xff]  }
 0x2a1   :  { %6118 = vrcp.f32 %v3087_v2  ;;  %5728 = vmatprep.subr.bf16.mxu0 %v6062_v60  ;;  %v6068_v43 = vld [vmem:[#allocation12] sm:$0xff]   ;;  %v6085_v15 = vld [vmem:[#allocation15 + $0x8] sm:$0xff]   ;;  %v6086_v6 = vld [vmem:[#allocation15 + $0x10] sm:$0xff]  }
 0x2a2   :  { %6120 = vrcp.f32 %v3090_v40  ;;  %v6084_v47 = vld [vmem:[#allocation15] sm:$0xff]   ;;  %v6087_v48 = vld [vmem:[#allocation15 + $0x18] sm:$0xff]   ;;  %v6089_v20 = vld [vmem:[#allocation15 + $0x28] sm:$0xff]  }
 0x2a3   :  { %6122 = vrcp.f32 %v3089_v8  ;;  %5788 = vmatprep.subr.bf16.mxu1 %v6084_v47  ;;  %v6088_v18 = vld [vmem:[#allocation15 + $0x20] sm:$0xff]  }
 0x2a4   :  { %6124 = vrcp.f32 %v3092_v31  ;;  %5729 = vmatpush3.bf16.msra.mxu0 %v6062_v60  ;;  %5789 = vmatpush3.bf16.msra.mxu1 %v6084_v47  ;;  %v7763_v47 = vld [vmem:[%s7848_s7] ss:$0 sm:$0xff] }
 0x2a5   :  { %6126 = vrcp.f32 %v3091_v46  ;;  %5730 = vmatprep.subr.bf16.mxu0 %v6063_v58  ;;  %5790 = vmatprep.subr.bf16.mxu1 %v6085_v15 }
 0x2a6   :  { %v6109_v11 = vpop.eup %6108  ;;  %6128 = vrcp.f32 %v3094_v53  ;;  %v6069_v53 = vld [vmem:[#allocation12 + $0x8] sm:$0xff]  }
 0x2a7   :  { %v6111_v3 = vpop.eup %6110  ;;  %3143 = vperm.xlu1 %6059, %v6109_v11   ;;  %6130 = vrcp.f32 %v3093_v61 }
 0x2a8   :  { %v6113_v29 = vpop.eup %6112  ;;  %3133 = vperm.xlu0 %6058, %v6111_v3   ;;  %5731 = vmatpush3.bf16.msra.mxu0 %v6063_v58  ;;  %6132 = vrcp.f32 %v3096_v62 }
 0x2a9   :  { %v6115_v23 = vpop.eup %6114  ;;  %5732 = vmatprep.subr.bf16.mxu0 %v6064_v5  ;;  %6134 = vrcp.f32 %v3095_v4  ;;  %5791 = vmatpush3.bf16.msra.mxu1 %v6085_v15 }
 0x2aa   :  { %v6117_v52 = vpop.eup %6116  ;;  %6136 = vrcp.f32 %v3098_v42  ;;  %5792 = vmatprep.subr.bf16.mxu1 %v6086_v6 }
 0x2ab   :  { %3148 = vperm.xlu1 %6059, %v6113_v29   ;;  %v6119_v7 = vpop.eup %6118  ;;  %6138 = vrcp.f32 %v3097_v25 }
 0x2ac   :  { %3138 = vperm.xlu0 %6058, %v6115_v23   ;;  %v6121_v10 = vpop.eup %6120  ;;  %5733 = vmatpush3.bf16.msra.mxu0 %v6064_v5 }
 0x2ad   :  { %v6123_v22 = vpop.eup %6122  ;;  %5734 = vmatprep.subr.bf16.mxu0 %v6065_v9  ;;  %5793 = vmatpush3.bf16.msra.mxu1 %v6086_v6 }
 0x2ae   :  { %v6125_v36 = vpop.eup %6124  ;;  %5794 = vmatprep.subr.bf16.mxu1 %v6087_v48 }
 0x2af   :  { %3158 = vperm.xlu1 %6059, %v6117_v52   ;;  %v6127_v35 = vpop.eup %6126 }
 0x2b0   :  { %3153 = vperm.xlu0 %6058, %v6119_v7   ;;  %5735 = vmatpush3.bf16.msra.mxu0 %v6065_v9  ;;  %v6129_v51 = vpop.eup %6128 }
 0x2b1   :  { %5736 = vmatprep.subr.bf16.mxu0 %v6066_v33  ;;  %v6131_v17 = vpop.eup %6130  ;;  %5795 = vmatpush3.bf16.msra.mxu1 %v6087_v48 }
 0x2b2   :  { %v6133_v1 = vpop.eup %6132  ;;  %5796 = vmatprep.subr.bf16.mxu1 %v6088_v18 }
 0x2b3   :  { %3168 = vperm.xlu1 %6059, %v6121_v10   ;;  %v6135_v44 = vpop.eup %6134 }
 0x2b4   :  { %3163 = vperm.xlu0 %6058, %v6123_v22   ;;  %5737 = vmatpush3.bf16.msra.mxu0 %v6066_v33  ;;  %v6137_v34 = vpop.eup %6136 }
 0x2b5   :  { %5738 = vmatprep.subr.bf16.mxu0 %v6067_v56  ;;  %v6139_v14 = vpop.eup %6138  ;;  %5797 = vmatpush3.bf16.msra.mxu1 %v6088_v18 }
 0x2b6   :  { %5798 = vmatprep.subr.bf16.mxu1 %v6089_v20 }
 0x2b7   :  { %3178 = vperm.xlu1 %6059, %v6125_v36  }
 0x2b8   :  { %3173 = vperm.xlu0 %6058, %v6127_v35   ;;  %5739 = vmatpush3.bf16.msra.mxu0 %v6067_v56  ;;  %v6075_v56 = vld [vmem:[#allocation12 + $0x38] sm:$0xff]  }
 0x2b9   :  { %5756 = vmatprep.subr.bf16.mxu0 %v6068_v43  ;;  %5799 = vmatpush3.bf16.msra.mxu1 %v6089_v20 }
 0x2bb   :  { %3188 = vperm.xlu1 %6059, %v6129_v51   ;;  %v6078_v51 = vld [vmem:[#allocation9 + $0x10] sm:$0xff]  }
 0x2bc   :  { %3183 = vperm.xlu0 %6058, %v6131_v17   ;;  %v6080_v17 = vld [vmem:[#allocation9 + $0x20] sm:$0xff]  }
 0x2bf   :  { %3198 = vperm.xlu1 %6059, %v6133_v1   ;;  %v6083_v1 = vld [vmem:[#allocation9 + $0x38] sm:$0xff]  }
 0x2c0   :  { %3193 = vperm.xlu0 %6058, %v6135_v44   ;;  %v6090_v44 = vld [vmem:[#allocation15 + $0x30] sm:$0xff]  }
 0x2c1   :  { %5800 = vmatprep.subr.bf16.mxu1 %v6090_v44 }
 0x2c2   :  { %5801 = vmatpush3.bf16.msra.mxu1 %v6090_v44 }
 0x2c3   :  { %3208 = vperm.xlu1 %6059, %v6137_v34   ;;  %v6091_v34 = vld [vmem:[#allocation15 + $0x38] sm:$0xff]  }
 0x2c4   :  { %3203 = vperm.xlu0 %6058, %v6139_v14   ;;  %5802 = vmatprep.subr.bf16.mxu1 %v6091_v34  ;;  %v6092_v14 = vld [vmem:[#allocation17] sm:$0xff]  }
 0x2c6   :  { %5803 = vmatpush3.bf16.msra.mxu1 %v6091_v34  ;;  %v6098_v34 = vld [vmem:[#allocation17 + $0x30] sm:$0xff]  }
 0x2c7   :  { %5820 = vmatprep.subr.bf16.mxu1 %v6092_v14 }
 0x326   :  { %v3144_v38 = vpop.permute.xlu1 %3143 }
 0x327   :  { %v3134_v54 = vpop.permute.xlu0 %3133  ;;  %v3213_v28 = vmul.f32 %v3144_v38, %v7696_v21 }
 0x328   :  { %v3211_v2 = vmul.f32 %v3134_v54, %v7698_v26  ;;  %v6070_v26 = vld [vmem:[#allocation12 + $0x10] sm:$0xff]  }
 0x32a   :  { %v3149_v59 = vpop.permute.xlu1 %3148 }
 0x32b   :  { %v3214_v30 = vmul.f32 %v3149_v59, %v7700_v24  ;;  %v3139_v32 = vpop.permute.xlu0 %3138 }
 0x32c   :  { %v3212_v55 = vmul.f32 %v3139_v32, %v7705_v39 }
 0x32d   :  { %v3228_v40 = vpack.c.bf16 %v3214_v30, %v3213_v28 }
 0x32e   :  { %v3159_v63 = vpop.permute.xlu1 %3158  ;;  %v3227_v8 = vpack.c.bf16 %v3212_v55, %v3211_v2 }
 0x32f   :  { %v3216_v31 = vmul.f32 %v3159_v63, %v7708_v50  ;;  %v3154_v46 = vpop.permute.xlu0 %3153 }
 0x330   :  { %v3215_v60 = vmul.f32 %v3154_v46, %v7710_v27  ;;  %5740 = vmatprep.mubr.bf16.mxu0 %v3227_v8  ;;  %v6071_v27 = vld [vmem:[#allocation12 + $0x18] sm:$0xff]   ;;  %v6093_v46 = vld [vmem:[#allocation17 + $0x8] sm:$0xff]  }
 0x331   :  { %5741 = vmatmul.mubr.bf16.vlgmr.msra.gmra.mrb[0].mxu0 %v3228_v40 }
 0x332   :  { %v3229_v61 = vpack.c.bf16 %v3216_v31, %v3215_v60  ;;  %5757 = vmatpush3.bf16.msra.mxu0 %v6068_v43  ;;  %v3169_v21 = vpop.permute.xlu1 %3168  ;;  %v6082_v43 = vld [vmem:[#allocation9 + $0x30] sm:$0xff]  }
 0x333   :  { %v3218_v24 = vmul.f32 %v3169_v21, %v7712_v49  ;;  %v3164_v11 = vpop.permute.xlu0 %3163  ;;  %5758 = vmatprep.subr.bf16.mxu0 %v6069_v53 }
 0x334   :  { %v3217_v39 = vmul.f32 %v3164_v11, %v7714_v45  ;;  %5744 = vmatprep.mubr.bf16.mxu0 %v3229_v61  ;;  %v6072_v45 = vld [vmem:[#allocation12 + $0x20] sm:$0xff]  }
 0x336   :  { %v3230_v3 = vpack.c.bf16 %v3218_v24, %v3217_v39  ;;  %5759 = vmatpush3.bf16.msra.mxu0 %v6069_v53  ;;  %v3179_v50 = vpop.permute.xlu1 %3178  ;;  %v6094_v39 = vld [vmem:[#allocation17 + $0x10] sm:$0xff]  }
 0x337   :  { %v3220_v62 = vmul.f32 %v3179_v50, %v7716_v37  ;;  %v3174_v58 = vpop.permute.xlu0 %3173  ;;  %5760 = vmatprep.subr.bf16.mxu0 %v6070_v26 }
 0x338   :  { %v3219_v29 = vmul.f32 %v3174_v58, %v7719_v13  ;;  %v6073_v13 = vld [vmem:[#allocation12 + $0x28] sm:$0xff]  }
 0x339   :  { %5745 = vmatmul.mubr.bf16.gmra.mrb[4].mxu0 %v3230_v3 }
 0x33a   :  { %v3231_v23 = vpack.c.bf16 %v3220_v62, %v3219_v29  ;;  %5761 = vmatpush3.bf16.msra.mxu0 %v6070_v26  ;;  %v3189_v49 = vpop.permute.xlu1 %3188 }
 0x33b   :  { %v3222_v4 = vmul.f32 %v3189_v49, %v7721_v57  ;;  %v3184_v5 = vpop.permute.xlu0 %3183  ;;  %5762 = vmatprep.subr.bf16.mxu0 %v6071_v27  ;;  %v6095_v49 = vld [vmem:[#allocation17 + $0x18] sm:$0xff]  }
 0x33c   :  { %v3221_v52 = vmul.f32 %v3184_v5, %v7726_v41  ;;  %5748 = vmatprep.mubr.bf16.mxu0 %v3231_v23  ;;  %v6074_v41 = vld [vmem:[#allocation12 + $0x30] sm:$0xff]  }
 0x33e   :  { %v3232_v7 = vpack.c.bf16 %v3222_v4, %v3221_v52  ;;  %5763 = vmatpush3.bf16.msra.mxu0 %v6071_v27  ;;  %v3199_v37 = vpop.permute.xlu1 %3198 }
 0x33f   :  { %v3224_v42 = vmul.f32 %v3199_v37, %v7732_v12  ;;  %v3194_v9 = vpop.permute.xlu0 %3193  ;;  %5764 = vmatprep.subr.bf16.mxu0 %v6072_v45  ;;  %v6076_v12 = vld [vmem:[#allocation9] sm:$0xff]  }
 0x340   :  { %v3223_v10 = vmul.f32 %v3194_v9, %v7734_v0  ;;  %v6077_v0 = vld [vmem:[#allocation9 + $0x8] sm:$0xff]   ;;  %v6096_v9 = vld [vmem:[#allocation17 + $0x20] sm:$0xff]  }
 0x341   :  { %5749 = vmatmul.mubr.bf16.gmra.mrb[8].mxu0 %v3232_v7 }
 0x342   :  { %v3233_v22 = vpack.c.bf16 %v3224_v42, %v3223_v10  ;;  %5765 = vmatpush3.bf16.msra.mxu0 %v6072_v45  ;;  %v3209_v57 = vpop.permute.xlu1 %3208 }
 0x343   :  { %v3226_v25 = vmul.f32 %v3209_v57, %v7737_v16  ;;  %v3204_v33 = vpop.permute.xlu0 %3203  ;;  %5766 = vmatprep.subr.bf16.mxu0 %v6073_v13  ;;  %v6079_v16 = vld [vmem:[#allocation9 + $0x18] sm:$0xff]  }
 0x344   :  { %v3225_v36 = vmul.f32 %v3204_v33, %v7740_v19  ;;  %5752 = vmatprep.mubr.bf16.mxu0 %v3233_v22  ;;  %v6081_v19 = vld [vmem:[#allocation9 + $0x28] sm:$0xff]  }
 0x346   :  { %v3234_v35 = vpack.c.bf16 %v3226_v25, %v3225_v36  ;;  %5767 = vmatpush3.bf16.msra.mxu0 %v6073_v13  ;;  %v6097_v36 = vld [vmem:[#allocation17 + $0x28] sm:$0xff]  }
 0x347   :  { %5768 = vmatprep.subr.bf16.mxu0 %v6074_v41 }
 0x349   :  { %5753 = vmatmul.mubr.bf16.gmra.mrb[12].mxu0 %v3234_v35 }
 0x34a   :  { %5769 = vmatpush3.bf16.msra.mxu0 %v6074_v41  ;;  %5772 = vmatprep.mubr.bf16.mxu0 %v6076_v12 }
 0x34b   :  { %5770 = vmatprep.subr.bf16.mxu0 %v6075_v56 }
 0x34e   :  { %5771 = vmatpush3.bf16.msra.mxu0 %v6075_v56 }
 0x351   :  { %5773 = vmatmul.mubr.bf16.vlgmr.msra.gmra.mrb[0].mxu0 %v6077_v0 }
 0x352   :  { %5776 = vmatprep.mubr.bf16.mxu0 %v6078_v51 }
 0x359   :  { %5777 = vmatmul.mubr.bf16.gmra.mrb[4].mxu0 %v6079_v16 }
 0x35a   :  { %5780 = vmatprep.mubr.bf16.mxu0 %v6080_v17 }
 0x361   :  { %5781 = vmatmul.mubr.bf16.gmra.mrb[8].mxu0 %v6081_v19 }
 0x362   :  { %5784 = vmatprep.mubr.bf16.mxu0 %v6082_v43 }
 0x369   :  { %5785 = vmatmul.mubr.bf16.gmra.mrb[12].mxu0 %v6083_v1 }
 0x424   :  { %v5774_v15 = vpop.f32.mrb[0].mxu0 }
 0x425   :  { %v3630_v6 = vadd.f32 %v5774_v15, %v7763_v47  ;;  %v3558_v48 = vpop.f32.mrb[1].mxu0  ;;  %v6100_v15 = vld [vmem:[#allocation18] sm:$0xff]  }
 0x426   :  { %v3628_v18 = vadd.f32 %v7763_v47, %v3558_v48  ;;  %v5775_v20 = vpop.f32.mrb[2].mxu0  ;;  %5852 = vmatprep.subr.bf16.mxu0 %v6100_v15  ;;  %v7781_v48 = vld [vmem:[#allocation18 + $0x18] sm:$0xff]  }
 0x427   :  { %v3631_v38 = vadd.f32 %v5775_v20, %v7763_v47  ;;  %v3561_v54 = vpop.f32.mrb[3].mxu0  ;;  %v3646_v28 = vmax.f32 %v3630_v6, 0.0  ;;  %v6101_v6 = vld [vmem:[#allocation18 + $0x8] sm:$0xff]   ;;  %5853 = vmatpush3.bf16.msra.mxu0 %v6100_v15 }
 0x428   :  { %v3629_v59 = vadd.f32 %v7763_v47, %v3561_v54  ;;  %v3644_v32 = vmax.f32 %v3628_v18, 0.0  ;;  %5854 = vmatprep.subr.bf16.mxu0 %v6101_v6  ;;  %v7784_v18 = vld [vmem:[#allocation18 + $0x20] sm:$0xff]   ;;  %v7788_v20 = vld [vmem:[#allocation18 + $0x28] sm:$0xff]  }
 0x429   :  { %v3647_v30 = vmax.f32 %v3631_v38, 0.0  ;;  %v7796_v38 = vld [vmem:[%s7850_s9] ss:$0 sm:$0xff] }
 0x42a   :  { %v3645_v2 = vmax.f32 %v3629_v59, 0.0 }
 0x42b   :  { %v3661_v55 = vpack.c.bf16 %v3647_v30, %v3646_v28  ;;  %5855 = vmatpush3.bf16.msra.mxu0 %v6101_v6 }
 0x42c   :  { %v5778_v40 = vpop.f32.mrb[4].mxu0  ;;  %v3660_v63 = vpack.c.bf16 %v3645_v2, %v3644_v32 }
 0x42d   :  { %v3634_v8 = vadd.f32 %v5778_v40, %v7763_v47  ;;  %v3574_v31 = vpop.f32.mrb[5].mxu0 }
 0x42e   :  { %v3632_v53 = vadd.f32 %v7763_v47, %v3574_v31  ;;  %v5779_v60 = vpop.f32.mrb[6].mxu0  ;;  %5804 = vmatprep.mubr.bf16.mxu1 %v3660_v63 }
 0x42f   :  { %v3635_v61 = vadd.f32 %v5779_v60, %v7763_v47  ;;  %v3577_v21 = vpop.f32.mrb[7].mxu0  ;;  %5805 = vmatmul.mubr.bf16.vlgmr.msra.gmra.mrb[0].mxu1 %v3661_v55  ;;  %v3650_v11 = vmax.f32 %v3634_v8, 0.0 }
 0x430   :  { %v3633_v24 = vadd.f32 %v7763_v47, %v3577_v21  ;;  %5821 = vmatpush3.bf16.msra.mxu1 %v6092_v14  ;;  %v3648_v3 = vmax.f32 %v3632_v53, 0.0  ;;  %v6099_v14 = vld [vmem:[#allocation17 + $0x38] sm:$0xff]  }
 0x431   :  { %v3651_v26 = vmax.f32 %v3635_v61, 0.0  ;;  %5822 = vmatprep.subr.bf16.mxu1 %v6093_v46 }
 0x432   :  { %v3649_v50 = vmax.f32 %v3633_v24, 0.0 }
 0x433   :  { %v3663_v62 = vpack.c.bf16 %v3651_v26, %v3650_v11 }
 0x434   :  { %v3662_v58 = vpack.c.bf16 %v3649_v50, %v3648_v3  ;;  %v5782_v27 = vpop.f32.mrb[8].mxu0  ;;  %5823 = vmatpush3.bf16.msra.mxu1 %v6093_v46 }
 0x435   :  { %v3638_v29 = vadd.f32 %v5782_v27, %v7763_v47  ;;  %v3590_v23 = vpop.f32.mrb[9].mxu0  ;;  %5824 = vmatprep.subr.bf16.mxu1 %v6094_v39 }
 0x436   :  { %v3636_v4 = vadd.f32 %v7763_v47, %v3590_v23  ;;  %v5783_v5 = vpop.f32.mrb[10].mxu0  ;;  %5808 = vmatprep.mubr.bf16.mxu1 %v3662_v58 }
 0x437   :  { %v3639_v45 = vadd.f32 %v5783_v5, %v7763_v47  ;;  %v3593_v52 = vpop.f32.mrb[11].mxu0  ;;  %5809 = vmatmul.mubr.bf16.gmra.mrb[4].mxu1 %v3663_v62  ;;  %v3654_v37 = vmax.f32 %v3638_v29, 0.0 }
 0x438   :  { %v3637_v7 = vadd.f32 %v7763_v47, %v3593_v52  ;;  %5825 = vmatpush3.bf16.msra.mxu1 %v6094_v39  ;;  %v3652_v13 = vmax.f32 %v3636_v4, 0.0 }
 0x439   :  { %v3655_v42 = vmax.f32 %v3639_v45, 0.0  ;;  %5826 = vmatprep.subr.bf16.mxu1 %v6095_v49 }
 0x43a   :  { %v3653_v10 = vmax.f32 %v3637_v7, 0.0 }
 0x43b   :  { %v3665_v22 = vpack.c.bf16 %v3655_v42, %v3654_v37 }
 0x43c   :  { %v3664_v57 = vpack.c.bf16 %v3653_v10, %v3652_v13  ;;  %v5786_v25 = vpop.f32.mrb[12].mxu0  ;;  %5827 = vmatpush3.bf16.msra.mxu1 %v6095_v49 }
 0x43d   :  { %v3642_v33 = vadd.f32 %v5786_v25, %v7763_v47  ;;  %v3606_v41 = vpop.f32.mrb[13].mxu0  ;;  %5828 = vmatprep.subr.bf16.mxu1 %v6096_v9 }
 0x43e   :  { %v3640_v35 = vadd.f32 %v7763_v47, %v3606_v41  ;;  %v5787_v12 = vpop.f32.mrb[14].mxu0  ;;  %5812 = vmatprep.mubr.bf16.mxu1 %v3664_v57 }
 0x43f   :  { %v3643_v56 = vadd.f32 %v5787_v12, %v7763_v47  ;;  %v3609_v0 = vpop.f32.mrb[15].mxu0  ;;  %5813 = vmatmul.mubr.bf16.gmra.mrb[8].mxu1 %v3665_v22  ;;  %v3658_v16 = vmax.f32 %v3642_v33, 0.0 }
 0x440   :  { %v3641_v51 = vadd.f32 %v7763_v47, %v3609_v0  ;;  %5829 = vmatpush3.bf16.msra.mxu1 %v6096_v9  ;;  %v3656_v19 = vmax.f32 %v3640_v35, 0.0  ;;  %v6102_v47 = vld [vmem:[#allocation18 + $0x10] sm:$0xff]  }
 0x441   :  { %v3659_v17 = vmax.f32 %v3643_v56, 0.0  ;;  %5830 = vmatprep.subr.bf16.mxu1 %v6097_v36  ;;  %5856 = vmatprep.subr.bf16.mxu0 %v6102_v47 }
 0x442   :  { %v3657_v43 = vmax.f32 %v3641_v51, 0.0  ;;  %5857 = vmatpush3.bf16.msra.mxu0 %v6102_v47 }
 0x443   :  { %v3667_v1 = vpack.c.bf16 %v3659_v17, %v3658_v16  ;;  %5858 = vmatprep.subr.bf16.mxu0 %v7781_v48 }
 0x444   :  { %v3666_v44 = vpack.c.bf16 %v3657_v43, %v3656_v19  ;;  %5831 = vmatpush3.bf16.msra.mxu1 %v6097_v36 }
 0x445   :  { %5832 = vmatprep.subr.bf16.mxu1 %v6098_v34 }
 0x446   :  { %5816 = vmatprep.mubr.bf16.mxu1 %v3666_v44  ;;  %5859 = vmatpush3.bf16.msra.mxu0 %v7781_v48 }
 0x447   :  { %5817 = vmatmul.mubr.bf16.gmra.mrb[12].mxu1 %v3667_v1  ;;  %5860 = vmatprep.subr.bf16.mxu0 %v7784_v18 }
 0x448   :  { %5833 = vmatpush3.bf16.msra.mxu1 %v6098_v34 }
 0x449   :  { %5834 = vmatprep.subr.bf16.mxu1 %v6099_v14 }
 0x44a   :  { %5861 = vmatpush3.bf16.msra.mxu0 %v7784_v18 }
 0x44b   :  { %5862 = vmatprep.subr.bf16.mxu0 %v7788_v20 }
 0x44c   :  { %5835 = vmatpush3.bf16.msra.mxu1 %v6099_v14  ;;  %v6106_v14 = vld [vmem:[#allocation18 + $0x30] sm:$0xff]  }
 0x44d   :  { %5884 = vmatprep.subr.bf16.mxu1 %v6100_v15 }
 0x44e   :  { %5863 = vmatpush3.bf16.msra.mxu0 %v7788_v20 }
 0x44f   :  { %5864 = vmatprep.subr.bf16.mxu0 %v6106_v14 }
 0x452   :  { %5865 = vmatpush3.bf16.msra.mxu0 %v6106_v14 }
 0x502   :  { %v5806_v54 = vpop.f32.mrb[0].mxu1 }
 0x503   :  { %v3782_v59 = vadd.f32 %v5806_v54, %v7796_v38  ;;  %v3773_v28 = vpop.f32.mrb[1].mxu1 }
 0x504   :  { %v3774_v30 = vadd.f32 %v7796_v38, %v3773_v28  ;;  %v5807_v32 = vpop.f32.mrb[2].mxu1 }
 0x505   :  { %v3785_v2 = vadd.f32 %v5807_v32, %v7796_v38  ;;  %v3776_v55 = vpop.f32.mrb[3].mxu1  ;;  %v3838_v63 = vmax.f32 %v3782_v59, 0.0 }
 0x506   :  { %v3777_v40 = vadd.f32 %v7796_v38, %v3776_v55  ;;  %v3836_v31 = vmax.f32 %v3774_v30, 0.0 }
 0x507   :  { %v3839_v8 = vmax.f32 %v3785_v2, 0.0 }
 0x508   :  { %v3837_v46 = vmax.f32 %v3777_v40, 0.0 }
 0x509   :  { %v3853_v53 = vpack.c.bf16 %v3839_v8, %v3838_v63 }
 0x50a   :  { %v3852_v60 = vpack.c.bf16 %v3837_v46, %v3836_v31  ;;  %v5810_v61 = vpop.f32.mrb[4].mxu1 }
 0x50b   :  { %v3798_v21 = vadd.f32 %v5810_v61, %v7796_v38  ;;  %v3789_v24 = vpop.f32.mrb[5].mxu1 }
 0x50c   :  { %v3790_v11 = vadd.f32 %v7796_v38, %v3789_v24  ;;  %v5811_v26 = vpop.f32.mrb[6].mxu1  ;;  %5836 = vmatprep.mubr.bf16.mxu1 %v3852_v60 }
 0x50d   :  { %v3801_v39 = vadd.f32 %v5811_v26, %v7796_v38  ;;  %v3792_v3 = vpop.f32.mrb[7].mxu1  ;;  %5837 = vmatmul.mubr.bf16.vlgmr.msra.gmra.mrb[16].mxu1 %v3853_v53  ;;  %v3842_v62 = vmax.f32 %v3798_v21, 0.0 }
 0x50e   :  { %v3793_v50 = vadd.f32 %v7796_v38, %v3792_v3  ;;  %5892 = vmatpush3.bf16.msra.mxu1 %v6100_v15  ;;  %v3840_v27 = vmax.f32 %v3790_v11, 0.0  ;;  %v6107_v15 = vld [vmem:[#allocation18 + $0x38] sm:$0xff]  }
 0x50f   :  { %v3843_v58 = vmax.f32 %v3801_v39, 0.0  ;;  %5885 = vmatprep.subr.bf16.mxu1 %v6101_v6  ;;  %5866 = vmatprep.subr.bf16.mxu0 %v6107_v15 }
 0x510   :  { %v3841_v29 = vmax.f32 %v3793_v50, 0.0  ;;  %5867 = vmatpush3.bf16.msra.mxu0 %v6107_v15 }
 0x511   :  { %v3855_v23 = vpack.c.bf16 %v3843_v58, %v3842_v62 }
 0x512   :  { %v3854_v49 = vpack.c.bf16 %v3841_v29, %v3840_v27  ;;  %v5814_v4 = vpop.f32.mrb[8].mxu1  ;;  %5893 = vmatpush3.bf16.msra.mxu1 %v6101_v6  ;;  %v5027_v6 = vld [vmem:[%s7852_s11] ss:$0 sm:$0xff] }
 0x513   :  { %v3814_v5 = vadd.f32 %v5814_v4, %v7796_v38  ;;  %v3805_v45 = vpop.f32.mrb[9].mxu1  ;;  %5886 = vmatprep.subr.bf16.mxu1 %v6102_v47 }
 0x514   :  { %v3806_v52 = vadd.f32 %v7796_v38, %v3805_v45  ;;  %v5815_v7 = vpop.f32.mrb[10].mxu1  ;;  %5840 = vmatprep.mubr.bf16.mxu1 %v3854_v49 }
 0x515   :  { %v3817_v37 = vadd.f32 %v5815_v7, %v7796_v38  ;;  %v3808_v42 = vpop.f32.mrb[11].mxu1  ;;  %5841 = vmatmul.mubr.bf16.gmra.mrb[20].mxu1 %v3855_v23  ;;  %v3846_v13 = vmax.f32 %v3814_v5, 0.0 }
 0x516   :  { %v3809_v9 = vadd.f32 %v7796_v38, %v3808_v42  ;;  %5894 = vmatpush3.bf16.msra.mxu1 %v6102_v47  ;;  %v3844_v22 = vmax.f32 %v3806_v52, 0.0 }
 0x517   :  { %v3847_v10 = vmax.f32 %v3817_v37, 0.0  ;;  %5887 = vmatprep.subr.bf16.mxu1 %v7781_v48 }
 0x518   :  { %v3845_v57 = vmax.f32 %v3809_v9, 0.0 }
 0x519   :  { %v3857_v25 = vpack.c.bf16 %v3847_v10, %v3846_v13 }
 0x51a   :  { %v3856_v33 = vpack.c.bf16 %v3845_v57, %v3844_v22  ;;  %v5818_v41 = vpop.f32.mrb[12].mxu1  ;;  %5895 = vmatpush3.bf16.msra.mxu1 %v7781_v48 }
 0x51b   :  { %v3830_v36 = vadd.f32 %v5818_v41, %v7796_v38  ;;  %v3821_v35 = vpop.f32.mrb[13].mxu1  ;;  %5888 = vmatprep.subr.bf16.mxu1 %v7784_v18 }
 0x51c   :  { %v3822_v12 = vadd.f32 %v7796_v38, %v3821_v35  ;;  %v5819_v56 = vpop.f32.mrb[14].mxu1  ;;  %5844 = vmatprep.mubr.bf16.mxu1 %v3856_v33 }
 0x51d   :  { %v3833_v0 = vadd.f32 %v5819_v56, %v7796_v38  ;;  %v3824_v51 = vpop.f32.mrb[15].mxu1  ;;  %5845 = vmatmul.mubr.bf16.gmra.mrb[24].mxu1 %v3857_v25  ;;  %v3850_v17 = vmax.f32 %v3830_v36, 0.0 }
 0x51e   :  { %v3825_v16 = vadd.f32 %v7796_v38, %v3824_v51  ;;  %5896 = vmatpush3.bf16.msra.mxu1 %v7784_v18  ;;  %v3848_v43 = vmax.f32 %v3822_v12, 0.0 }
 0x51f   :  { %v3851_v19 = vmax.f32 %v3833_v0, 0.0  ;;  %5889 = vmatprep.subr.bf16.mxu1 %v7788_v20 }
 0x520   :  { %v3849_v1 = vmax.f32 %v3825_v16, 0.0 }
 0x521   :  { %v3859_v44 = vpack.c.bf16 %v3851_v19, %v3850_v17  ;;  %v5036_v19 = vld [vmem:[%s7854_s13] ss:$0 sm:$0xff]  ;;  %s6367_s13 = smov [#allocation20]  }
 0x522   :  { %v3858_v34 = vpack.c.bf16 %v3849_v1, %v3848_v43  ;;  %5897 = vmatpush3.bf16.msra.mxu1 %v7788_v20  ;;  %s4321_s18 = sshll.u32 %s6367_s13, 4  ;;  %s4322_s18 = int_to_ptr.vmem [resolvable:$true] %s4321_s18 }
 0x523   :  { %5890 = vmatprep.subr.bf16.mxu1 %v6106_v14  ;;  %s6320_s19 = scalar_lea.vmem %s4322_s18, 1024  ;;  %p6325_p5 = scmp.lt.s32.totalorder %s4322_s18, %s4322_s18 }
 0x524   :  { %5848 = vmatprep.mubr.bf16.mxu1 %v3858_v34  ;;  %p6321_p4 = scmp.ne.s32.totalorder %s4322_s18, %s6320_s19  ;;  %p6326_p6 = scmp.lt.s32.totalorder %s6320_s19, %s6320_s19 }
 0x525   :  { %5849 = vmatmul.mubr.bf16.gmra.mrb[28].mxu1 %v3859_v44 }
 0x526   :  { %5898 = vmatpush3.bf16.msra.mxu1 %v6106_v14  ;;  %p6327_p7 = por %p6326_p6, %p6325_p5 }
 0x527   :  { %5891 = vmatprep.subr.bf16.mxu1 %v6107_v15 }
 0x528   :  { %p6328_p8 = pnand %p6327_p7, %p6321_p4 }
 0x52a   :  { %5899 = vmatpush3.bf16.msra.mxu1 %v6107_v15 }
 0x5e0   :  { %v5838_v47 = vpop.f32.mrb[16].mxu1 }
 0x5e1   :  { %v3974_v48 = vadd.f32 %v5838_v47, %v5027_v6  ;;  %v3965_v18 = vpop.f32.mrb[17].mxu1 }
 0x5e2   :  { %v3966_v20 = vadd.f32 %v5027_v6, %v3965_v18  ;;  %v5839_v38 = vpop.f32.mrb[18].mxu1 }
 0x5e3   :  { %v3977_v54 = vadd.f32 %v5839_v38, %v5027_v6  ;;  %v3968_v59 = vpop.f32.mrb[19].mxu1  ;;  %v4030_v30 = vmax.f32 %v3974_v48, 0.0 }
 0x5e4   :  { %v3969_v28 = vadd.f32 %v5027_v6, %v3968_v59  ;;  %v4028_v2 = vmax.f32 %v3966_v20, 0.0 }
 0x5e5   :  { %v4031_v32 = vmax.f32 %v3977_v54, 0.0 }
 0x5e6   :  { %v4029_v55 = vmax.f32 %v3969_v28, 0.0 }
 0x5e7   :  { %v4045_v40 = vpack.c.bf16 %v4031_v32, %v4030_v30 }
 0x5e8   :  { %v4044_v63 = vpack.c.bf16 %v4029_v55, %v4028_v2  ;;  %v5842_v8 = vpop.f32.mrb[20].mxu1 }
 0x5e9   :  { %v3990_v31 = vadd.f32 %v5842_v8, %v5027_v6  ;;  %v3981_v46 = vpop.f32.mrb[21].mxu1 }
 0x5ea   :  { %v3982_v53 = vadd.f32 %v5027_v6, %v3981_v46  ;;  %v5843_v60 = vpop.f32.mrb[22].mxu1  ;;  %5868 = vmatprep.mubr.bf16.mxu0 %v4044_v63 }
 0x5eb   :  { %v3993_v61 = vadd.f32 %v5843_v60, %v5027_v6  ;;  %v3984_v21 = vpop.f32.mrb[23].mxu1  ;;  %5869 = vmatmul.mubr.bf16.vlgmr.msra.gmra.mrb[16].mxu0 %v4045_v40  ;;  %v4034_v11 = vmax.f32 %v3990_v31, 0.0 }
 0x5ec   :  { %v3985_v24 = vadd.f32 %v5027_v6, %v3984_v21  ;;  %v4032_v39 = vmax.f32 %v3982_v53, 0.0 }
 0x5ed   :  { %v4035_v26 = vmax.f32 %v3993_v61, 0.0 }
 0x5ee   :  { %v4033_v3 = vmax.f32 %v3985_v24, 0.0 }
 0x5ef   :  { %v4047_v50 = vpack.c.bf16 %v4035_v26, %v4034_v11 }
 0x5f0   :  { %v4046_v62 = vpack.c.bf16 %v4033_v3, %v4032_v39  ;;  %v5846_v58 = vpop.f32.mrb[24].mxu1 }
 0x5f1   :  { %v4006_v27 = vadd.f32 %v5846_v58, %v5027_v6  ;;  %v3997_v29 = vpop.f32.mrb[25].mxu1 }
 0x5f2   :  { %v3998_v23 = vadd.f32 %v5027_v6, %v3997_v29  ;;  %v5847_v49 = vpop.f32.mrb[26].mxu1  ;;  %5872 = vmatprep.mubr.bf16.mxu0 %v4046_v62 }
 0x5f3   :  { %v4009_v4 = vadd.f32 %v5847_v49, %v5027_v6  ;;  %v4000_v5 = vpop.f32.mrb[27].mxu1  ;;  %5873 = vmatmul.mubr.bf16.gmra.mrb[20].mxu0 %v4047_v50  ;;  %v4038_v52 = vmax.f32 %v4006_v27, 0.0 }
 0x5f4   :  { %v4001_v45 = vadd.f32 %v5027_v6, %v4000_v5  ;;  %v4036_v37 = vmax.f32 %v3998_v23, 0.0 }
 0x5f5   :  { %v4039_v7 = vmax.f32 %v4009_v4, 0.0 }
 0x5f6   :  { %v4037_v42 = vmax.f32 %v4001_v45, 0.0 }
 0x5f7   :  { %v4049_v9 = vpack.c.bf16 %v4039_v7, %v4038_v52 }
 0x5f8   :  { %v4048_v13 = vpack.c.bf16 %v4037_v42, %v4036_v37  ;;  %v5850_v10 = vpop.f32.mrb[28].mxu1 }
 0x5f9   :  { %v4022_v22 = vadd.f32 %v5850_v10, %v5027_v6  ;;  %v4013_v57 = vpop.f32.mrb[29].mxu1 }
 0x5fa   :  { %v4014_v25 = vadd.f32 %v5027_v6, %v4013_v57  ;;  %v5851_v33 = vpop.f32.mrb[30].mxu1  ;;  %5876 = vmatprep.mubr.bf16.mxu1 %v4048_v13 }
 0x5fb   :  { %v4025_v41 = vadd.f32 %v5851_v33, %v5027_v6  ;;  %v4016_v36 = vpop.f32.mrb[31].mxu1  ;;  %5877 = vmatmul.mubr.bf16.vlgmr.msra.gmra.mrb[32].mxu1 %v4049_v9  ;;  %v4042_v12 = vmax.f32 %v4022_v22, 0.0 }
 0x5fc   :  { %v4017_v35 = vadd.f32 %v5027_v6, %v4016_v36  ;;  %v4040_v0 = vmax.f32 %v4014_v25, 0.0 }
 0x5fd   :  { %v4043_v56 = vmax.f32 %v4025_v41, 0.0 }
 0x5fe   :  { %v4041_v51 = vmax.f32 %v4017_v35, 0.0 }
 0x5ff   :  { %v4051_v16 = vpack.c.bf16 %v4043_v56, %v4042_v12 }
 0x600   :  { %v4050_v17 = vpack.c.bf16 %v4041_v51, %v4040_v0 }
 0x602   :  { %5880 = vmatprep.mubr.bf16.mxu1 %v4050_v17 }
 0x603   :  { %5881 = vmatmul.mubr.bf16.gmra.mrb[36].mxu1 %v4051_v16 }
 0x6be   :  { %v5870_v43 = vpop.f32.mrb[16].mxu0 }
 0x6bf   :  { %v4166_v1 = vadd.f32 %v5870_v43, %v5036_v19  ;;  %v4157_v44 = vpop.f32.mrb[17].mxu0 }
 0x6c0   :  { %v4158_v34 = vadd.f32 %v5036_v19, %v4157_v44  ;;  %v5871_v14 = vpop.f32.mrb[18].mxu0 }
 0x6c1   :  { %v4169_v15 = vadd.f32 %v5871_v14, %v5036_v19  ;;  %v4160_v47 = vpop.f32.mrb[19].mxu0  ;;  %v4222_v48 = vmax.f32 %v4166_v1, 0.0 }
 0x6c2   :  { %v4161_v6 = vadd.f32 %v5036_v19, %v4160_v47  ;;  %v4220_v20 = vmax.f32 %v4158_v34, 0.0 }
 0x6c3   :  { %v4223_v18 = vmax.f32 %v4169_v15, 0.0 }
 0x6c4   :  { %v4221_v38 = vmax.f32 %v4161_v6, 0.0 }
 0x6c5   :  { %v5093_v54 = vpack.c.bf16 %v4223_v18, %v4222_v48 }
 0x6c6   :  { %v5088_v59 = vpack.c.bf16 %v4221_v38, %v4220_v20  ;;  %v5874_v28 = vpop.f32.mrb[20].mxu0 }
 0x6c7   :  { %5125 = vst [vmem:[#allocation20 + $0x8] sm:$0xff] %v5093_v54   ;;  %v4182_v30 = vadd.f32 %v5874_v28, %v5036_v19  ;;  %v4173_v32 = vpop.f32.mrb[21].mxu0 }
 0x6c8   :  { %5089 = vst [vmem:[#allocation20] sm:$0xff] %v5088_v59   ;;  %v4174_v2 = vadd.f32 %v5036_v19, %v4173_v32  ;;  %v5875_v55 = vpop.f32.mrb[22].mxu0 }
 0x6c9   :  { %v4185_v40 = vadd.f32 %v5875_v55, %v5036_v19  ;;  %v4176_v63 = vpop.f32.mrb[23].mxu0  ;;  %v4226_v31 = vmax.f32 %v4182_v30, 0.0 }
 0x6ca   :  { %v4177_v8 = vadd.f32 %v5036_v19, %v4176_v63  ;;  %v4224_v53 = vmax.f32 %v4174_v2, 0.0 }
 0x6cb   :  { %v4227_v46 = vmax.f32 %v4185_v40, 0.0 }
 0x6cc   :  { %v4225_v60 = vmax.f32 %v4177_v8, 0.0 }
 0x6cd   :  { %v5103_v61 = vpack.c.bf16 %v4227_v46, %v4226_v31 }
 0x6ce   :  { %v5098_v21 = vpack.c.bf16 %v4225_v60, %v4224_v53  ;;  %v5878_v24 = vpop.f32.mrb[32].mxu1 }
 0x6cf   :  { %5127 = vst [vmem:[#allocation20 + $0x18] sm:$0xff] %v5103_v61   ;;  %v4198_v11 = vadd.f32 %v5878_v24, %v5036_v19  ;;  %v4189_v26 = vpop.f32.mrb[33].mxu1 }
 0x6d0   :  { %5126 = vst [vmem:[#allocation20 + $0x10] sm:$0xff] %v5098_v21   ;;  %v4190_v39 = vadd.f32 %v5036_v19, %v4189_v26  ;;  %v5879_v3 = vpop.f32.mrb[34].mxu1 }
 0x6d1   :  { %v4201_v50 = vadd.f32 %v5879_v3, %v5036_v19  ;;  %v4192_v62 = vpop.f32.mrb[35].mxu1  ;;  %v4230_v27 = vmax.f32 %v4198_v11, 0.0 }
 0x6d2   :  { %v4193_v58 = vadd.f32 %v5036_v19, %v4192_v62  ;;  %v4228_v23 = vmax.f32 %v4190_v39, 0.0 }
 0x6d3   :  { %v4231_v29 = vmax.f32 %v4201_v50, 0.0 }
 0x6d4   :  { %v4229_v49 = vmax.f32 %v4193_v58, 0.0 }
 0x6d5   :  { %v5113_v4 = vpack.c.bf16 %v4231_v29, %v4230_v27 }
 0x6d6   :  { %v5108_v5 = vpack.c.bf16 %v4229_v49, %v4228_v23  ;;  %v5882_v45 = vpop.f32.mrb[36].mxu1 }
 0x6d7   :  { %5129 = vst [vmem:[#allocation20 + $0x28] sm:$0xff] %v5113_v4   ;;  %v4214_v52 = vadd.f32 %v5882_v45, %v5036_v19  ;;  %v4205_v7 = vpop.f32.mrb[37].mxu1 }
 0x6d8   :  { %5128 = vst [vmem:[#allocation20 + $0x20] sm:$0xff] %v5108_v5   ;;  %v4206_v37 = vadd.f32 %v5036_v19, %v4205_v7  ;;  %v5883_v42 = vpop.f32.mrb[38].mxu1 }
 0x6d9   :  { %v4217_v9 = vadd.f32 %v5883_v42, %v5036_v19  ;;  %v4208_v13 = vpop.f32.mrb[39].mxu1  ;;  %v4234_v22 = vmax.f32 %v4214_v52, 0.0 }
 0x6da   :  { %v4209_v10 = vadd.f32 %v5036_v19, %v4208_v13  ;;  %v4232_v25 = vmax.f32 %v4206_v37, 0.0 }
 0x6db   :  { %v4235_v57 = vmax.f32 %v4217_v9, 0.0 }
 0x6dc   :  { %v4233_v33 = vmax.f32 %v4209_v10, 0.0 }
 0x6dd   :  { %v5123_v41 = vpack.c.bf16 %v4235_v57, %v4234_v22 }
 0x6de   :  { %v5118_v36 = vpack.c.bf16 %v4233_v33, %v4232_v25 }
 0x6df   :  { %5131 = vst [vmem:[#allocation20 + $0x38] sm:$0xff] %v5123_v41  }
 0x6e0   :  { %5130 = vst [vmem:[#allocation20 + $0x30] sm:$0xff] %v5118_v36  }
 0x6e1   :  { %6331 = shalt.err (!%p6328_p8)
}
 0x6e2   :  { %s6332_s4 = scalar_lea.hbm %s7855_s14, 1024 }
 0x6e3   :  { %p6333_p9 = scmp.ne.s32.totalorder %s7855_s14, %s6332_s4  ;;  %p6336_p10 = scmp.lt.u32.totalorder %s6332_s4, %s7855_s14 }
 0x6e5   :  { %p6338_p11 = pnand %p6336_p10, %p6333_p9 }
 0x6e7   :  { %6341 = shalt.err (!%p6338_p11)
}
 0x6e8   :  { %s7918_s28 = smov 4   ;;  %s7919_s3 = smov 64  }
 0x6e9   :  { %4327 = dma.vmem_to_hbm [thread:$0]  %s4322_s18, 1024, %s7855_s14, [#allocation8], %s7919_s3, %s7919_s3, %s7918_s28  }
 0x6ea   :  { %6352 = dma.done.wait [#allocation8], 1024  }
 0x6eb   :  { %6353 = vsyncadd [#allocation8], 4294966272 }
 0x6ec   :  { %4331 = vsyncpa [#allocation7], 1 }
 0x6ed   :  { %4332 = vsyncpa [#allocation10], 1 }
 0x6ee   :  { %4333 = vsyncpa [#allocation13], 1 }
 0x6ef   :  { %4334 = vsyncpa [#allocation16], 1 }
 0x6f0   :  { %4335 = vsyncpa [#allocation19], 1 }
 0x6f1   :  { %4336 = vsyncpa [#allocation8], 1 }

</bundles_post_ra>
